<compile_context>
chip_gen: v6e
topology: v6e:2x2x1
jax: 0.10.0
libtpu: 0.0.40
codegen_flags: <defaults>
</compile_context>

<pallas_src>
import functools

import numpy as np
import jax
import jax.numpy as jnp
from jax import lax
from jax.experimental import pallas as pl
from jax.experimental.pallas import tpu as pltpu

# --- hyper-parameters matching simple_Edge(input_size=F_IN) defaults ---
F_IN = 4          # input_size (features per part)
H = 16            # nhidden
H2 = H // 2
C_OUT = 1         # out_channels
K = 8             # DynamicEdgeConv k
ACT_OUT = True    # sigmoid output
# runbatchnorm=False (default) -> BatchNorm1d branch is never taken.

# packed parameter slab layout (rows x H); multi-row blocks start 8-aligned.
R_W1, R_W2, R_W3, R_WEA, R_WEB, R_WO1 = 0, 8, 24, 40, 56, 72
R_B2, R_B3, R_BE, R_BO1, R_WO2, R_BO2 = 88, 89, 90, 91, 92, 93
THETA_ROWS = 96
INT32_MAX = 2147483647


def _elu(z):
    # torch.nn.ELU(alpha=1.0); clamp keeps the not-taken exp branch finite.
    return jnp.where(z > 0, z, jnp.exp(jnp.minimum(z, 0.0)) - 1.0)


def _simple_edge_kernel(x_ref, theta_ref, o_ref, *, parts):
    P = parts
    n = x_ref.shape[0]          # Bt * P rows in this step
    Bt = n // P

    # ---- single resident weight slab, static 8-aligned row slices ----
    w1t = theta_ref[R_W1:R_W1 + F_IN, :]
    w2t = theta_ref[R_W2:R_W2 + H, :]
    w3t = theta_ref[R_W3:R_W3 + H, :]
    weat = theta_ref[R_WEA:R_WEA + H, :]
    webt = theta_ref[R_WEB:R_WEB + H, :]
    wo1t = theta_ref[R_WO1:R_WO1 + H, :]          # cols H2: are zero padding
    b2 = theta_ref[R_B2:R_B2 + 1, :]
    b3 = theta_ref[R_B3:R_B3 + 1, :]
    be = theta_ref[R_BE:R_BE + 1, :]
    bo1 = theta_ref[R_BO1:R_BO1 + 1, :]           # cols H2: are zero padding
    wo2r = theta_ref[R_WO2:R_WO2 + 1, :]          # cols H2: are zero padding
    bo2 = theta_ref[R_BO2:R_BO2 + 1, 0:1]         # (1,1) scalar bias

    x = x_ref[...]                                                      # (Bt*P, F_IN)

    # ---- part_encode for all Bt graphs at once (big-M matmuls) ----
    h = _elu(jnp.dot(x, w1t, preferred_element_type=jnp.float32))
    h = _elu(jnp.dot(h, w2t, preferred_element_type=jnp.float32) + b2)
    h = _elu(jnp.dot(h, w3t, preferred_element_type=jnp.float32) + b3)  # (Bt*P, H)

    # edge-MLP split:  msg_ij = ELU(a_i - bm_i + bm_j + be)
    a2 = jnp.dot(h, weat, preferred_element_type=jnp.float32)           # (Bt*P, H)
    bm2 = jnp.dot(h, webt, preferred_element_type=jnp.float32)          # (Bt*P, H)

    h3 = h.reshape(Bt, P, H)
    bm3 = bm2.reshape(Bt, P, H)

    # ---- per-graph relative squared distances (no explicit h.T) ----
    # d[b,i,j] = ||h_j||^2 - 2 h_i.h_j  (dropping ||h_i||^2 keeps row-wise order)
    g = lax.dot_general(h3, h3, (((2,), (2,)), ((0,), (0,))),
                        preferred_element_type=jnp.float32)             # (Bt, P, P)
    ones_h = jnp.ones((Bt, 1, H), jnp.float32)
    sq_j = lax.dot_general(ones_h, h3 * h3, (((2,), (2,)), ((0,), (0,))),
                           preferred_element_type=jnp.float32)          # (Bt, 1, P)
    d = sq_j - 2.0 * g                                                  # (Bt, P, P)

    # ---- k-NN (self included) via a single packed-key argmin per iteration ----
    # order-preserving int32 key: sortable float bits, low bits carry column idx
    nbits = max(1, (P - 1).bit_length())
    bits = pltpu.bitcast(d, jnp.int32)
    skey = jnp.where(bits < 0, bits ^ jnp.int32(0x7FFFFFFF), bits)
    iota_j = lax.broadcasted_iota(jnp.int32, (Bt, P, P), 2)
    key = (skey & jnp.int32(-(1 << nbits))) | iota_j

    m = jnp.full((Bt, P, H), -jnp.inf, dtype=jnp.float32)
    for _ in range(K):                       # keep statically unrolled (LLO visibility)
        kmin = jnp.min(key, axis=2, keepdims=True)           # one XLU reduce / iter
        sel = key == kmin                                    # exact one-hot per row
        picked = lax.dot_general(sel.astype(jnp.float32), bm3,
                                 (((2,), (1,)), ((0,), (0,))),
                                 preferred_element_type=jnp.float32)    # (Bt, P, H)
        m = jnp.maximum(m, picked)
        key = jnp.where(sel, jnp.int32(INT32_MAX), key)

    # ELU is strictly monotone, so max_j ELU(z_ij) == ELU(max_j z_ij)
    feats = _elu(a2 - bm2 + be + m.reshape(n, H))                       # (Bt*P, H)

    # ---- avg_pool_x per graph as a block-diagonal averaging matmul (MXU) ----
    r_idx = lax.broadcasted_iota(jnp.int32, (Bt, n), 1)
    g_lo = lax.broadcasted_iota(jnp.int32, (Bt, n), 0) * P
    pool_mat = jnp.where((r_idx >= g_lo) & (r_idx < g_lo + P), 1.0 / P, 0.0)
    pooled = jnp.dot(pool_mat, feats, preferred_element_type=jnp.float32)   # (Bt, H)

    # ---- output MLP + sigmoid, lane-dense (1, Bt) store ----
    inter = _elu(jnp.dot(pooled, wo1t, preferred_element_type=jnp.float32) + bo1)  # (Bt, H)
    o_row = lax.dot_general(wo2r, inter, (((1,), (1,)), ((), ())),
                            preferred_element_type=jnp.float32) + bo2   # (1, Bt)
    if ACT_OUT:
        o_row = 1.0 / (1.0 + jnp.exp(-o_row))
    o_ref[0] = o_row


def _pack_params(params):
    """Pack all weights/biases into one (THETA_ROWS, H) f32 slab."""
    w1t = jnp.zeros((8, H), jnp.float32).at[:F_IN, :].set(params["w1"].T)
    wo1t = jnp.pad(params["wo1"].T, ((0, 0), (0, H - H2)))
    bo1 = jnp.pad(params["bo1"].reshape(1, H2), ((0, 0), (0, H - H2)))
    wo2r = jnp.pad(params["wo2"].reshape(1, H2), ((0, 0), (0, H - H2)))
    bo2 = jnp.zeros((1, H), jnp.float32).at[0, 0].set(params["bo2"][0])
    rows = [
        w1t,                              # 0:8   (rows F_IN: are zero)
        params["w2"].T,                   # 8:24
        params["w3"].T,                   # 24:40
        params["we"][:, :H].T,            # 40:56  acts on x_i
        params["we"][:, H:].T,            # 56:72  acts on (x_j - x_i)
        wo1t,                             # 72:88
        params["b2"].reshape(1, H),       # 88
        params["b3"].reshape(1, H),       # 89
        params["be"].reshape(1, H),       # 90
        bo1,                              # 91
        wo2r,                             # 92
        bo2,                              # 93
        jnp.zeros((2, H), jnp.float32),   # 94:96 pad to 8-multiple
    ]
    return jnp.concatenate(rows, axis=0).astype(jnp.float32)


def simple_edge_forward(x, params, max_graphs_per_step=128):
    B, D = x.shape
    assert D % F_IN == 0
    P = D // F_IN
    x2 = x.reshape(B * P, F_IN).astype(jnp.float32)

    # batch up to 128 graphs per grid step to amortize per-step overhead
    Bt = min(B, max_graphs_per_step)
    n_steps = (B + Bt - 1) // Bt
    Bpad = n_steps * Bt
    if Bpad != B:
        x2 = jnp.pad(x2, ((0, (Bpad - B) * P), (0, 0)))

    theta = _pack_params(params)
    kernel = functools.partial(_simple_edge_kernel, parts=P)

    out = pl.pallas_call(
        kernel,
        out_shape=jax.ShapeDtypeStruct((n_steps, 1, Bt), jnp.float32),
        grid=(n_steps,),
        in_specs=[
            pl.BlockSpec((Bt * P, F_IN), lambda b: (b, 0)),
            pl.BlockSpec((THETA_ROWS, H), lambda b: (0, 0)),
        ],
        out_specs=pl.BlockSpec((1, 1, Bt), lambda b: (b, 0, 0)),
        compiler_params=pltpu.CompilerParams(dimension_semantics=("parallel",)),
    )(x2, theta)
    return out.reshape(Bpad)[:B].reshape(B, C_OUT)


# ------------------------- parameter init (deterministic) -------------------------
def _linear_init(key, out_f, in_f, bias=True):
    bound = 1.0 / float(np.sqrt(in_f))
    kw, kb = jax.random.split(key)
    w = jax.random.uniform(kw, (out_f, in_f), jnp.float32, -bound, bound)
    if bias:
        b = jax.random.uniform(kb, (out_f,), jnp.float32, -bound, bound)
        return w, b
    return w, None


def init_params(key):
    k1, k2, k3, ke, ko1, ko2 = jax.random.split(key, 6)
    w1, _ = _linear_init(k1, H, F_IN, bias=False)
    w2, b2 = _linear_init(k2, H, H)
    w3, b3 = _linear_init(k3, H, H)
    we, be = _linear_init(ke, H, 2 * H)
    wo1, bo1 = _linear_init(ko1, H2, H)
    wo2, bo2 = _linear_init(ko2, C_OUT, H2)
    return dict(w1=w1, w2=w2, b2=b2, w3=w3, b3=b3, we=we, be=be,
                wo1=wo1, bo1=bo1, wo2=wo2, bo2=bo2)


# ------------------------- pure-JAX reference (independent path) -------------------------
def reference_forward(x, params):
    B, D = x.shape
    P = D // F_IN
    h = x.reshape(B * P, F_IN)
    h = jax.nn.elu(h @ params["w1"].T)
    h = jax.nn.elu(h @ params["w2"].T + params["b2"])
    h = jax.nn.elu(h @ params["w3"].T + params["b3"])
    h = h.reshape(B, P, H)

    def per_graph(hb):
        d = jnp.sum((hb[:, None, :] - hb[None, :, :]) ** 2, axis=-1)
        _, idx = lax.top_k(-d, K)
        x_i = jnp.broadcast_to(hb[:, None, :], (P, K, H))
        x_j = hb[idx]
        msg = jax.nn.elu(jnp.concatenate([x_i, x_j - x_i], axis=-1) @ params["we"].T + params["be"])
        return jnp.max(msg, axis=1)

    feats = jax.vmap(per_graph)(h)
    pooled = feats.mean(axis=1)
    o = jax.nn.elu(pooled @ params["wo1"].T + params["bo1"])
    o = o @ params["wo2"].T + params["bo2"]
    if ACT_OUT:
        o = jax.nn.sigmoid(o)
    return o


if __name__ == "__main__":
    B = 2
    P = 32  # parts per event; x has shape (B, P * F_IN)
    key = jax.random.PRNGKey(0)
    k_x, k_params = jax.random.split(key)
    params = init_params(k_params)
    x = jax.random.normal(k_x, (B, P * F_IN), dtype=jnp.float32)

    out = simple_edge_forward(x, params)
    out = jax.block_until_ready(out)
    assert out.shape == (B, C_OUT)

    ref = reference_forward(x, params)
    np.testing.assert_allclose(np.asarray(out), np.asarray(ref), rtol=1e-4, atol=1e-4)
    print("KERNEL_OK")
</pallas_src>

<mosaic_0001>
module attributes {stable_mosaic.version = 11 : i64} {
  func.func @_simple_edge_kernel(%arg0: i32, %arg1: memref<64x4xf32, #tpu.memory_space<vmem>>, %arg2: memref<96x16xf32, #tpu.memory_space<vmem>>, %arg3: memref<1x1x2xf32, #tpu.memory_space<vmem>>) attributes {dimension_semantics = [#tpu.dimension_semantics<parallel>], iteration_bounds = array<i64: 1>, scalar_prefetch = 0 : i64, scratch_operands = 0 : i64, tpu.core_type = #tpu.core_type<tc>, window_params = [{transform_indices = @transform_0, window_bounds = array<i64: 64, 4>}, {pipeline_mode = #tpu.pipeline_mode<synchronous>, transform_indices = @transform_1, window_bounds = array<i64: 96, 16>}, {transform_indices = @transform_2, window_bounds = array<i64: 1, 1, 2>}]} {
    %c0 = arith.constant 0 : index
    %c0_0 = arith.constant 0 : index
    %0 = vector.load %arg2[%c0, %c0_0] : memref<96x16xf32, #tpu.memory_space<vmem>>, vector<4x16xf32>
    %c8 = arith.constant 8 : index
    %c0_1 = arith.constant 0 : index
    %1 = vector.load %arg2[%c8, %c0_1] : memref<96x16xf32, #tpu.memory_space<vmem>>, vector<16x16xf32>
    %c24 = arith.constant 24 : index
    %c0_2 = arith.constant 0 : index
    %2 = vector.load %arg2[%c24, %c0_2] : memref<96x16xf32, #tpu.memory_space<vmem>>, vector<16x16xf32>
    %c40 = arith.constant 40 : index
    %c0_3 = arith.constant 0 : index
    %3 = vector.load %arg2[%c40, %c0_3] : memref<96x16xf32, #tpu.memory_space<vmem>>, vector<16x16xf32>
    %c56 = arith.constant 56 : index
    %c0_4 = arith.constant 0 : index
    %4 = vector.load %arg2[%c56, %c0_4] : memref<96x16xf32, #tpu.memory_space<vmem>>, vector<16x16xf32>
    %c72 = arith.constant 72 : index
    %c0_5 = arith.constant 0 : index
    %5 = vector.load %arg2[%c72, %c0_5] : memref<96x16xf32, #tpu.memory_space<vmem>>, vector<16x16xf32>
    %c88 = arith.constant 88 : index
    %c0_6 = arith.constant 0 : index
    %6 = vector.load %arg2[%c88, %c0_6] : memref<96x16xf32, #tpu.memory_space<vmem>>, vector<1x16xf32>
    %c89 = arith.constant 89 : index
    %c0_7 = arith.constant 0 : index
    %7 = vector.load %arg2[%c89, %c0_7] : memref<96x16xf32, #tpu.memory_space<vmem>>, vector<1x16xf32>
    %c90 = arith.constant 90 : index
    %c0_8 = arith.constant 0 : index
    %8 = vector.load %arg2[%c90, %c0_8] : memref<96x16xf32, #tpu.memory_space<vmem>>, vector<1x16xf32>
    %c91 = arith.constant 91 : index
    %c0_9 = arith.constant 0 : index
    %9 = vector.load %arg2[%c91, %c0_9] : memref<96x16xf32, #tpu.memory_space<vmem>>, vector<1x16xf32>
    %c92 = arith.constant 92 : index
    %c0_10 = arith.constant 0 : index
    %10 = vector.load %arg2[%c92, %c0_10] : memref<96x16xf32, #tpu.memory_space<vmem>>, vector<1x16xf32>
    %c93 = arith.constant 93 : index
    %c0_11 = arith.constant 0 : index
    %11 = vector.load %arg2[%c93, %c0_11] : memref<96x16xf32, #tpu.memory_space<vmem>>, vector<1x1xf32>
    %c0_12 = arith.constant 0 : index
    %c0_13 = arith.constant 0 : index
    %12 = vector.load %arg1[%c0_12, %c0_13] : memref<64x4xf32, #tpu.memory_space<vmem>>, vector<64x4xf32>
    %cst = arith.constant dense<0.000000e+00> : vector<64x16xf32>
    %13 = tpu.matmul %12, %0, %cst {dimension_numbers = #tpu.dot_dimension_numbers<[1], [0], [0], [1], [0, 0, 1, 1], [], []>} : vector<64x4xf32>, vector<4x16xf32>, vector<64x16xf32> -> vector<64x16xf32>
    %cst_14 = arith.constant 0.000000e+00 : f32
    %14 = vector.broadcast %cst_14 : f32 to vector<64x16xf32>
    %15 = arith.cmpf ogt, %13, %14 : vector<64x16xf32>
    %cst_15 = arith.constant 0.000000e+00 : f32
    %16 = vector.broadcast %cst_15 : f32 to vector<64x16xf32>
    %17 = arith.minimumf %13, %16 : vector<64x16xf32>
    %18 = math.exp %17 : vector<64x16xf32>
    %cst_16 = arith.constant 1.000000e+00 : f32
    %19 = vector.broadcast %cst_16 : f32 to vector<64x16xf32>
    %20 = arith.subf %18, %19 : vector<64x16xf32>
    %21 = arith.select %15, %13, %20 : vector<64x16xi1>, vector<64x16xf32>
    %cst_17 = arith.constant dense<0.000000e+00> : vector<64x16xf32>
    %22 = tpu.matmul %21, %1, %cst_17 {dimension_numbers = #tpu.dot_dimension_numbers<[1], [0], [0], [1], [0, 0, 1, 1], [], []>} : vector<64x16xf32>, vector<16x16xf32>, vector<64x16xf32> -> vector<64x16xf32>
    %23 = vector.broadcast %6 : vector<1x16xf32> to vector<64x16xf32>
    %24 = arith.addf %22, %23 : vector<64x16xf32>
    %cst_18 = arith.constant 0.000000e+00 : f32
    %25 = vector.broadcast %cst_18 : f32 to vector<64x16xf32>
    %26 = arith.cmpf ogt, %24, %25 : vector<64x16xf32>
    %cst_19 = arith.constant 0.000000e+00 : f32
    %27 = vector.broadcast %cst_19 : f32 to vector<64x16xf32>
    %28 = arith.minimumf %24, %27 : vector<64x16xf32>
    %29 = math.exp %28 : vector<64x16xf32>
    %cst_20 = arith.constant 1.000000e+00 : f32
    %30 = vector.broadcast %cst_20 : f32 to vector<64x16xf32>
    %31 = arith.subf %29, %30 : vector<64x16xf32>
    %32 = arith.select %26, %24, %31 : vector<64x16xi1>, vector<64x16xf32>
    %cst_21 = arith.constant dense<0.000000e+00> : vector<64x16xf32>
    %33 = tpu.matmul %32, %2, %cst_21 {dimension_numbers = #tpu.dot_dimension_numbers<[1], [0], [0], [1], [0, 0, 1, 1], [], []>} : vector<64x16xf32>, vector<16x16xf32>, vector<64x16xf32> -> vector<64x16xf32>
    %34 = vector.broadcast %7 : vector<1x16xf32> to vector<64x16xf32>
    %35 = arith.addf %33, %34 : vector<64x16xf32>
    %cst_22 = arith.constant 0.000000e+00 : f32
    %36 = vector.broadcast %cst_22 : f32 to vector<64x16xf32>
    %37 = arith.cmpf ogt, %35, %36 : vector<64x16xf32>
    %cst_23 = arith.constant 0.000000e+00 : f32
    %38 = vector.broadcast %cst_23 : f32 to vector<64x16xf32>
    %39 = arith.minimumf %35, %38 : vector<64x16xf32>
    %40 = math.exp %39 : vector<64x16xf32>
    %cst_24 = arith.constant 1.000000e+00 : f32
    %41 = vector.broadcast %cst_24 : f32 to vector<64x16xf32>
    %42 = arith.subf %40, %41 : vector<64x16xf32>
    %43 = arith.select %37, %35, %42 : vector<64x16xi1>, vector<64x16xf32>
    %cst_25 = arith.constant dense<0.000000e+00> : vector<64x16xf32>
    %44 = tpu.matmul %43, %3, %cst_25 {dimension_numbers = #tpu.dot_dimension_numbers<[1], [0], [0], [1], [0, 0, 1, 1], [], []>} : vector<64x16xf32>, vector<16x16xf32>, vector<64x16xf32> -> vector<64x16xf32>
    %cst_26 = arith.constant dense<0.000000e+00> : vector<64x16xf32>
    %45 = tpu.matmul %43, %4, %cst_26 {dimension_numbers = #tpu.dot_dimension_numbers<[1], [0], [0], [1], [0, 0, 1, 1], [], []>} : vector<64x16xf32>, vector<16x16xf32>, vector<64x16xf32> -> vector<64x16xf32>
    %46 = vector.shape_cast %43 : vector<64x16xf32> to vector<2x32x16xf32>
    %47 = vector.shape_cast %45 : vector<64x16xf32> to vector<2x32x16xf32>
    %cst_27 = arith.constant dense<0.000000e+00> : vector<2x32x32xf32>
    %48 = tpu.matmul %46, %46, %cst_27 {dimension_numbers = #tpu.dot_dimension_numbers<[2], [2], [1], [1], [0, 0, 0, 1, 1, 1], [0], [0]>} : vector<2x32x16xf32>, vector<2x32x16xf32>, vector<2x32x32xf32> -> vector<2x32x32xf32>
    %cst_28 = arith.constant 1.000000e+00 : f32
    %49 = vector.broadcast %cst_28 : f32 to vector<2x1x16xf32>
    %50 = arith.mulf %46, %46 : vector<2x32x16xf32>
    %cst_29 = arith.constant dense<0.000000e+00> : vector<2x1x32xf32>
    %51 = tpu.matmul %49, %50, %cst_29 {dimension_numbers = #tpu.dot_dimension_numbers<[2], [2], [1], [1], [0, 0, 0, 1, 1, 1], [0], [0]>} : vector<2x1x16xf32>, vector<2x32x16xf32>, vector<2x1x32xf32> -> vector<2x1x32xf32>
    %cst_30 = arith.constant 2.000000e+00 : f32
    %52 = vector.broadcast %cst_30 : f32 to vector<2x32x32xf32>
    %53 = arith.mulf %52, %48 : vector<2x32x32xf32>
    %54 = vector.broadcast %51 : vector<2x1x32xf32> to vector<2x32x32xf32>
    %55 = arith.subf %54, %53 : vector<2x32x32xf32>
    %56 = tpu.bitcast %55 : vector<2x32x32xf32> -> vector<2x32x32xi32>
    %c0_i32 = arith.constant 0 : i32
    %57 = vector.broadcast %c0_i32 : i32 to vector<2x32x32xi32>
    %58 = arith.cmpi slt, %56, %57 : vector<2x32x32xi32>
    %c2147483647_i32 = arith.constant 2147483647 : i32
    %59 = vector.broadcast %c2147483647_i32 : i32 to vector<2x32x32xi32>
    %60 = arith.xori %56, %59 : vector<2x32x32xi32>
    %61 = arith.select %58, %60, %56 : vector<2x32x32xi1>, vector<2x32x32xi32>
    %62 = tpu.iota {dimensions = array<i32: 2>} : vector<2x32x32xi32>
    %c-32_i32 = arith.constant -32 : i32
    %63 = vector.broadcast %c-32_i32 : i32 to vector<2x32x32xi32>
    %64 = arith.andi %61, %63 : vector<2x32x32xi32>
    %65 = arith.ori %64, %62 : vector<2x32x32xi32>
    %cst_31 = arith.constant 0xFF800000 : f32
    %66 = vector.broadcast %cst_31 : f32 to vector<2x32x16xf32>
    %cst_32 = arith.constant dense<2147483647> : vector<2x32xi32>
    %67 = vector.multi_reduction <minsi>, %65, %cst_32 [2] : vector<2x32x32xi32> to vector<2x32xi32>
    %68 = vector.shape_cast %67 : vector<2x32xi32> to vector<2x32x1xi32>
    %69 = vector.broadcast %68 : vector<2x32x1xi32> to vector<2x32x32xi32>
    %70 = arith.cmpi eq, %65, %69 : vector<2x32x32xi32>
    %71 = arith.extui %70 : vector<2x32x32xi1> to vector<2x32x32xi32>
    %72 = arith.sitofp %71 : vector<2x32x32xi32> to vector<2x32x32xf32>
    %cst_33 = arith.constant dense<0.000000e+00> : vector<2x32x16xf32>
    %73 = tpu.matmul %72, %47, %cst_33 {dimension_numbers = #tpu.dot_dimension_numbers<[2], [1], [1], [2], [0, 0, 0, 1, 1, 2], [0], [0]>} : vector<2x32x32xf32>, vector<2x32x16xf32>, vector<2x32x16xf32> -> vector<2x32x16xf32>
    %74 = arith.maximumf %66, %73 : vector<2x32x16xf32>
    %c2147483647_i32_34 = arith.constant 2147483647 : i32
    %75 = vector.broadcast %c2147483647_i32_34 : i32 to vector<2x32x32xi32>
    %76 = arith.select %70, %75, %65 : vector<2x32x32xi1>, vector<2x32x32xi32>
    %cst_35 = arith.constant dense<2147483647> : vector<2x32xi32>
    %77 = vector.multi_reduction <minsi>, %76, %cst_35 [2] : vector<2x32x32xi32> to vector<2x32xi32>
    %78 = vector.shape_cast %77 : vector<2x32xi32> to vector<2x32x1xi32>
    %79 = vector.broadcast %78 : vector<2x32x1xi32> to vector<2x32x32xi32>
    %80 = arith.cmpi eq, %76, %79 : vector<2x32x32xi32>
    %81 = arith.extui %80 : vector<2x32x32xi1> to vector<2x32x32xi32>
    %82 = arith.sitofp %81 : vector<2x32x32xi32> to vector<2x32x32xf32>
    %cst_36 = arith.constant dense<0.000000e+00> : vector<2x32x16xf32>
    %83 = tpu.matmul %82, %47, %cst_36 {dimension_numbers = #tpu.dot_dimension_numbers<[2], [1], [1], [2], [0, 0, 0, 1, 1, 2], [0], [0]>} : vector<2x32x32xf32>, vector<2x32x16xf32>, vector<2x32x16xf32> -> vector<2x32x16xf32>
    %84 = arith.maximumf %74, %83 : vector<2x32x16xf32>
    %c2147483647_i32_37 = arith.constant 2147483647 : i32
    %85 = vector.broadcast %c2147483647_i32_37 : i32 to vector<2x32x32xi32>
    %86 = arith.select %80, %85, %76 : vector<2x32x32xi1>, vector<2x32x32xi32>
    %cst_38 = arith.constant dense<2147483647> : vector<2x32xi32>
    %87 = vector.multi_reduction <minsi>, %86, %cst_38 [2] : vector<2x32x32xi32> to vector<2x32xi32>
    %88 = vector.shape_cast %87 : vector<2x32xi32> to vector<2x32x1xi32>
    %89 = vector.broadcast %88 : vector<2x32x1xi32> to vector<2x32x32xi32>
    %90 = arith.cmpi eq, %86, %89 : vector<2x32x32xi32>
    %91 = arith.extui %90 : vector<2x32x32xi1> to vector<2x32x32xi32>
    %92 = arith.sitofp %91 : vector<2x32x32xi32> to vector<2x32x32xf32>
    %cst_39 = arith.constant dense<0.000000e+00> : vector<2x32x16xf32>
    %93 = tpu.matmul %92, %47, %cst_39 {dimension_numbers = #tpu.dot_dimension_numbers<[2], [1], [1], [2], [0, 0, 0, 1, 1, 2], [0], [0]>} : vector<2x32x32xf32>, vector<2x32x16xf32>, vector<2x32x16xf32> -> vector<2x32x16xf32>
    %94 = arith.maximumf %84, %93 : vector<2x32x16xf32>
    %c2147483647_i32_40 = arith.constant 2147483647 : i32
    %95 = vector.broadcast %c2147483647_i32_40 : i32 to vector<2x32x32xi32>
    %96 = arith.select %90, %95, %86 : vector<2x32x32xi1>, vector<2x32x32xi32>
    %cst_41 = arith.constant dense<2147483647> : vector<2x32xi32>
    %97 = vector.multi_reduction <minsi>, %96, %cst_41 [2] : vector<2x32x32xi32> to vector<2x32xi32>
    %98 = vector.shape_cast %97 : vector<2x32xi32> to vector<2x32x1xi32>
    %99 = vector.broadcast %98 : vector<2x32x1xi32> to vector<2x32x32xi32>
    %100 = arith.cmpi eq, %96, %99 : vector<2x32x32xi32>
    %101 = arith.extui %100 : vector<2x32x32xi1> to vector<2x32x32xi32>
    %102 = arith.sitofp %101 : vector<2x32x32xi32> to vector<2x32x32xf32>
    %cst_42 = arith.constant dense<0.000000e+00> : vector<2x32x16xf32>
    %103 = tpu.matmul %102, %47, %cst_42 {dimension_numbers = #tpu.dot_dimension_numbers<[2], [1], [1], [2], [0, 0, 0, 1, 1, 2], [0], [0]>} : vector<2x32x32xf32>, vector<2x32x16xf32>, vector<2x32x16xf32> -> vector<2x32x16xf32>
    %104 = arith.maximumf %94, %103 : vector<2x32x16xf32>
    %c2147483647_i32_43 = arith.constant 2147483647 : i32
    %105 = vector.broadcast %c2147483647_i32_43 : i32 to vector<2x32x32xi32>
    %106 = arith.select %100, %105, %96 : vector<2x32x32xi1>, vector<2x32x32xi32>
    %cst_44 = arith.constant dense<2147483647> : vector<2x32xi32>
    %107 = vector.multi_reduction <minsi>, %106, %cst_44 [2] : vector<2x32x32xi32> to vector<2x32xi32>
    %108 = vector.shape_cast %107 : vector<2x32xi32> to vector<2x32x1xi32>
    %109 = vector.broadcast %108 : vector<2x32x1xi32> to vector<2x32x32xi32>
    %110 = arith.cmpi eq, %106, %109 : vector<2x32x32xi32>
    %111 = arith.extui %110 : vector<2x32x32xi1> to vector<2x32x32xi32>
    %112 = arith.sitofp %111 : vector<2x32x32xi32> to vector<2x32x32xf32>
    %cst_45 = arith.constant dense<0.000000e+00> : vector<2x32x16xf32>
    %113 = tpu.matmul %112, %47, %cst_45 {dimension_numbers = #tpu.dot_dimension_numbers<[2], [1], [1], [2], [0, 0, 0, 1, 1, 2], [0], [0]>} : vector<2x32x32xf32>, vector<2x32x16xf32>, vector<2x32x16xf32> -> vector<2x32x16xf32>
    %114 = arith.maximumf %104, %113 : vector<2x32x16xf32>
    %c2147483647_i32_46 = arith.constant 2147483647 : i32
    %115 = vector.broadcast %c2147483647_i32_46 : i32 to vector<2x32x32xi32>
    %116 = arith.select %110, %115, %106 : vector<2x32x32xi1>, vector<2x32x32xi32>
    %cst_47 = arith.constant dense<2147483647> : vector<2x32xi32>
    %117 = vector.multi_reduction <minsi>, %116, %cst_47 [2] : vector<2x32x32xi32> to vector<2x32xi32>
    %118 = vector.shape_cast %117 : vector<2x32xi32> to vector<2x32x1xi32>
    %119 = vector.broadcast %118 : vector<2x32x1xi32> to vector<2x32x32xi32>
    %120 = arith.cmpi eq, %116, %119 : vector<2x32x32xi32>
    %121 = arith.extui %120 : vector<2x32x32xi1> to vector<2x32x32xi32>
    %122 = arith.sitofp %121 : vector<2x32x32xi32> to vector<2x32x32xf32>
    %cst_48 = arith.constant dense<0.000000e+00> : vector<2x32x16xf32>
    %123 = tpu.matmul %122, %47, %cst_48 {dimension_numbers = #tpu.dot_dimension_numbers<[2], [1], [1], [2], [0, 0, 0, 1, 1, 2], [0], [0]>} : vector<2x32x32xf32>, vector<2x32x16xf32>, vector<2x32x16xf32> -> vector<2x32x16xf32>
    %124 = arith.maximumf %114, %123 : vector<2x32x16xf32>
    %c2147483647_i32_49 = arith.constant 2147483647 : i32
    %125 = vector.broadcast %c2147483647_i32_49 : i32 to vector<2x32x32xi32>
    %126 = arith.select %120, %125, %116 : vector<2x32x32xi1>, vector<2x32x32xi32>
    %cst_50 = arith.constant dense<2147483647> : vector<2x32xi32>
    %127 = vector.multi_reduction <minsi>, %126, %cst_50 [2] : vector<2x32x32xi32> to vector<2x32xi32>
    %128 = vector.shape_cast %127 : vector<2x32xi32> to vector<2x32x1xi32>
    %129 = vector.broadcast %128 : vector<2x32x1xi32> to vector<2x32x32xi32>
    %130 = arith.cmpi eq, %126, %129 : vector<2x32x32xi32>
    %131 = arith.extui %130 : vector<2x32x32xi1> to vector<2x32x32xi32>
    %132 = arith.sitofp %131 : vector<2x32x32xi32> to vector<2x32x32xf32>
    %cst_51 = arith.constant dense<0.000000e+00> : vector<2x32x16xf32>
    %133 = tpu.matmul %132, %47, %cst_51 {dimension_numbers = #tpu.dot_dimension_numbers<[2], [1], [1], [2], [0, 0, 0, 1, 1, 2], [0], [0]>} : vector<2x32x32xf32>, vector<2x32x16xf32>, vector<2x32x16xf32> -> vector<2x32x16xf32>
    %134 = arith.maximumf %124, %133 : vector<2x32x16xf32>
    %c2147483647_i32_52 = arith.constant 2147483647 : i32
    %135 = vector.broadcast %c2147483647_i32_52 : i32 to vector<2x32x32xi32>
    %136 = arith.select %130, %135, %126 : vector<2x32x32xi1>, vector<2x32x32xi32>
    %cst_53 = arith.constant dense<2147483647> : vector<2x32xi32>
    %137 = vector.multi_reduction <minsi>, %136, %cst_53 [2] : vector<2x32x32xi32> to vector<2x32xi32>
    %138 = vector.shape_cast %137 : vector<2x32xi32> to vector<2x32x1xi32>
    %139 = vector.broadcast %138 : vector<2x32x1xi32> to vector<2x32x32xi32>
    %140 = arith.cmpi eq, %136, %139 : vector<2x32x32xi32>
    %141 = arith.extui %140 : vector<2x32x32xi1> to vector<2x32x32xi32>
    %142 = arith.sitofp %141 : vector<2x32x32xi32> to vector<2x32x32xf32>
    %cst_54 = arith.constant dense<0.000000e+00> : vector<2x32x16xf32>
    %143 = tpu.matmul %142, %47, %cst_54 {dimension_numbers = #tpu.dot_dimension_numbers<[2], [1], [1], [2], [0, 0, 0, 1, 1, 2], [0], [0]>} : vector<2x32x32xf32>, vector<2x32x16xf32>, vector<2x32x16xf32> -> vector<2x32x16xf32>
    %144 = arith.maximumf %134, %143 : vector<2x32x16xf32>
    %145 = arith.subf %44, %45 : vector<64x16xf32>
    %146 = vector.broadcast %8 : vector<1x16xf32> to vector<64x16xf32>
    %147 = arith.addf %145, %146 : vector<64x16xf32>
    %148 = vector.shape_cast %144 : vector<2x32x16xf32> to vector<64x16xf32>
    %149 = arith.addf %147, %148 : vector<64x16xf32>
    %cst_55 = arith.constant 0.000000e+00 : f32
    %150 = vector.broadcast %cst_55 : f32 to vector<64x16xf32>
    %151 = arith.cmpf ogt, %149, %150 : vector<64x16xf32>
    %cst_56 = arith.constant 0.000000e+00 : f32
    %152 = vector.broadcast %cst_56 : f32 to vector<64x16xf32>
    %153 = arith.minimumf %149, %152 : vector<64x16xf32>
    %154 = math.exp %153 : vector<64x16xf32>
    %cst_57 = arith.constant 1.000000e+00 : f32
    %155 = vector.broadcast %cst_57 : f32 to vector<64x16xf32>
    %156 = arith.subf %154, %155 : vector<64x16xf32>
    %157 = arith.select %151, %149, %156 : vector<64x16xi1>, vector<64x16xf32>
    %158 = tpu.iota {dimensions = array<i32: 1>} : vector<2x64xi32>
    %159 = tpu.iota {dimensions = array<i32: 0>} : vector<2x64xi32>
    %c32_i32 = arith.constant 32 : i32
    %160 = vector.broadcast %c32_i32 : i32 to vector<2x64xi32>
    %161 = arith.muli %159, %160 : vector<2x64xi32>
    %162 = arith.cmpi sge, %158, %161 : vector<2x64xi32>
    %c32_i32_58 = arith.constant 32 : i32
    %163 = vector.broadcast %c32_i32_58 : i32 to vector<2x64xi32>
    %164 = arith.addi %161, %163 : vector<2x64xi32>
    %165 = arith.cmpi slt, %158, %164 : vector<2x64xi32>
    %166 = arith.andi %162, %165 : vector<2x64xi1>
    %cst_59 = arith.constant 3.125000e-02 : f32
    %cst_60 = arith.constant 0.000000e+00 : f32
    %167 = vector.broadcast %cst_59 : f32 to vector<2x64xf32>
    %168 = vector.broadcast %cst_60 : f32 to vector<2x64xf32>
    %169 = arith.select %166, %167, %168 : vector<2x64xi1>, vector<2x64xf32>
    %cst_61 = arith.constant dense<0.000000e+00> : vector<2x16xf32>
    %170 = tpu.matmul %169, %157, %cst_61 {dimension_numbers = #tpu.dot_dimension_numbers<[1], [0], [0], [1], [0, 0, 1, 1], [], []>} : vector<2x64xf32>, vector<64x16xf32>, vector<2x16xf32> -> vector<2x16xf32>
    %cst_62 = arith.constant dense<0.000000e+00> : vector<2x16xf32>
    %171 = tpu.matmul %170, %5, %cst_62 {dimension_numbers = #tpu.dot_dimension_numbers<[1], [0], [0], [1], [0, 0, 1, 1], [], []>} : vector<2x16xf32>, vector<16x16xf32>, vector<2x16xf32> -> vector<2x16xf32>
    %172 = vector.broadcast %9 : vector<1x16xf32> to vector<2x16xf32>
    %173 = arith.addf %171, %172 : vector<2x16xf32>
    %cst_63 = arith.constant 0.000000e+00 : f32
    %174 = vector.broadcast %cst_63 : f32 to vector<2x16xf32>
    %175 = arith.cmpf ogt, %173, %174 : vector<2x16xf32>
    %cst_64 = arith.constant 0.000000e+00 : f32
    %176 = vector.broadcast %cst_64 : f32 to vector<2x16xf32>
    %177 = arith.minimumf %173, %176 : vector<2x16xf32>
    %178 = math.exp %177 : vector<2x16xf32>
    %cst_65 = arith.constant 1.000000e+00 : f32
    %179 = vector.broadcast %cst_65 : f32 to vector<2x16xf32>
    %180 = arith.subf %178, %179 : vector<2x16xf32>
    %181 = arith.select %175, %173, %180 : vector<2x16xi1>, vector<2x16xf32>
    %cst_66 = arith.constant dense<0.000000e+00> : vector<1x2xf32>
    %182 = tpu.matmul %10, %181, %cst_66 {dimension_numbers = #tpu.dot_dimension_numbers<[1], [1], [0], [0], [0, 0, 1, 0], [], []>} : vector<1x16xf32>, vector<2x16xf32>, vector<1x2xf32> -> vector<1x2xf32>
    %183 = vector.broadcast %11 : vector<1x1xf32> to vector<1x2xf32>
    %184 = arith.addf %182, %183 : vector<1x2xf32>
    %cst_67 = arith.constant 0.000000e+00 : f32
    %185 = vector.broadcast %cst_67 : f32 to vector<1x2xf32>
    %186 = arith.subf %185, %184 : vector<1x2xf32>
    %187 = math.exp %186 : vector<1x2xf32>
    %cst_68 = arith.constant 1.000000e+00 : f32
    %188 = vector.broadcast %cst_68 : f32 to vector<1x2xf32>
    %189 = arith.addf %188, %187 : vector<1x2xf32>
    %cst_69 = arith.constant 1.000000e+00 : f32
    %190 = vector.broadcast %cst_69 : f32 to vector<1x2xf32>
    %191 = arith.divf %190, %189 : vector<1x2xf32>
    %c0_70 = arith.constant 0 : index
    %c0_71 = arith.constant 0 : index
    %c0_72 = arith.constant 0 : index
    %192 = vector.load %arg3[%c0_70, %c0_71, %c0_72] : memref<1x1x2xf32, #tpu.memory_space<vmem>>, vector<1x1x2xf32>
    %193 = vector.shape_cast %192 : vector<1x1x2xf32> to vector<1x2xf32>
    %194 = vector.shape_cast %191 : vector<1x2xf32> to vector<1x1x2xf32>
    tpu.vector_store %arg3[%c0_70, %c0_71, %c0_72], %194 {strides = array<i32>} : memref<1x1x2xf32, #tpu.memory_space<vmem>>, vector<1x1x2xf32>,
    return
  }
  func.func @transform_0(%arg0: i32) -> (i32, i32) {
    %c0_i32 = arith.constant 0 : i32
    %c0_i32_0 = arith.constant 0 : i32
    return %arg0, %c0_i32 : i32, i32
  }
  func.func @transform_1(%arg0: i32) -> (i32, i32) {
    %c0_i32 = arith.constant 0 : i32
    %c0_i32_0 = arith.constant 0 : i32
    %c0_i32_1 = arith.constant 0 : i32
    return %c0_i32, %c0_i32_0 : i32, i32
  }
  func.func @transform_2(%arg0: i32) -> (i32, i32, i32) {
    %c0_i32 = arith.constant 0 : i32
    %c0_i32_0 = arith.constant 0 : i32
    %c0_i32_1 = arith.constant 0 : i32
    return %arg0, %c0_i32, %c0_i32_0 : i32, i32, i32
  }
}

</mosaic_0001>

<bundles_post_ra>
// kernel: tpu_custom_call.1
= control target key start
LH: loop header
LB: loop body
LE: loop exit
PB: predicated region body
PF: predicated region fallthrough
CT: control target
= control target key end

     0   :  { %vm62_vm0 = vcmask 1043456   ;;  %vm37_vm1 = vcmask 31744   ;;  %s6703_s0 = inlined_call_operand.vmem [shape: f32[64,4], index: 0, kind: input, shape index: {}]   ;;  %s6704_s1 = inlined_call_operand.vmem [shape: f32[96,16], index: 1, kind: input, shape index: {}]   ;;  %s6705_s2 = inlined_call_operand.hbm [shape: f32[1,1,2], index: 2, kind: output, shape index: {}]  }
   0x1   :  { %v12_v0 = vld [vmem:[%s6704_s1] sm:$0xf]  ;;  %v30_v2 = vld [vmem:[%s6703_s0 + $0x8] sm:$0xff]  ;;  %v31_v3 = vld [vmem:[%s6703_s0 + $0x10] sm:$0xff] }
   0x2   :  { %v29_v1 = vld [vmem:[%s6703_s0] sm:$0xff]  ;;  %4849 = vmatprep.subr.msk.mxu0 %vm62_vm0, %v12_v0 }
   0x3   :  { %4851 = vmatprep.mubr.msk.f32.mxu0 %vm37_vm1, %v29_v1  ;;  %4850 = vmatpush3.msk.msra.mxu0 %vm62_vm0, %v12_v0 }
   0x4   :  { %4852 = vmatmul.mubr.msk.f32.vlgmr.msra.gmra.mxu0 %vm37_vm1, %v30_v2 }
   0x5   :  { %7 = vsyncpa [#allocation3], 0  ;;  %4854 = vmatprep.mubr.msk.f32.mxu0 %vm37_vm1, %v31_v3  ;;  %v32_v4 = vld [vmem:[%s6703_s0 + $0x18] sm:$0xff]  ;;  %v33_v5 = vld [vmem:[%s6703_s0 + $0x20] sm:$0xff]  ;;  %vm223_vm2 = vcmask 130048   ;;  %s5334_s30 = smov [#allocation2]  }
   0x6   :  { %v34_v6 = vld [vmem:[%s6703_s0 + $0x28] sm:$0xff]  ;;  %v35_v7 = vld [vmem:[%s6703_s0 + $0x30] sm:$0xff]  ;;  %v36_v8 = vld [vmem:[%s6703_s0 + $0x38] sm:$0xff]  ;;  %s4388_s0 = sshll.u32 %s5334_s30, 4  ;;  %s4389_s0 = int_to_ptr.vmem [resolvable:$true] %s4388_s0 }
   0x7   :  { %v14_v9 = vld [vmem:[%s6704_s1 + $0x10] sm:$0xff]  ;;  %v13_v10 = vld [vmem:[%s6704_s1 + $0x8] sm:$0xff]  ;;  %v16_v59 = vld [vmem:[%s6704_s1 + $0x20] sm:$0xff]  ;;  %s5308_s3 = scalar_lea.vmem %s4389_s0, 16  ;;  %p5313_p1 = scmp.lt.s32.totalorder %s4389_s0, %s4389_s0 }
   0x8   :  { %4855 = vmatmul.mubr.msk.f32.gmra.mxu0 %vm37_vm1, %v32_v4  ;;  %4863 = vmatprep.subr.mxu1 %v14_v9  ;;  %v15_v60 = vld [vmem:[%s6704_s1 + $0x18] sm:$0xff]  ;;  %p5309_p0 = scmp.ne.s32.totalorder %s4389_s0, %s5308_s3 }
   0x9   :  { %4857 = vmatprep.mubr.msk.f32.mxu0 %vm37_vm1, %v33_v5  ;;  %4864 = vmatpush3.msra.mxu1 %v14_v9  ;;  %v4413_v61 = vld [vmem:[%s6704_s1 + $0x58] ss:$0 sm:$0xff] }
   0xa   :  { %4865 = vmatprep.subr.mxu1 %v13_v10  ;;  %4879 = vmatprep.subr.mxu0 %v16_v59 }
   0xb   :  { %4866 = vmatpush3.msra.mxu1 %v13_v10  ;;  %4880 = vmatpush3.msra.mxu0 %v16_v59 }
   0xc   :  { %4858 = vmatmul.mubr.msk.f32.gmra.mxu0 %vm37_vm1, %v34_v6  ;;  %4881 = vmatprep.subr.mxu0 %v15_v60 }
   0xd   :  { %4860 = vmatprep.mubr.msk.f32.mxu0 %vm37_vm1, %v35_v7  ;;  %4882 = vmatpush3.msra.mxu0 %v15_v60 }
  0x10   :  { %4861 = vmatmul.mubr.msk.f32.gmra.mxu0 %vm37_vm1, %v36_v8 }
  0xc4   :  { %v4853_v11 = vpop.f32.mrf.mxu0 }
  0xc5   :  { %v180_v12 = vmin.f32 %v4853_v11, 0.0  ;;  %vm172_vm4 = vcmp.gt.f32.partialorder %v4853_v11, 0.0 }
  0xc6   :  { %v132_v13 = vpop.f32.mrf.mxu0 }
  0xc7   :  { %v189_v14 = vmul.f32 1.442695, %v180_v12  ;;  %v179_v15 = vmin.f32 %v132_v13, 0.0  ;;  %vm171_vm3 = vcmp.gt.f32.partialorder %v132_v13, 0.0 }
  0xc8   :  { %v4856_v16 = vpop.f32.mrf.mxu0 }
  0xc9   :  { %5238 = vpow2.f32 %v189_v14  ;;  %v187_v17 = vmul.f32 1.442695, %v179_v15  ;;  %v182_v18 = vmin.f32 %v4856_v16, 0.0  ;;  %vm174_vm6 = vcmp.gt.f32.partialorder %v4856_v16, 0.0 }
  0xca   :  { %v142_v19 = vpop.f32.mrf.mxu0 }
  0xcb   :  { %5240 = vpow2.f32 %v187_v17  ;;  %v193_v20 = vmul.f32 1.442695, %v182_v18  ;;  %v181_v21 = vmin.f32 %v142_v19, 0.0  ;;  %vm173_vm5 = vcmp.gt.f32.partialorder %v142_v19, 0.0 }
  0xcc   :  { %v4859_v22 = vpop.f32.mrf.mxu0 }
  0xcd   :  { %5242 = vpow2.f32 %v193_v20  ;;  %v191_v23 = vmul.f32 1.442695, %v181_v21  ;;  %v184_v24 = vmin.f32 %v4859_v22, 0.0  ;;  %vm176_vm8 = vcmp.gt.f32.partialorder %v4859_v22, 0.0 }
  0xce   :  { %v152_v25 = vpop.f32.mrf.mxu0 }
  0xcf   :  { %5244 = vpow2.f32 %v191_v23  ;;  %v197_v26 = vmul.f32 1.442695, %v184_v24  ;;  %v183_v27 = vmin.f32 %v152_v25, 0.0  ;;  %vm175_vm7 = vcmp.gt.f32.partialorder %v152_v25, 0.0 }
  0xd0   :  { %v4862_v28 = vpop.f32.mrf.mxu0 }
  0xd1   :  { %5246 = vpow2.f32 %v197_v26  ;;  %v195_v29 = vmul.f32 1.442695, %v183_v27  ;;  %v186_v30 = vmin.f32 %v4862_v28, 0.0  ;;  %vm178_vm10 = vcmp.gt.f32.partialorder %v4862_v28, 0.0 }
  0xd2   :  { %v162_v31 = vpop.f32.mrf.mxu0 }
  0xd3   :  { %5248 = vpow2.f32 %v195_v29  ;;  %v201_v32 = vmul.f32 1.442695, %v186_v30  ;;  %v185_v33 = vmin.f32 %v162_v31, 0.0  ;;  %vm177_vm9 = vcmp.gt.f32.partialorder %v162_v31, 0.0 }
  0xd5   :  { %5250 = vpow2.f32 %v201_v32  ;;  %v199_v34 = vmul.f32 1.442695, %v185_v33 }
  0xd6   :  { %v5239_v35 = vpop.eup %5238 }
  0xd7   :  { %5252 = vpow2.f32 %v199_v34  ;;  %v4406_v37 = vadd.f32 -1.0, %v5239_v35 }
  0xd8   :  { %v5241_v36 = vpop.eup %5240 }
  0xd9   :  { %v4405_v38 = vadd.f32 -1.0, %v5241_v36  ;;  %v212_v42 = vsel %vm172_vm4, %v4853_v11, %v4406_v37 }
  0xda   :  { %v5243_v39 = vpop.eup %5242 }
  0xdb   :  { %v211_v40 = vsel %vm171_vm3, %v132_v13, %v4405_v38  ;;  %v4408_v43 = vadd.f32 -1.0, %v5243_v39 }
  0xdc   :  { %v5245_v41 = vpop.eup %5244  ;;  %4867 = vmatprep.mubr.msk.f32.mxu1 %vm223_vm2, %v211_v40 }
  0xdd   :  { %4868 = vmatmul.mubr.msk.f32.vlgmr.msra.gmra.mxu1 %vm223_vm2, %v212_v42  ;;  %v4407_v44 = vadd.f32 -1.0, %v5245_v41  ;;  %v214_v48 = vsel %vm174_vm6, %v4856_v16, %v4408_v43 }
  0xde   :  { %v5247_v45 = vpop.eup %5246 }
  0xdf   :  { %v213_v46 = vsel %vm173_vm5, %v142_v19, %v4407_v44  ;;  %v4410_v49 = vadd.f32 -1.0, %v5247_v45 }
  0xe0   :  { %v5249_v47 = vpop.eup %5248  ;;  %4870 = vmatprep.mubr.msk.f32.mxu1 %vm223_vm2, %v213_v46 }
  0xe1   :  { %4871 = vmatmul.mubr.msk.f32.gmra.mxu1 %vm223_vm2, %v214_v48  ;;  %v4409_v50 = vadd.f32 -1.0, %v5249_v47  ;;  %v216_v54 = vsel %vm176_vm8, %v4859_v22, %v4410_v49 }
  0xe2   :  { %v5251_v51 = vpop.eup %5250 }
  0xe3   :  { %v215_v52 = vsel %vm175_vm7, %v152_v25, %v4409_v50  ;;  %v4412_v55 = vadd.f32 -1.0, %v5251_v51 }
  0xe4   :  { %v5253_v53 = vpop.eup %5252  ;;  %4873 = vmatprep.mubr.msk.f32.mxu1 %vm223_vm2, %v215_v52 }
  0xe5   :  { %4874 = vmatmul.mubr.msk.f32.gmra.mxu1 %vm223_vm2, %v216_v54  ;;  %v4411_v56 = vadd.f32 -1.0, %v5253_v53  ;;  %v218_v58 = vsel %vm178_vm10, %v4862_v28, %v4412_v55  ;;  %v20_v54 = vld [vmem:[%s6704_s1 + $0x40] sm:$0xff]  ;;  %v18_v55 = vld [vmem:[%s6704_s1 + $0x30] sm:$0xff] }
  0xe6   :  { %4911 = vmatprep.subr.mxu0 %v20_v54  ;;  %4895 = vmatprep.subr.mxu1 %v18_v55 }
  0xe7   :  { %v217_v57 = vsel %vm177_vm9, %v162_v31, %v4411_v56  ;;  %4896 = vmatpush3.msra.mxu1 %v18_v55  ;;  %v17_v56 = vld [vmem:[%s6704_s1 + $0x28] sm:$0xff] }
  0xe8   :  { %4876 = vmatprep.mubr.msk.f32.mxu1 %vm223_vm2, %v217_v57  ;;  %v19_v57 = vld [vmem:[%s6704_s1 + $0x38] sm:$0xff]  ;;  %4897 = vmatprep.subr.mxu1 %v17_v56 }
  0xe9   :  { %4877 = vmatmul.mubr.msk.f32.gmra.mxu1 %vm223_vm2, %v218_v58  ;;  %v4430_v58 = vld [vmem:[%s6704_s1 + $0x59] ss:$0 sm:$0xff] }
  0xea   :  { %4898 = vmatpush3.msra.mxu1 %v17_v56 }
 0x19d   :  { %v4869_v62 = vpop.f32.mrf.mxu1 }
 0x19e   :  { %v320_v63 = vadd.f32 %v4869_v62, %v4413_v61 }
 0x19f   :  { %v314_v0 = vpop.f32.mrf.mxu1 }
 0x1a0   :  { %v362_v1 = vmin.f32 %v320_v63, 0.0  ;;  %v315_v2 = vadd.f32 %v4413_v61, %v314_v0  ;;  %vm354_vm12 = vcmp.gt.f32.partialorder %v320_v63, 0.0 }
 0x1a1   :  { %v4872_v3 = vpop.f32.mrf.mxu1 }
 0x1a2   :  { %v371_v4 = vmul.f32 1.442695, %v362_v1  ;;  %v361_v5 = vmin.f32 %v315_v2, 0.0  ;;  %v330_v6 = vadd.f32 %v4872_v3, %v4413_v61  ;;  %vm353_vm11 = vcmp.gt.f32.partialorder %v315_v2, 0.0 }
 0x1a3   :  { %v324_v7 = vpop.f32.mrf.mxu1 }
 0x1a4   :  { %5254 = vpow2.f32 %v371_v4  ;;  %v369_v8 = vmul.f32 1.442695, %v361_v5  ;;  %v364_v9 = vmin.f32 %v330_v6, 0.0  ;;  %v325_v10 = vadd.f32 %v4413_v61, %v324_v7 }
 0x1a5   :  { %v4875_v11 = vpop.f32.mrf.mxu1  ;;  %vm356_vm14 = vcmp.gt.f32.partialorder %v330_v6, 0.0 }
 0x1a6   :  { %5256 = vpow2.f32 %v369_v8  ;;  %v375_v12 = vmul.f32 1.442695, %v364_v9  ;;  %v340_v13 = vadd.f32 %v4875_v11, %v4413_v61  ;;  %v363_v14 = vmin.f32 %v325_v10, 0.0 }
 0x1a7   :  { %v334_v15 = vpop.f32.mrf.mxu1  ;;  %vm355_vm13 = vcmp.gt.f32.partialorder %v325_v10, 0.0 }
 0x1a8   :  { %5258 = vpow2.f32 %v375_v12  ;;  %v366_v16 = vmin.f32 %v340_v13, 0.0  ;;  %v335_v17 = vadd.f32 %v4413_v61, %v334_v15  ;;  %v373_v18 = vmul.f32 1.442695, %v363_v14 }
 0x1a9   :  { %v4878_v19 = vpop.f32.mrf.mxu1  ;;  %vm358_vm0 = vcmp.gt.f32.partialorder %v340_v13, 0.0 }
 0x1aa   :  { %v379_v20 = vmul.f32 1.442695, %v366_v16  ;;  %v365_v21 = vmin.f32 %v335_v17, 0.0  ;;  %v350_v22 = vadd.f32 %v4878_v19, %v4413_v61  ;;  %5260 = vpow2.f32 %v373_v18 }
 0x1ab   :  { %v344_v23 = vpop.f32.mrf.mxu1  ;;  %vm357_vm15 = vcmp.gt.f32.partialorder %v335_v17, 0.0 }
 0x1ac   :  { %5262 = vpow2.f32 %v379_v20  ;;  %v377_v24 = vmul.f32 1.442695, %v365_v21  ;;  %v368_v25 = vmin.f32 %v350_v22, 0.0  ;;  %v345_v26 = vadd.f32 %v4413_v61, %v344_v23 }
 0x1ad   :  { %vm360_vm3 = vcmp.gt.f32.partialorder %v350_v22, 0.0 }
 0x1ae   :  { %5264 = vpow2.f32 %v377_v24  ;;  %v383_v27 = vmul.f32 1.442695, %v368_v25  ;;  %v367_v28 = vmin.f32 %v345_v26, 0.0  ;;  %vm359_vm1 = vcmp.gt.f32.partialorder %v345_v26, 0.0 }
 0x1b0   :  { %5266 = vpow2.f32 %v383_v27  ;;  %v381_v30 = vmul.f32 1.442695, %v367_v28 }
 0x1b1   :  { %v5255_v29 = vpop.eup %5254 }
 0x1b2   :  { %v4423_v32 = vadd.f32 -1.0, %v5255_v29  ;;  %5268 = vpow2.f32 %v381_v30 }
 0x1b3   :  { %v5257_v31 = vpop.eup %5256 }
 0x1b4   :  { %v4422_v33 = vadd.f32 -1.0, %v5257_v31  ;;  %v394_v36 = vsel %vm354_vm12, %v320_v63, %v4423_v32  ;;  %vm5331_vm12 = vmmov 0  }
 0x1b5   :  { %v5259_v34 = vpop.eup %5258 }
 0x1b6   :  { %v393_v35 = vsel %vm353_vm11, %v315_v2, %v4422_v33  ;;  %v4425_v38 = vadd.f32 -1.0, %v5259_v34 }
 0x1b7   :  { %4883 = vmatprep.mubr.msk.f32.mxu0 %vm223_vm2, %v393_v35  ;;  %v5261_v37 = vpop.eup %5260 }
 0x1b8   :  { %4884 = vmatmul.mubr.msk.f32.vlgmr.msra.gmra.mxu0 %vm223_vm2, %v394_v36  ;;  %v4424_v40 = vadd.f32 -1.0, %v5261_v37  ;;  %v396_v43 = vsel %vm356_vm14, %v330_v6, %v4425_v38 }
 0x1b9   :  { %v5263_v39 = vpop.eup %5262  ;;  %4912 = vmatpush3.msra.mxu0 %v20_v54 }
 0x1ba   :  { %v395_v42 = vsel %vm355_vm13, %v325_v10, %v4424_v40  ;;  %v4427_v45 = vadd.f32 -1.0, %v5263_v39  ;;  %4913 = vmatprep.subr.mxu0 %v19_v57 }
 0x1bb   :  { %v5265_v41 = vpop.eup %5264  ;;  %4886 = vmatprep.mubr.msk.f32.mxu0 %vm223_vm2, %v395_v42  ;;  %4914 = vmatpush3.msra.mxu0 %v19_v57 }
 0x1bc   :  { %v4426_v44 = vadd.f32 -1.0, %v5265_v41  ;;  %4887 = vmatmul.mubr.msk.f32.gmra.mxu0 %vm223_vm2, %v396_v43  ;;  %v398_v49 = vsel %vm358_vm0, %v340_v13, %v4427_v45 }
 0x1bd   :  { %v5267_v46 = vpop.eup %5266 }
 0x1be   :  { %v397_v47 = vsel %vm357_vm15, %v335_v17, %v4426_v44  ;;  %v4429_v50 = vadd.f32 -1.0, %v5267_v46 }
 0x1bf   :  { %4889 = vmatprep.mubr.msk.f32.mxu0 %vm223_vm2, %v397_v47  ;;  %v5269_v48 = vpop.eup %5268 }
 0x1c0   :  { %4890 = vmatmul.mubr.msk.f32.gmra.mxu0 %vm223_vm2, %v398_v49  ;;  %v4428_v51 = vadd.f32 -1.0, %v5269_v48  ;;  %v400_v53 = vsel %vm360_vm3, %v350_v22, %v4429_v50 }
 0x1c2   :  { %v399_v52 = vsel %vm359_vm1, %v345_v26, %v4428_v51  ;;  %v6706_v51 = vmov 0.0  }
 0x1c3   :  { %4892 = vmatprep.mubr.msk.f32.mxu0 %vm223_vm2, %v399_v52 }
 0x1c4   :  { %4893 = vmatmul.mubr.msk.f32.gmra.mxu0 %vm223_vm2, %v400_v53 }
 0x278   :  { %v4885_v59 = vpop.f32.mrf.mxu0 }
 0x279   :  { %v501_v60 = vadd.f32 %v4885_v59, %v4430_v58 }
 0x27a   :  { %v495_v61 = vpop.f32.mrf.mxu0 }
 0x27b   :  { %v543_v62 = vmin.f32 %v501_v60, 0.0  ;;  %v496_v63 = vadd.f32 %v4430_v58, %v495_v61  ;;  %vm535_vm5 = vcmp.gt.f32.partialorder %v501_v60, 0.0 }
 0x27c   :  { %v4888_v2 = vpop.f32.mrf.mxu0 }
 0x27d   :  { %v552_v0 = vmul.f32 1.442695, %v543_v62  ;;  %v542_v1 = vmin.f32 %v496_v63, 0.0  ;;  %v511_v3 = vadd.f32 %v4888_v2, %v4430_v58  ;;  %vm534_vm4 = vcmp.gt.f32.partialorder %v496_v63, 0.0 }
 0x27e   :  { %v505_v5 = vpop.f32.mrf.mxu0 }
 0x27f   :  { %5270 = vpow2.f32 %v552_v0  ;;  %v550_v4 = vmul.f32 1.442695, %v542_v1  ;;  %v545_v6 = vmin.f32 %v511_v3, 0.0  ;;  %v506_v7 = vadd.f32 %v4430_v58, %v505_v5 }
 0x280   :  { %v4891_v8 = vpop.f32.mrf.mxu0  ;;  %vm537_vm6 = vcmp.gt.f32.partialorder %v511_v3, 0.0 }
 0x281   :  { %5272 = vpow2.f32 %v550_v4  ;;  %v556_v9 = vmul.f32 1.442695, %v545_v6  ;;  %v544_v10 = vmin.f32 %v506_v7, 0.0  ;;  %v5431_v11 = vadd.f32 %v4891_v8, %v4430_v58 }
 0x282   :  { %v515_v12 = vpop.f32.mrf.mxu0  ;;  %vm536_vm7 = vcmp.gt.f32.partialorder %v506_v7, 0.0 }
 0x283   :  { %5274 = vpow2.f32 %v556_v9  ;;  %v554_v13 = vmul.f32 1.442695, %v544_v10  ;;  %v547_v14 = vmin.f32 %v5431_v11, 0.0  ;;  %v516_v15 = vadd.f32 %v4430_v58, %v515_v12 }
 0x284   :  { %v4894_v16 = vpop.f32.mrf.mxu0  ;;  %vm539_vm9 = vcmp.gt.f32.partialorder %v5431_v11, 0.0 }
 0x285   :  { %5276 = vpow2.f32 %v554_v13  ;;  %v560_v17 = vmul.f32 1.442695, %v547_v14  ;;  %v531_v18 = vadd.f32 %v4894_v16, %v4430_v58  ;;  %v546_v19 = vmin.f32 %v516_v15, 0.0 }
 0x286   :  { %v525_v20 = vpop.f32.mrf.mxu0  ;;  %vm538_vm8 = vcmp.gt.f32.partialorder %v516_v15, 0.0  ;;  %v1169_v13 = vlaneseq }
 0x287   :  { %5278 = vpow2.f32 %v560_v17  ;;  %v549_v21 = vmin.f32 %v531_v18, 0.0  ;;  %v526_v22 = vadd.f32 %v4430_v58, %v525_v20  ;;  %v558_v23 = vmul.f32 1.442695, %v546_v19 }
 0x288   :  { %vm541_vm10 = vcmp.gt.f32.partialorder %v531_v18, 0.0  ;;  %v5332_v58 = vmov 1.0   ;;  %v5566_v16 = vshrl.u32 %v1169_v13, 7 }
 0x289   :  { %v564_v24 = vmul.f32 1.442695, %v549_v21  ;;  %v548_v25 = vmin.f32 %v526_v22, 0.0  ;;  %5280 = vpow2.f32 %v558_v23  ;;  %vm540_vm11 = vcmp.gt.f32.partialorder %v526_v22, 0.0 }
 0x28a   :  { %6717 = vst [vmem:[#allocation9_spill] sm:$0xff] %v5566_v16  ;;  %v1171_v19 = vsub.s32 0, %v5566_v16 }
 0x28b   :  { %5282 = vpow2.f32 %v564_v24  ;;  %v562_v27 = vmul.f32 1.442695, %v548_v25 }
 0x28c   :  { %v5271_v26 = vpop.eup %5270 }
 0x28d   :  { %v4440_v29 = vadd.f32 -1.0, %v5271_v26  ;;  %5284 = vpow2.f32 %v562_v27 }
 0x28e   :  { %v5273_v28 = vpop.eup %5272 }
 0x28f   :  { %v4439_v30 = vadd.f32 -1.0, %v5273_v28  ;;  %v5436_v33 = vsel %vm535_vm5, %v501_v60, %v4440_v29 }
 0x290   :  { %v5275_v31 = vpop.eup %5274  ;;  %v987_v54 = vmul.f32 %v5436_v33, %v5436_v33 }
 0x291   :  { %v5434_v32 = vsel %vm534_vm4, %v496_v63, %v4439_v30  ;;  %v4442_v34 = vadd.f32 -1.0, %v5275_v31 }
 0x292   :  { %4899 = vmatprep.mubr.msk.f32.mxu1 %vm223_vm2, %v5434_v32  ;;  %4915 = vmatprep.mubr.msk.f32.mxu0 %vm223_vm2, %v5434_v32  ;;  %v5277_v35 = vpop.eup %5276  ;;  %v986_v56 = vmul.f32 %v5434_v32, %v5434_v32 }
 0x293   :  { %4900 = vmatmul.mubr.msk.f32.vlgmr.msra.gmra.mxu1 %vm223_vm2, %v5436_v33  ;;  %4916 = vmatmul.mubr.msk.f32.vlgmr.msra.gmra.mxu0 %vm223_vm2, %v5436_v33  ;;  %v577_v36 = vsel %vm537_vm6, %v511_v3, %v4442_v34  ;;  %v4441_v37 = vadd.f32 -1.0, %v5277_v35  ;;  %vm1235_vm6 = vcmask 261120  }
 0x294   :  { %v5279_v38 = vpop.eup %5278  ;;  %4927 = vmatprep.subr.msk.mxu1 %vm223_vm2, %v577_v36  ;;  %v989_v52 = vmul.f32 %v577_v36, %v577_v36 }
 0x295   :  { %v576_v39 = vsel %vm536_vm7, %v506_v7, %v4441_v37  ;;  %4928 = vmatpush3.xpose.msk.msra.mxu1 %vm223_vm2, %v577_v36  ;;  %v4444_v41 = vadd.f32 -1.0, %v5279_v38 }
 0x296   :  { %4902 = vmatprep.mubr.msk.f32.mxu1 %vm223_vm2, %v576_v39  ;;  %4918 = vmatprep.mubr.msk.f32.mxu0 %vm223_vm2, %v576_v39  ;;  %v5281_v40 = vpop.eup %5280  ;;  %v988_v53 = vmul.f32 %v576_v39, %v576_v39 }
 0x297   :  { %4929 = vmatprep.subr.msk.mxu1 %vm223_vm2, %v576_v39  ;;  %4903 = vmatmul.mubr.msk.f32.gmra.mxu1 %vm223_vm2, %v577_v36  ;;  %v4443_v43 = vadd.f32 -1.0, %v5281_v40  ;;  %v579_v47 = vsel %vm539_vm9, %v5431_v11, %v4444_v41 }
 0x298   :  { %v5283_v42 = vpop.eup %5282  ;;  %4919 = vmatmul.mubr.msk.f32.gmra.mxu0 %vm223_vm2, %v577_v36  ;;  %v991_v59 = vmul.f32 %v579_v47, %v579_v47 }
 0x299   :  { %v4446_v44 = vadd.f32 -1.0, %v5283_v42  ;;  %4930 = vmatpush3.xpose.msk.msra.mxu1 %vm223_vm2, %v576_v39  ;;  %v578_v46 = vsel %vm538_vm8, %v516_v15, %v4443_v43 }
 0x29a   :  { %v5285_v45 = vpop.eup %5284  ;;  %4931 = vmatprep.subr.msk.mxu1 %vm223_vm2, %v5436_v33  ;;  %4905 = vmatprep.mubr.msk.f32.mxu1 %vm223_vm2, %v578_v46  ;;  %v990_v60 = vmul.f32 %v578_v46, %v578_v46 }
 0x29b   :  { %v581_v48 = vsel %vm541_vm10, %v531_v18, %v4446_v44  ;;  %v4445_v49 = vadd.f32 -1.0, %v5285_v45  ;;  %4921 = vmatprep.mubr.msk.f32.mxu0 %vm223_vm2, %v578_v46  ;;  %4906 = vmatmul.mubr.msk.f32.gmra.mxu1 %vm223_vm2, %v579_v47 }
 0x29c   :  { %4922 = vmatmul.mubr.msk.f32.gmra.mxu0 %vm223_vm2, %v579_v47  ;;  %4941 = vmatprep.subr.msk.mxu0 %vm223_vm2, %v581_v48  ;;  %v993_v55 = vmul.f32 %v581_v48, %v581_v48 }
 0x29d   :  { %v580_v50 = vsel %vm540_vm11, %v526_v22, %v4445_v49  ;;  %4932 = vmatpush3.xpose.msk.msra.mxu1 %vm223_vm2, %v5436_v33  ;;  %4942 = vmatpush3.xpose.msk.msra.mxu0 %vm223_vm2, %v581_v48 }
 0x29e   :  { %4908 = vmatprep.mubr.msk.f32.mxu1 %vm223_vm2, %v580_v50  ;;  %4924 = vmatprep.mubr.msk.f32.mxu0 %vm223_vm2, %v580_v50  ;;  %v992_v57 = vmul.f32 %v580_v50, %v580_v50 }
 0x29f   :  { %4933 = vmatprep.subr.msk.mxu1 %vm223_vm2, %v5434_v32  ;;  %4943 = vmatprep.subr.msk.mxu0 %vm223_vm2, %v580_v50 }
 0x2a0   :  { %4909 = vmatmul.mubr.msk.f32.gmra.mxu1 %vm223_vm2, %v581_v48  ;;  %4925 = vmatmul.mubr.msk.f32.gmra.mxu0 %vm223_vm2, %v581_v48 }
 0x2a1   :  { %4935 = vmatprep.mubr.msk.f32.mxu1 %vm223_vm2, %v5434_v32  ;;  %4949 = vmatprep.mubr.msk.f32.mxu0 %vm223_vm2, %v578_v46 }
 0x2a2   :  { %4934 = vmatpush3.xpose.msk.msra.mxu1 %vm223_vm2, %v5434_v32  ;;  %4944 = vmatpush3.xpose.msk.msra.mxu0 %vm223_vm2, %v580_v50 }
 0x2a3   :  { %4955 = vmatprep.subr.mxu1 %v6706_v51  ;;  %4945 = vmatprep.subr.msk.mxu0 %vm223_vm2, %v579_v47 }
 0x2a5   :  { %4936 = vmatmul.mubr.msk.f32.vlgmr.msra.gmra.mxu1 %vm223_vm2, %v5436_v33 }
 0x2a6   :  { %4938 = vmatprep.mubr.msk.f32.mxu1 %vm223_vm2, %v576_v39  ;;  %4956 = vmatpush3.xpose.msk.msra.mxu1 %vm223_vm2, %v989_v52 }
 0x2a7   :  { %4946 = vmatpush3.xpose.msk.msra.mxu0 %vm223_vm2, %v579_v47  ;;  %4957 = vmatprep.subr.mxu1 %v6706_v51 }
 0x2a8   :  { %4947 = vmatprep.subr.msk.mxu0 %vm223_vm2, %v578_v46 }
 0x2a9   :  { %4939 = vmatmul.mubr.msk.f32.gmra.mxu1 %vm223_vm2, %v577_v36 }
 0x2aa   :  { %4958 = vmatpush3.xpose.msk.msra.mxu1 %vm223_vm2, %v988_v53  ;;  %4963 = vmatprep.mubr.msk.f32.mxu1 %vm5331_vm12, %v6706_v51  ;;  %v5569_v53 = vand.u32 127, %v1169_v13 }
 0x2ab   :  { %4948 = vmatpush3.xpose.msk.msra.mxu0 %vm223_vm2, %v578_v46  ;;  %4959 = vmatprep.subr.mxu1 %v6706_v51 }
 0x2ac   :  { %4966 = vmatprep.subr.mxu0 %v6706_v51  ;;  %6718 = vst [vmem:[#allocation10_spill] sm:$0xff] %v5569_v53 }
 0x2ae   :  { %4950 = vmatmul.mubr.msk.f32.vlgmr.msra.gmra.mxu0 %vm223_vm2, %v579_v47  ;;  %4960 = vmatpush3.xpose.msk.msra.mxu1 %vm223_vm2, %v987_v54 }
 0x2af   :  { %4952 = vmatprep.mubr.msk.f32.mxu0 %vm223_vm2, %v580_v50  ;;  %4967 = vmatpush3.xpose.msk.msra.mxu0 %vm223_vm2, %v993_v55 }
 0x2b0   :  { %4961 = vmatprep.subr.mxu1 %v6706_v51  ;;  %4968 = vmatprep.subr.mxu0 %v6706_v51 }
 0x2b2   :  { %4953 = vmatmul.mubr.msk.f32.gmra.mxu0 %vm223_vm2, %v581_v48  ;;  %4962 = vmatpush3.xpose.msk.msra.mxu1 %vm223_vm2, %v986_v56 }
 0x2b3   :  { %4969 = vmatpush3.xpose.msk.msra.mxu0 %vm223_vm2, %v992_v57  ;;  %4974 = vmatprep.mubr.msk.f32.mxu0 %vm5331_vm12, %v6706_v51 }
 0x2b4   :  { %4970 = vmatprep.subr.mxu0 %v6706_v51 }
 0x2b5   :  { %4964 = vmatmul.mubr.msk.f32.vlgmr.msra.gmra.mxu1 %vm223_vm2, %v5332_v58 }
 0x2b7   :  { %4971 = vmatpush3.xpose.msk.msra.mxu0 %vm223_vm2, %v991_v59 }
 0x2b8   :  { %4972 = vmatprep.subr.mxu0 %v6706_v51 }
 0x2bb   :  { %4973 = vmatpush3.xpose.msk.msra.mxu0 %vm223_vm2, %v990_v60 }
 0x2be   :  { %4975 = vmatmul.mubr.msk.f32.vlgmr.msra.gmra.mxu0 %vm223_vm2, %v5332_v58 }
 0x353   :  { %v5516_v61 = vpop.f32.mrf.mxu1  ;;  %v5518_v62 = vpop.f32.mrf.mxu0 }
 0x355   :  { %v5520_v63 = vpop.f32.mrf.mxu1  ;;  %v5522_v0 = vpop.f32.mrf.mxu0 }
 0x357   :  { %v5524_v1 = vpop.f32.mrf.mxu1 }
 0x358   :  { %6713 = vst [vmem:[#allocation5_spill] sm:$0xff] %v5524_v1  ;;  %v5526_v2 = vpop.f32.mrf.mxu0 }
 0x359   :  { %6714 = vst [vmem:[#allocation6_spill] sm:$0xff] %v5526_v2  ;;  %4977 = vmatprep.subr.mxu1 %v5526_v2  ;;  %5005 = vmatprep.subr.mxu0 %v5526_v2  ;;  %v5530_v3 = vpop.f32.mrf.mxu1 }
 0x35a   :  { %6715 = vst [vmem:[#allocation7_spill] sm:$0xff] %v5530_v3  ;;  %v5532_v4 = vpop.f32.mrf.mxu0  ;;  %4978 = vmatpush3.msra.mxu1 %v5526_v2  ;;  %5006 = vmatpush3.msra.mxu0 %v5526_v2 }
 0x35b   :  { %6716 = vst [vmem:[#allocation8_spill] sm:$0xff] %v5532_v4  ;;  %4979 = vmatprep.subr.mxu1 %v5532_v4  ;;  %5007 = vmatprep.subr.mxu0 %v5532_v4  ;;  %v5538_v5 = vpop.f32.mrf.mxu1 }
 0x35c   :  { %v5540_v6 = vpop.f32.mrf.mxu0  ;;  %4980 = vmatpush3.msra.mxu1 %v5532_v4  ;;  %5008 = vmatpush3.msra.mxu0 %v5532_v4 }
 0x35d   :  { %4981 = vmatprep.subr.mxu1 %v5518_v62  ;;  %5009 = vmatprep.subr.mxu0 %v5518_v62  ;;  %v5546_v7 = vpop.f32.mrf.mxu1 }
 0x35e   :  { %v5548_v8 = vpop.f32.mrf.mxu0  ;;  %4982 = vmatpush3.msra.mxu1 %v5518_v62  ;;  %5010 = vmatpush3.msra.mxu0 %v5518_v62 }
 0x35f   :  { %4983 = vmatprep.subr.mxu1 %v5522_v0  ;;  %5011 = vmatprep.subr.mxu0 %v5522_v0 }
 0x360   :  { %v5554_v9 = vpop.f32.mrf.mxu1  ;;  %4984 = vmatpush3.msra.mxu1 %v5522_v0  ;;  %5012 = vmatpush3.msra.mxu0 %v5522_v0  ;;  %v5558_v10 = vpop.f32.mrf.mxu0 }
 0x361   :  { %5033 = vmatprep.subr.mxu0 %v5526_v2  ;;  %4991 = vmatprep.subr.mxu1 %v5558_v10 }
 0x362   :  { %v5562_v11 = vpop.f32.mrf.mxu1  ;;  %v5564_v15 = vpop.f32.mrf.mxu0 }
 0x365   :  { %v4937_v12 = vpop.f32.mrf.mxu1 }
 0x366   :  { %v1162_v23 = vmul.f32 2.0, %v4937_v12 }
 0x367   :  { %v882_v14 = vpop.f32.mrf.mxu1 }
 0x368   :  { %v1161_v24 = vmul.f32 2.0, %v882_v14 }
 0x369   :  { %v4940_v17 = vpop.f32.mrf.mxu1 }
 0x36a   :  { %v1164_v30 = vmul.f32 2.0, %v4940_v17 }
 0x36b   :  { %v892_v20 = vpop.f32.mrf.mxu1 }
 0x36c   :  { %v1163_v31 = vmul.f32 2.0, %v892_v20 }
 0x36e   :  { %v4951_v18 = vpop.f32.mrf.mxu0 }
 0x36f   :  { %v1166_v37 = vmul.f32 2.0, %v4951_v18 }
 0x370   :  { %v967_v21 = vpop.f32.mrf.mxu0 }
 0x371   :  { %v1165_v38 = vmul.f32 2.0, %v967_v21 }
 0x372   :  { %v4954_v26 = vpop.f32.mrf.mxu0 }
 0x373   :  { %v1168_v39 = vmul.f32 2.0, %v4954_v26 }
 0x374   :  { %v977_v32 = vpop.f32.mrf.mxu0 }
 0x375   :  { %v1075_v22 = vpop.f32.mrf.mxu1  ;;  %v1167_v40 = vmul.f32 2.0, %v977_v32 }
 0x376   :  { %v1172_v25 = vrot.slane %v1075_v22, %v1171_v19 }
 0x377   :  { %v4965_v27 = vpop.f32.mrf.mxu1 }
 0x378   :  { %v1177_v28 = vsub.f32 %v1172_v25, %v1161_v24  ;;  %v1178_v29 = vsub.f32 %v1172_v25, %v1162_v23  ;;  %v1180_v33 = vsub.f32 %v1172_v25, %v1164_v30  ;;  %v1179_v36 = vsub.f32 %v1172_v25, %v1163_v31 }
 0x37a   :  { %v1201_v34 = vxor.u32 2147483647, %v1177_v28  ;;  %v1202_v35 = vxor.u32 2147483647, %v1178_v29  ;;  %vm1194_vm13 = vcmp.lt.s32.totalorder %v1178_v29, 0  ;;  %vm1193_vm14 = vcmp.lt.s32.totalorder %v1177_v28, 0 }
 0x37b   :  { %v1204_v42 = vxor.u32 2147483647, %v1180_v33  ;;  %v1203_v46 = vxor.u32 2147483647, %v1179_v36  ;;  %vm1196_vm15 = vcmp.lt.s32.totalorder %v1180_v33, 0  ;;  %vm1195_vm0 = vcmp.lt.s32.totalorder %v1179_v36, 0 }
 0x37c   :  { %v1210_v44 = vsel %vm1194_vm13, %v1202_v35, %v1178_v29  ;;  %v1209_v45 = vsel %vm1193_vm14, %v1201_v34, %v1177_v28 }
 0x37d   :  { %v1220_v54 = vand.u32 4294967264, %v1210_v44  ;;  %v1219_v55 = vand.u32 4294967264, %v1209_v45  ;;  %v1212_v59 = vsel %vm1196_vm15, %v1204_v42, %v1180_v33  ;;  %v1211_v17 = vsel %vm1195_vm0, %v1203_v46, %v1179_v36 }
 0x37e   :  { %v1157_v41 = vpop.f32.mrf.mxu0  ;;  %v1222_v27 = vand.u32 4294967264, %v1212_v59  ;;  %v1221_v28 = vand.u32 4294967264, %v1211_v17 }
 0x37f   :  { %v1176_v43 = vrot.slane %v1157_v41, %v1171_v19  ;;  %v5588_v31 = vor.u32 %v1220_v54, %v5569_v53  ;;  %v5591_v32 = vor.u32 %v1219_v55, %v5569_v53 }
 0x380   :  { %v4976_v47 = vpop.f32.mrf.mxu0  ;;  %v5605_v44 = vor.u32 %v1221_v28, %v5569_v53 }
 0x381   :  { %v1181_v48 = vsub.f32 %v1176_v43, %v1165_v38  ;;  %v1182_v49 = vsub.f32 %v1176_v43, %v1166_v37  ;;  %v1183_v50 = vsub.f32 %v1176_v43, %v1167_v40  ;;  %v1184_v52 = vsub.f32 %v1176_v43, %v1168_v39 }
 0x382   :  { %v1251_v41 = vsel %vm1235_vm6, %v5588_v31, 2147483647  ;;  %v1236_v42 = vsel %vm1235_vm6, %v5591_v32, 2147483647  ;;  %v5602_v43 = vor.u32 %v1222_v27, %v5569_v53 }
 0x383   :  { %v1205_v56 = vxor.u32 2147483647, %v1181_v48  ;;  %v1206_v57 = vxor.u32 2147483647, %v1182_v49  ;;  %v1207_v58 = vxor.u32 2147483647, %v1183_v50 }
 0x384   :  { %v1208_v60 = vxor.u32 2147483647, %v1184_v52  ;;  %vm1199_vm1 = vcmp.lt.s32.totalorder %v1183_v50, 0  ;;  %vm1197_vm3 = vcmp.lt.s32.totalorder %v1181_v48, 0  ;;  %vm1200_vm4 = vcmp.lt.s32.totalorder %v1184_v52, 0 }
 0x385   :  { %v1215_v12 = vsel %vm1199_vm1, %v1207_v58, %v1183_v50  ;;  %v1213_v14 = vsel %vm1197_vm3, %v1205_v56, %v1181_v48  ;;  %vm1198_vm5 = vcmp.lt.s32.totalorder %v1182_v49, 0  ;;  %v1253_v47 = vshra.s32 %v1251_v41, 16 }
 0x386   :  { %v1225_v18 = vand.u32 4294967264, %v1215_v12  ;;  %v1223_v19 = vand.u32 4294967264, %v1213_v14  ;;  %v1216_v20 = vsel %vm1200_vm4, %v1208_v60, %v1184_v52  ;;  %v1214_v13 = vsel %vm1198_vm5, %v1206_v57, %v1182_v49 }
 0x387   :  { %v1226_v21 = vand.u32 4294967264, %v1216_v20  ;;  %v1224_v22 = vand.u32 4294967264, %v1214_v13  ;;  %v1238_v48 = vshra.s32 %v1236_v42, 16  ;;  %v1281_v49 = vsel %vm1235_vm6, %v5602_v43, 2147483647 }
 0x388   :  { %v5572_v23 = vor.u32 %v1225_v18, %v5569_v53  ;;  %v5575_v24 = vor.u32 %v1223_v19, %v5569_v53  ;;  %v1266_v50 = vsel %vm1235_vm6, %v5605_v44, 2147483647  ;;  %v1255_v52 = vcvt.s32.f32 %v1253_v47 }
 0x389   :  { %v5578_v25 = vor.u32 %v1226_v21, %v5569_v53  ;;  %v5581_v26 = vor.u32 %v1224_v22, %v5569_v53  ;;  %v1240_v54 = vcvt.s32.f32 %v1238_v48  ;;  %v1283_v55 = vshra.s32 %v1281_v49, 16 }
 0x38a   :  { %v1326_v29 = vsel %vm1235_vm6, %v5572_v23, 2147483647  ;;  %v1296_v30 = vsel %vm1235_vm6, %v5575_v24, 2147483647  ;;  %v1268_v56 = vshra.s32 %v1266_v50, 16  ;;  %v1237_v28 = vand.u32 65535, %v1236_v42 }
 0x38b   :  { %v1328_v33 = vshra.s32 %v1326_v29, 16  ;;  %v1298_v34 = vshra.s32 %v1296_v30, 16  ;;  %v1341_v35 = vsel %vm1235_vm6, %v5578_v25, 2147483647  ;;  %v1311_v36 = vsel %vm1235_vm6, %v5581_v26, 2147483647 }
 0x38c   :  { %v1343_v39 = vshra.s32 %v1341_v35, 16  ;;  %v1313_v40 = vshra.s32 %v1311_v36, 16  ;;  %v1285_v57 = vcvt.s32.f32 %v1283_v55  ;;  %v1270_v58 = vcvt.s32.f32 %v1268_v56 }
 0x38d   :  { %v1330_v37 = vcvt.s32.f32 %v1328_v33  ;;  %v1300_v38 = vcvt.s32.f32 %v1298_v34  ;;  %v1297_v59 = vand.u32 65535, %v1296_v30  ;;  %v1312_v17 = vand.u32 65535, %v1311_v36 }
 0x38e   :  { %v1345_v45 = vcvt.s32.f32 %v1343_v39  ;;  %v1315_v46 = vcvt.s32.f32 %v1313_v40  ;;  %v1327_v18 = vand.u32 65535, %v1326_v29  ;;  %v1342_v27 = vand.u32 65535, %v1341_v35 }
 0x38f   :  { %1331 = vmin.xlane.f32.xlu1 %v1330_v37  ;;  %1301 = vmin.xlane.f32.xlu0 %v1300_v38  ;;  %v1299_v14 = vcvt.s32.f32 %v1297_v59  ;;  %v1314_v21 = vcvt.s32.f32 %v1312_v17  ;;  %v1239_v29 = vcvt.s32.f32 %v1237_v28  ;;  %v1267_v40 = vand.u32 65535, %v1266_v50 }
 0x390   :  { %v1329_v22 = vcvt.s32.f32 %v1327_v18  ;;  %v1344_v36 = vcvt.s32.f32 %v1342_v27  ;;  %v1282_v55 = vand.u32 65535, %v1281_v49 }
 0x391   :  { %v1269_v48 = vcvt.s32.f32 %v1267_v40 }
 0x393   :  { %1346 = vmin.xlane.f32.xlu1 %v1345_v45  ;;  %1316 = vmin.xlane.f32.xlu0 %v1315_v46 }
 0x397   :  { %1256 = vmin.xlane.f32.xlu1 %v1255_v52  ;;  %1241 = vmin.xlane.f32.xlu0 %v1240_v54 }
 0x39b   :  { %1286 = vmin.xlane.f32.xlu1 %v1285_v57  ;;  %1271 = vmin.xlane.f32.xlu0 %v1270_v58 }
 0x418   :  { %v1332_v60 = vpop.xlane.xlu1 %1331  ;;  %v1302_v12 = vpop.xlane.xlu0 %1301 }
 0x419   :  { %vm1303_vm7 = vcmp.eq.f32.partialorder %v1300_v38, %v1302_v12  ;;  %vm1333_vm8 = vcmp.eq.f32.partialorder %v1330_v37, %v1332_v60  ;;  %v1252_v38 = vand.u32 65535, %v1251_v41  ;;  %v1284_v41 = vcvt.s32.f32 %v1282_v55 }
 0x41a   :  { %v1304_v19 = vsel %vm1303_vm7, %v1299_v14, inf  ;;  %v1334_v34 = vsel %vm1333_vm8, %v1329_v22, inf  ;;  %v1338_v59 = vcvt.f32.s32 %v1332_v60 }
 0x41b   :  { %1305 = vmin.xlane.f32.xlu0 %v1304_v19 }
 0x41c   :  { %v1347_v20 = vpop.xlane.xlu1 %1346  ;;  %v1317_v13 = vpop.xlane.xlu0 %1316 }
 0x41d   :  { %vm1318_vm9 = vcmp.eq.f32.partialorder %v1315_v46, %v1317_v13  ;;  %vm1348_vm10 = vcmp.eq.f32.partialorder %v1345_v45, %v1347_v20  ;;  %v1254_v46 = vcvt.s32.f32 %v1252_v38  ;;  %v1323_v17 = vcvt.f32.s32 %v1317_v13 }
 0x41e   :  { %v1319_v33 = vsel %vm1318_vm9, %v1314_v21, inf  ;;  %v1349_v37 = vsel %vm1348_vm10, %v1344_v36, inf  ;;  %v1339_v21 = vshll.u32 %v1338_v59, 16  ;;  %v1353_v49 = vcvt.f32.s32 %v1347_v20 }
 0x41f   :  { %1320 = vmin.xlane.f32.xlu1 %v1319_v33  ;;  %1335 = vmin.xlane.f32.xlu0 %v1334_v34  ;;  %v1324_v28 = vshll.u32 %v1323_v17, 16 }
 0x420   :  { %v1257_v30 = vpop.xlane.xlu1 %1256  ;;  %v1242_v39 = vpop.xlane.xlu0 %1241 }
 0x421   :  { %vm1243_vm11 = vcmp.eq.f32.partialorder %v1240_v54, %v1242_v39  ;;  %vm1258_vm13 = vcmp.eq.f32.partialorder %v1255_v52, %v1257_v30  ;;  %v1308_v54 = vcvt.f32.s32 %v1302_v12  ;;  %v1263_v34 = vcvt.f32.s32 %v1257_v30 }
 0x422   :  { %v1244_v47 = vsel %vm1243_vm11, %v1239_v29, inf  ;;  %v1259_v45 = vsel %vm1258_vm13, %v1254_v46, inf }
 0x423   :  { %1350 = vmin.xlane.f32.xlu1 %v1349_v37  ;;  %1245 = vmin.xlane.f32.xlu0 %v1244_v47  ;;  %v1309_v52 = vshll.u32 %v1308_v54, 16  ;;  %v1264_v46 = vshll.u32 %v1263_v34, 16 }
 0x424   :  { %v5611_v35 = vpop.xlane.xlu1 %1286  ;;  %v1272_v42 = vpop.xlane.xlu0 %1271 }
 0x425   :  { %vm1273_vm14 = vcmp.eq.f32.partialorder %v1270_v58, %v1272_v42  ;;  %vm1288_vm15 = vcmp.eq.f32.partialorder %v1285_v57, %v5611_v35  ;;  %v1248_v58 = vcvt.f32.s32 %v1242_v39  ;;  %v1354_v39 = vshll.u32 %v1353_v49, 16 }
 0x426   :  { %v1274_v56 = vsel %vm1273_vm14, %v1269_v48, inf  ;;  %v1289_v50 = vsel %vm1288_vm15, %v1284_v41, inf  ;;  %v1278_v29 = vcvt.f32.s32 %v1272_v42  ;;  %v1293_v54 = vcvt.f32.s32 %v5611_v35 }
 0x427   :  { %1260 = vmin.xlane.f32.xlu1 %v1259_v45  ;;  %1275 = vmin.xlane.f32.xlu0 %v1274_v56  ;;  %v1249_v36 = vshll.u32 %v1248_v58, 16 }
 0x428   :  { %v1279_v59 = vshll.u32 %v1278_v29, 16 }
 0x42b   :  { %1290 = vmin.xlane.f32.xlu1 %v1289_v50 }
 0x4a4   :  { %v1306_v14 = vpop.xlane.xlu0 %1305 }
 0x4a5   :  { %v1307_v18 = vcvt.f32.s32 %v1306_v14 }
 0x4a7   :  { %v5614_v19 = vadd.s32 %v1309_v52, %v1307_v18 }
 0x4a8   :  { %v1321_v22 = vpop.xlane.xlu1 %1320  ;;  %v1336_v27 = vpop.xlane.xlu0 %1335 }
 0x4a9   :  { %vm1360_vm0 = vcmp.eq.s32.totalorder %v5575_v24, %v5614_v19  ;;  %v1322_v57 = vcvt.f32.s32 %v1321_v22  ;;  %v1337_v33 = vcvt.f32.s32 %v1336_v27 }
 0x4aa   :  { %v5622_v60 = vsel %vm1360_vm0, 2147483647, %v5575_v24 }
 0x4ab   :  { %v5624_v12 = vadd.s32 %v1324_v28, %v1322_v57  ;;  %v5626_v13 = vadd.s32 %v1339_v21, %v1337_v33  ;;  %v5630_v20 = vsel %vm1235_vm6, %v5622_v60, 2147483647 }
 0x4ac   :  { %v1351_v38 = vpop.xlane.xlu1 %1350  ;;  %v1246_v40 = vpop.xlane.xlu0 %1245  ;;  %v1644_v30 = vshra.s32 %v5630_v20, 16 }
 0x4ad   :  { %vm1361_vm1 = vcmp.eq.s32.totalorder %v5581_v26, %v5624_v12  ;;  %vm1362_vm3 = vcmp.eq.s32.totalorder %v5572_v23, %v5626_v13  ;;  %v1352_v37 = vcvt.f32.s32 %v1351_v38  ;;  %v1247_v47 = vcvt.f32.s32 %v1246_v40 }
 0x4ae   :  { %v5637_v48 = vcvt.s32.f32 %v1644_v30  ;;  %v5643_v42 = vsel %vm1361_vm1, 2147483647, %v5581_v26  ;;  %v5649_v55 = vsel %vm1362_vm3, 2147483647, %v5572_v23  ;;  %v4495_v24 = vsel %vm1362_vm3, 1.0, %v6706_v51 }
 0x4af   :  { %v5651_v45 = vadd.s32 %v1354_v39, %v1352_v37  ;;  %v1250_v56 = vadd.s32 %v1249_v36, %v1247_v47  ;;  %v5655_v41 = vsel %vm1235_vm6, %v5643_v42, 2147483647  ;;  %v5659_v50 = vsel %vm1235_vm6, %v5649_v55, 2147483647 }
 0x4b0   :  { %v1261_v14 = vpop.xlane.xlu1 %1260  ;;  %1647 = vmin.xlane.f32.xlu0 %v5637_v48  ;;  %v1276_v52 = vpop.xlane.xlu0 %1275  ;;  %v1659_v17 = vshra.s32 %v5655_v41, 16  ;;  %v1674_v18 = vshra.s32 %v5659_v50, 16  ;;  %v1294_v39 = vshll.u32 %v1293_v54, 16  ;;  %v1643_v23 = vand.u32 65535, %v5630_v20 }
 0x4b1   :  { %vm1363_vm4 = vcmp.eq.s32.totalorder %v5578_v25, %v5651_v45  ;;  %v1262_v21 = vcvt.f32.s32 %v1261_v14  ;;  %v1277_v49 = vcvt.f32.s32 %v1276_v52  ;;  %vm1356_vm5 = vcmp.eq.s32.totalorder %v5591_v32, %v1250_v56 }
 0x4b2   :  { %v4489_v58 = vsel %vm1356_vm5, 1.0, %v6706_v51  ;;  %v5669_v22 = vcvt.s32.f32 %v1659_v17  ;;  %v5671_v35 = vcvt.s32.f32 %v1674_v18  ;;  %v5677_v27 = vsel %vm1363_vm4, 2147483647, %v5578_v25 }
 0x4b3   :  { %v1265_v28 = vadd.s32 %v1264_v46, %v1262_v21  ;;  %v1280_v57 = vadd.s32 %v1279_v59, %v1277_v49  ;;  %4985 = vmatprep.mubr.msk.f32.mxu1 %vm1235_vm6, %v4489_v58  ;;  %v5682_v33 = vsel %vm1235_vm6, %v5677_v27, 2147483647  ;;  %v5685_v34 = vsel %vm1356_vm5, 2147483647, %v5591_v32 }
 0x4b4   :  { %1662 = vmin.xlane.f32.xlu1 %v5669_v22  ;;  %v1291_v36 = vpop.xlane.xlu1 %1290  ;;  %1677 = vmin.xlane.f32.xlu0 %v5671_v35  ;;  %v1689_v29 = vshra.s32 %v5682_v33, 16  ;;  %v5692_v38 = vsel %vm1235_vm6, %v5685_v34, 2147483647  ;;  %v4496_v26 = vsel %vm1363_vm4, 1.0, %v6706_v51  ;;  %v1645_v12 = vcvt.s32.f32 %v1643_v23 }
 0x4b5   :  { %vm1357_vm7 = vcmp.eq.s32.totalorder %v5588_v31, %v1265_v28  ;;  %v1292_v40 = vcvt.f32.s32 %v1291_v36  ;;  %v1584_v30 = vshra.s32 %v5692_v38, 16  ;;  %vm1358_vm8 = vcmp.eq.s32.totalorder %v5605_v44, %v1280_v57 }
 0x4b6   :  { %v4490_v32 = vsel %vm1357_vm7, 1.0, %v6706_v51  ;;  %v5698_v37 = vcvt.s32.f32 %v1689_v29  ;;  %v4491_v47 = vsel %vm1358_vm8, 1.0, %v6706_v51  ;;  %v5702_v46 = vsel %vm1357_vm7, 2147483647, %v5588_v31 }
 0x4b7   :  { %v1295_v56 = vadd.s32 %v1294_v39, %v1292_v40  ;;  %4986 = vmatmul.mubr.msk.f32.vlgmr.msra.gmra.mxu1 %vm1235_vm6, %v4490_v32  ;;  %v5705_v54 = vcvt.s32.f32 %v1584_v30  ;;  %v5709_v59 = vsel %vm1235_vm6, %v5702_v46, 2147483647  ;;  %v5712_v14 = vsel %vm1358_vm8, 2147483647, %v5605_v44 }
 0x4b8   :  { %4992 = vmatpush3.msra.mxu1 %v5558_v10  ;;  %1692 = vmin.xlane.f32.xlu1 %v5698_v37  ;;  %v1599_v52 = vshra.s32 %v5709_v59, 16  ;;  %v5719_v31 = vsel %vm1235_vm6, %v5712_v14, 2147483647  ;;  %v4494_v39 = vsel %vm1361_vm1, 1.0, %v6706_v51  ;;  %v1658_v13 = vand.u32 65535, %v5655_v41 }
 0x4b9   :  { %1587 = vmin.xlane.f32.xlu0 %v5705_v54  ;;  %4988 = vmatprep.mubr.msk.f32.mxu1 %vm1235_vm6, %v4491_v47  ;;  %vm1359_vm9 = vcmp.eq.s32.totalorder %v5602_v43, %v1295_v56  ;;  %v1614_v17 = vshra.s32 %v5719_v31, 16  ;;  %v1673_v25 = vand.u32 65535, %v5659_v50  ;;  %v1688_v32 = vand.u32 65535, %v5682_v33 }
 0x4ba   :  { %4993 = vmatprep.subr.mxu1 %v5564_v15  ;;  %v4492_v44 = vsel %vm1359_vm9, 1.0, %v6706_v51  ;;  %v5727_v18 = vcvt.s32.f32 %v1599_v52  ;;  %v5730_v21 = vsel %vm1359_vm9, 2147483647, %v5602_v43  ;;  %v4493_v43 = vsel %vm1360_vm0, 1.0, %v6706_v51 }
 0x4bb   :  { %4994 = vmatpush3.msra.mxu1 %v5564_v15  ;;  %v5733_v49 = vcvt.s32.f32 %v1614_v17  ;;  %v5737_v58 = vsel %vm1235_vm6, %v5730_v21, 2147483647  ;;  %v1660_v40 = vcvt.s32.f32 %v1658_v13  ;;  %v1675_v30 = vcvt.s32.f32 %v1673_v25 }
 0x4bc   :  { %4995 = vmatprep.subr.mxu1 %v5540_v6  ;;  %4989 = vmatmul.mubr.msk.f32.gmra.mxu1 %vm1235_vm6, %v4492_v44  ;;  %v1629_v28 = vshra.s32 %v5737_v58, 16  ;;  %v1583_v20 = vand.u32 65535, %v5692_v38  ;;  %v1598_v17 = vand.u32 65535, %v5709_v59 }
 0x4bd   :  { %4996 = vmatpush3.msra.mxu1 %v5540_v6  ;;  %1602 = vmin.xlane.f32.xlu1 %v5727_v18 }
 0x4be   :  { %4997 = vmatprep.subr.mxu1 %v5548_v8  ;;  %1617 = vmin.xlane.f32.xlu0 %v5733_v49  ;;  %v5750_v57 = vcvt.s32.f32 %v1629_v28  ;;  %v1585_v52 = vcvt.s32.f32 %v1583_v20  ;;  %v1600_v38 = vcvt.s32.f32 %v1598_v17  ;;  %v1628_v28 = vand.u32 65535, %v5737_v58 }
 0x4bf   :  { %4999 = vmatprep.mubr.msk.f32.mxu1 %vm1235_vm6, %v4493_v43  ;;  %4998 = vmatpush3.msra.mxu1 %v5548_v8 }
 0x4c0   :  { %5019 = vmatprep.subr.mxu1 %v5558_v10  ;;  %5000 = vmatmul.mubr.msk.f32.vlgmr.msra.gmra.mxu1 %vm1235_vm6, %v4494_v39 }
 0x4c1   :  { %5020 = vmatpush3.msra.mxu1 %v5558_v10  ;;  %1632 = vmin.xlane.f32.xlu1 %v5750_v57 }
 0x4c2   :  { %5002 = vmatprep.mubr.msk.f32.mxu1 %vm1235_vm6, %v4495_v24  ;;  %5021 = vmatprep.subr.mxu1 %v5564_v15 }
 0x4c3   :  { %5022 = vmatpush3.msra.mxu1 %v5564_v15 }
 0x4c4   :  { %5023 = vmatprep.subr.mxu1 %v5540_v6  ;;  %5003 = vmatmul.mubr.msk.f32.gmra.mxu1 %vm1235_vm6, %v4496_v26 }
 0x4c5   :  { %5024 = vmatpush3.msra.mxu1 %v5540_v6 }
 0x4c6   :  { %5025 = vmatprep.subr.mxu1 %v5548_v8 }
 0x4c7   :  { %5026 = vmatpush3.msra.mxu1 %v5548_v8 }
 0x4c8   :  { %5047 = vmatprep.subr.mxu1 %v5558_v10 }
 0x539   :  { %v1648_v19 = vpop.xlane.xlu0 %1647 }
 0x53a   :  { %vm1649_vm10 = vcmp.eq.f32.partialorder %v5637_v48, %v1648_v19  ;;  %v1690_v48 = vcvt.s32.f32 %v1688_v32  ;;  %v1654_v26 = vcvt.f32.s32 %v1648_v19 }
 0x53b   :  { %v1650_v45 = vsel %vm1649_vm10, %v1645_v12, inf }
 0x53c   :  { %1651 = vmin.xlane.f32.xlu0 %v1650_v45 }
 0x53d   :  { %v1663_v36 = vpop.xlane.xlu1 %1662  ;;  %v1678_v29 = vpop.xlane.xlu0 %1677 }
 0x53e   :  { %vm1664_vm11 = vcmp.eq.f32.partialorder %v5669_v22, %v1663_v36  ;;  %vm1679_vm13 = vcmp.eq.f32.partialorder %v5671_v35, %v1678_v29  ;;  %v1613_v22 = vand.u32 65535, %v5719_v31  ;;  %v1630_v31 = vcvt.s32.f32 %v1628_v28 }
 0x53f   :  { %v1665_v47 = vsel %vm1664_vm11, %v1660_v40, inf  ;;  %v1680_v41 = vsel %vm1679_vm13, %v1675_v30, inf  ;;  %v1669_v58 = vcvt.f32.s32 %v1663_v36  ;;  %v1684_v23 = vcvt.f32.s32 %v1678_v29 }
 0x540   :  { %1666 = vmin.xlane.f32.xlu1 %v1665_v47  ;;  %1681 = vmin.xlane.f32.xlu0 %v1680_v41  ;;  %v1615_v39 = vcvt.s32.f32 %v1613_v22 }
 0x541   :  { %v1693_v50 = vpop.xlane.xlu1 %1692  ;;  %v1670_v45 = vshll.u32 %v1669_v58, 16 }
 0x542   :  { %v1588_v56 = vpop.xlane.xlu0 %1587  ;;  %vm1694_vm14 = vcmp.eq.f32.partialorder %v5698_v37, %v1693_v50  ;;  %v1699_v40 = vcvt.f32.s32 %v1693_v50 }
 0x543   :  { %v1695_v44 = vsel %vm1694_vm14, %v1690_v48, inf  ;;  %vm1589_vm15 = vcmp.eq.f32.partialorder %v5705_v54, %v1588_v56  ;;  %v1594_v20 = vcvt.f32.s32 %v1588_v56 }
 0x544   :  { %1696 = vmin.xlane.f32.xlu1 %v1695_v44  ;;  %v1590_v35 = vsel %vm1589_vm15, %v1585_v52, inf  ;;  %v1700_v52 = vshll.u32 %v1699_v40, 16 }
 0x545   :  { %1591 = vmin.xlane.f32.xlu0 %v1590_v35  ;;  %v1595_v22 = vshll.u32 %v1594_v20, 16 }
 0x546   :  { %v1603_v33 = vpop.xlane.xlu1 %1602 }
 0x547   :  { %v1618_v43 = vpop.xlane.xlu0 %1617  ;;  %vm1604_vm0 = vcmp.eq.f32.partialorder %v5727_v18, %v1603_v33  ;;  %v1655_v18 = vshll.u32 %v1654_v26, 16  ;;  %v1609_v36 = vcvt.f32.s32 %v1603_v33 }
 0x548   :  { %v1605_v37 = vsel %vm1604_vm0, %v1600_v38, inf  ;;  %vm1619_vm1 = vcmp.eq.f32.partialorder %v5733_v49, %v1618_v43  ;;  %v1685_v49 = vshll.u32 %v1684_v23, 16  ;;  %v1624_v56 = vcvt.f32.s32 %v1618_v43 }
 0x549   :  { %1606 = vmin.xlane.f32.xlu1 %v1605_v37  ;;  %v1620_v59 = vsel %vm1619_vm1, %v1615_v39, inf  ;;  %v1610_v37 = vshll.u32 %v1609_v36, 16 }
 0x54a   :  { %1621 = vmin.xlane.f32.xlu0 %v1620_v59  ;;  %v5794_v54 = vpop.xlane.xlu1 %1632 }
 0x54b   :  { %vm1634_vm3 = vcmp.eq.f32.partialorder %v5750_v57, %v5794_v54 }
 0x54c   :  { %v1635_v24 = vsel %vm1634_vm3, %v1630_v31, inf }
 0x54d   :  { %1636 = vmin.xlane.f32.xlu1 %v1635_v24  ;;  %v1625_v24 = vshll.u32 %v1624_v56, 16 }
 0x5c5   :  { %v1652_v12 = vpop.xlane.xlu0 %1651 }
 0x5c6   :  { %v1653_v13 = vcvt.f32.s32 %v1652_v12 }
 0x5c8   :  { %v1656_v25 = vadd.s32 %v1655_v18, %v1653_v13 }
 0x5c9   :  { %v1667_v30 = vpop.xlane.xlu1 %1666  ;;  %v1682_v32 = vpop.xlane.xlu0 %1681 }
 0x5ca   :  { %v1668_v47 = vcvt.f32.s32 %v1667_v30  ;;  %v1683_v41 = vcvt.f32.s32 %v1682_v32  ;;  %vm1706_vm4 = vcmp.eq.s32.totalorder %v5622_v60, %v1656_v25 }
 0x5cb   :  { %v4509_v57 = vsel %vm1706_vm4, 1.0, %v6706_v51  ;;  %v5801_v19 = vsel %vm1706_vm4, 2147483647, %v5622_v60 }
 0x5cc   :  { %v1671_v29 = vadd.s32 %v1670_v45, %v1668_v47  ;;  %v1686_v48 = vadd.s32 %v1685_v49, %v1683_v41  ;;  %5027 = vmatprep.mubr.msk.f32.mxu1 %vm1235_vm6, %v4509_v57  ;;  %v5806_v50 = vsel %vm1235_vm6, %v5801_v19, 2147483647 }
 0x5cd   :  { %v1697_v17 = vpop.xlane.xlu1 %1696  ;;  %v1998_v44 = vshra.s32 %v5806_v50, 16 }
 0x5ce   :  { %vm1707_vm5 = vcmp.eq.s32.totalorder %v5643_v42, %v1671_v29  ;;  %v1698_v35 = vcvt.f32.s32 %v1697_v17  ;;  %v1592_v60 = vpop.xlane.xlu0 %1591  ;;  %vm1708_vm7 = vcmp.eq.s32.totalorder %v5649_v55, %v1686_v48 }
 0x5cf   :  { %v4510_v33 = vsel %vm1707_vm5, 1.0, %v6706_v51  ;;  %v1593_v38 = vcvt.f32.s32 %v1592_v60  ;;  %v5812_v28 = vcvt.s32.f32 %v1998_v44  ;;  %v4511_v39 = vsel %vm1708_vm7, 1.0, %v6706_v51 }
 0x5d0   :  { %v1701_v59 = vadd.s32 %v1700_v52, %v1698_v35  ;;  %5028 = vmatmul.mubr.msk.f32.vlgmr.msra.gmra.mxu1 %vm1235_vm6, %v4510_v33  ;;  %v5817_v43 = vsel %vm1707_vm5, 2147483647, %v5643_v42  ;;  %v5820_v31 = vsel %vm1708_vm7, 2147483647, %v5649_v55  ;;  %v1639_v42 = vcvt.f32.s32 %v5794_v54 }
 0x5d1   :  { %v1596_v26 = vadd.s32 %v1595_v22, %v1593_v38  ;;  %5048 = vmatpush3.msra.mxu1 %v5558_v10  ;;  %2001 = vmin.xlane.f32.xlu0 %v5812_v28  ;;  %v5826_v58 = vsel %vm1235_vm6, %v5817_v43, 2147483647  ;;  %v5830_v23 = vsel %vm1235_vm6, %v5820_v31, 2147483647 }
 0x5d2   :  { %v1607_v12 = vpop.xlane.xlu1 %1606  ;;  %5030 = vmatprep.mubr.msk.f32.mxu1 %vm1235_vm6, %v4511_v39  ;;  %5049 = vmatprep.subr.mxu1 %v5564_v15  ;;  %vm1709_vm8 = vcmp.eq.s32.totalorder %v5677_v27, %v1701_v59  ;;  %v2013_v55 = vshra.s32 %v5826_v58, 16  ;;  %v2028_v18 = vshra.s32 %v5830_v23, 16  ;;  %v1640_v48 = vshll.u32 %v1639_v42, 16 }
 0x5d3   :  { %v1608_v13 = vcvt.f32.s32 %v1607_v12  ;;  %v1622_v25 = vpop.xlane.xlu0 %1621  ;;  %5050 = vmatpush3.msra.mxu1 %v5564_v15  ;;  %vm1702_vm9 = vcmp.eq.s32.totalorder %v5685_v34, %v1596_v26  ;;  %v4512_v45 = vsel %vm1709_vm8, 1.0, %v6706_v51  ;;  %v5842_v54 = vsel %vm1709_vm8, 2147483647, %v5677_v27 }
 0x5d4   :  { %v1623_v49 = vcvt.f32.s32 %v1622_v25  ;;  %5051 = vmatprep.subr.mxu1 %v5540_v6  ;;  %v4505_v40 = vsel %vm1702_vm9, 1.0, %v6706_v51  ;;  %5031 = vmatmul.mubr.msk.f32.gmra.mxu1 %vm1235_vm6, %v4512_v45  ;;  %v5847_v30 = vcvt.s32.f32 %v2013_v55  ;;  %v5849_v32 = vcvt.s32.f32 %v2028_v18 }
 0x5d5   :  { %v1611_v20 = vadd.s32 %v1610_v37, %v1608_v13  ;;  %5013 = vmatprep.mubr.msk.f32.mxu0 %vm1235_vm6, %v4505_v40  ;;  %5052 = vmatpush3.msra.mxu1 %v5540_v6  ;;  %v5855_v27 = vsel %vm1235_vm6, %v5842_v54, 2147483647  ;;  %v5858_v47 = vsel %vm1702_vm9, 2147483647, %v5685_v34  ;;  %v2012_v25 = vand.u32 65535, %v5826_v58 }
 0x5d6   :  { %v1626_v41 = vadd.s32 %v1625_v24, %v1623_v49  ;;  %2016 = vmin.xlane.f32.xlu1 %v5847_v30  ;;  %v1637_v57 = vpop.xlane.xlu1 %1636  ;;  %5053 = vmatprep.subr.mxu1 %v5548_v8  ;;  %v2043_v36 = vshra.s32 %v5855_v27, 16  ;;  %v5865_v29 = vsel %vm1235_vm6, %v5858_v47, 2147483647  ;;  %v2027_v49 = vand.u32 65535, %v5830_v23 }
 0x5d7   :  { %vm1703_vm10 = vcmp.eq.s32.totalorder %v5702_v46, %v1611_v20  ;;  %v1638_v52 = vcvt.f32.s32 %v1637_v57  ;;  %2031 = vmin.xlane.f32.xlu0 %v5849_v32  ;;  %5054 = vmatpush3.msra.mxu1 %v5548_v8  ;;  %v1938_v34 = vshra.s32 %v5865_v29, 16  ;;  %v2014_v20 = vcvt.s32.f32 %v2012_v25 }
 0x5d8   :  { %5075 = vmatprep.subr.mxu1 %v5558_v10  ;;  %v4506_v56 = vsel %vm1703_vm10, 1.0, %v6706_v51  ;;  %v2045_v17 = vcvt.s32.f32 %v2043_v36  ;;  %vm1704_vm11 = vcmp.eq.s32.totalorder %v5712_v14, %v1626_v41  ;;  %v5875_v44 = vsel %vm1703_vm10, 2147483647, %v5702_v46 }
 0x5d9   :  { %v1641_v22 = vadd.s32 %v1640_v48, %v1638_v52  ;;  %5014 = vmatmul.mubr.msk.f32.vlgmr.msra.gmra.mxu0 %vm1235_vm6, %v4506_v56  ;;  %v1940_v35 = vcvt.s32.f32 %v1938_v34  ;;  %v4507_v60 = vsel %vm1704_vm11, 1.0, %v6706_v51  ;;  %v1951_v33 = vsel %vm1235_vm6, %v5875_v44, 2147483647 }
 0x5da   :  { %5034 = vmatpush3.msra.mxu0 %v5526_v2  ;;  %2046 = vmin.xlane.f32.xlu1 %v2045_v17  ;;  %v1953_v38 = vshra.s32 %v1951_v33, 16  ;;  %v5883_v39 = vsel %vm1704_vm11, 2147483647, %v5712_v14  ;;  %v2042_v41 = vand.u32 65535, %v5855_v27  ;;  %v2029_v36 = vcvt.s32.f32 %v2027_v49 }
 0x5db   :  { %1941 = vmin.xlane.f32.xlu0 %v1940_v35  ;;  %5016 = vmatprep.mubr.msk.f32.mxu0 %vm1235_vm6, %v4507_v60  ;;  %vm1705_vm13 = vcmp.eq.s32.totalorder %v5730_v21, %v1641_v22  ;;  %v1966_v46 = vsel %vm1235_vm6, %v5883_v39, 2147483647  ;;  %v1952_v56 = vand.u32 65535, %v1951_v33 }
 0x5dc   :  { %5035 = vmatprep.subr.mxu0 %v5532_v4  ;;  %v4508_v37 = vsel %vm1705_vm13, 1.0, %v6706_v51  ;;  %v1955_v59 = vcvt.s32.f32 %v1953_v38  ;;  %v1968_v24 = vshra.s32 %v1966_v46, 16  ;;  %v5892_v26 = vsel %vm1705_vm13, 2147483647, %v5730_v21 }
 0x5dd   :  { %5036 = vmatpush3.msra.mxu0 %v5532_v4  ;;  %v1981_v14 = vsel %vm1235_vm6, %v5892_v26, 2147483647  ;;  %v1997_v21 = vand.u32 65535, %v5806_v50  ;;  %v1937_v50 = vand.u32 65535, %v5865_v29  ;;  %v2044_v52 = vcvt.s32.f32 %v2042_v41 }
 0x5de   :  { %5037 = vmatprep.subr.mxu0 %v5518_v62  ;;  %5017 = vmatmul.mubr.msk.f32.gmra.mxu0 %vm1235_vm6, %v4508_v37  ;;  %v1970_v42 = vcvt.s32.f32 %v1968_v24  ;;  %v1983_v12 = vshra.s32 %v1981_v14, 16  ;;  %v1967_v27 = vand.u32 65535, %v1966_v46  ;;  %v1954_v29 = vcvt.s32.f32 %v1952_v56 }
 0x5df   :  { %5038 = vmatpush3.msra.mxu0 %v5518_v62  ;;  %1956 = vmin.xlane.f32.xlu1 %v1955_v59  ;;  %v1999_v13 = vcvt.s32.f32 %v1997_v21  ;;  %v1939_v34 = vcvt.s32.f32 %v1937_v50  ;;  %v1982_v38 = vand.u32 65535, %v1981_v14 }
 0x5e0   :  { %5039 = vmatprep.subr.mxu0 %v5522_v0  ;;  %1971 = vmin.xlane.f32.xlu0 %v1970_v42  ;;  %v1985_v55 = vcvt.s32.f32 %v1983_v12 }
 0x5e1   :  { %5040 = vmatpush3.msra.mxu0 %v5522_v0  ;;  %v1984_v33 = vcvt.s32.f32 %v1982_v38 }
 0x5e2   :  { %5061 = vmatprep.subr.mxu0 %v5526_v2 }
 0x5e3   :  { %1986 = vmin.xlane.f32.xlu1 %v1985_v55 }
 0x65a   :  { %v2002_v18 = vpop.xlane.xlu0 %2001 }
 0x65b   :  { %vm2003_vm14 = vcmp.eq.f32.partialorder %v5812_v28, %v2002_v18  ;;  %v2008_v46 = vcvt.f32.s32 %v2002_v18 }
 0x65c   :  { %v2004_v45 = vsel %vm2003_vm14, %v1999_v13, inf }
 0x65d   :  { %2005 = vmin.xlane.f32.xlu0 %v2004_v45  ;;  %v2009_v13 = vshll.u32 %v2008_v46, 16 }
 0x65f   :  { %v2017_v40 = vpop.xlane.xlu1 %2016 }
 0x660   :  { %v2032_v57 = vpop.xlane.xlu0 %2031  ;;  %vm2018_vm15 = vcmp.eq.f32.partialorder %v5847_v30, %v2017_v40  ;;  %v2023_v14 = vcvt.f32.s32 %v2017_v40 }
 0x661   :  { %v2019_v48 = vsel %vm2018_vm15, %v2014_v20, inf  ;;  %vm2033_vm0 = vcmp.eq.f32.partialorder %v5849_v32, %v2032_v57  ;;  %v1969_v32 = vcvt.s32.f32 %v1967_v27  ;;  %v2038_v45 = vcvt.f32.s32 %v2032_v57 }
 0x662   :  { %2020 = vmin.xlane.f32.xlu1 %v2019_v48  ;;  %v2034_v28 = vsel %vm2033_vm0, %v2029_v36, inf  ;;  %v2024_v41 = vshll.u32 %v2023_v14, 16 }
 0x663   :  { %2035 = vmin.xlane.f32.xlu0 %v2034_v28  ;;  %v2047_v58 = vpop.xlane.xlu1 %2046  ;;  %v2039_v18 = vshll.u32 %v2038_v45, 16 }
 0x664   :  { %v1942_v23 = vpop.xlane.xlu0 %1941  ;;  %vm2048_vm1 = vcmp.eq.f32.partialorder %v2045_v17, %v2047_v58  ;;  %v2053_v49 = vcvt.f32.s32 %v2047_v58 }
 0x665   :  { %v2049_v22 = vsel %vm2048_vm1, %v2044_v52, inf  ;;  %vm1943_vm3 = vcmp.eq.f32.partialorder %v1940_v35, %v1942_v23  ;;  %v1948_v20 = vcvt.f32.s32 %v1942_v23 }
 0x666   :  { %2050 = vmin.xlane.f32.xlu1 %v2049_v22  ;;  %v1944_v30 = vsel %vm1943_vm3, %v1939_v34, inf  ;;  %v2054_v52 = vshll.u32 %v2053_v49, 16 }
 0x667   :  { %1945 = vmin.xlane.f32.xlu0 %v1944_v30  ;;  %v1949_v23 = vshll.u32 %v1948_v20, 16 }
 0x668   :  { %v1957_v60 = vpop.xlane.xlu1 %1956 }
 0x669   :  { %v1972_v37 = vpop.xlane.xlu0 %1971  ;;  %vm1958_vm4 = vcmp.eq.f32.partialorder %v1955_v59, %v1957_v60  ;;  %v1963_v34 = vcvt.f32.s32 %v1957_v60 }
 0x66a   :  { %v1959_v24 = vsel %vm1958_vm4, %v1954_v29, inf  ;;  %vm1973_vm5 = vcmp.eq.f32.partialorder %v1970_v42, %v1972_v37  ;;  %v1978_v27 = vcvt.f32.s32 %v1972_v37 }
 0x66b   :  { %1960 = vmin.xlane.f32.xlu1 %v1959_v24  ;;  %v1974_v12 = vsel %vm1973_vm5, %v1969_v32, inf }
 0x66c   :  { %1975 = vmin.xlane.f32.xlu0 %v1974_v12  ;;  %v5911_v17 = vpop.xlane.xlu1 %1986 }
 0x66d   :  { %vm1988_vm7 = vcmp.eq.f32.partialorder %v1985_v55, %v5911_v17 }
 0x66e   :  { %v1989_v35 = vsel %vm1988_vm7, %v1984_v33, inf }
 0x66f   :  { %1990 = vmin.xlane.f32.xlu1 %v1989_v35  ;;  %v1964_v35 = vshll.u32 %v1963_v34, 16 }
 0x6e6   :  { %v2006_v21 = vpop.xlane.xlu0 %2005 }
 0x6e7   :  { %v2007_v25 = vcvt.f32.s32 %v2006_v21 }
 0x6e9   :  { %v2010_v59 = vadd.s32 %v2009_v13, %v2007_v25  ;;  %v1979_v13 = vshll.u32 %v1978_v27, 16  ;;  %v1993_v25 = vcvt.f32.s32 %v5911_v17 }
 0x6eb   :  { %v2021_v42 = vpop.xlane.xlu1 %2020  ;;  %vm2060_vm8 = vcmp.eq.s32.totalorder %v5801_v19, %v2010_v59 }
 0x6ec   :  { %v2022_v36 = vcvt.f32.s32 %v2021_v42  ;;  %v2036_v50 = vpop.xlane.xlu0 %2035  ;;  %v4525_v48 = vsel %vm2060_vm8, 1.0, %v6706_v51  ;;  %v5917_v55 = vsel %vm2060_vm8, 2147483647, %v5801_v19 }
 0x6ed   :  { %v2037_v28 = vcvt.f32.s32 %v2036_v50  ;;  %5055 = vmatprep.mubr.msk.f32.mxu1 %vm1235_vm6, %v4525_v48  ;;  %v5922_v40 = vsel %vm1235_vm6, %v5917_v55, 2147483647 }
 0x6ee   :  { %v2025_v57 = vadd.s32 %v2024_v41, %v2022_v36  ;;  %v2352_v58 = vshra.s32 %v5922_v40, 16 }
 0x6ef   :  { %v2040_v56 = vadd.s32 %v2039_v18, %v2037_v28  ;;  %v2051_v22 = vpop.xlane.xlu1 %2050 }
 0x6f0   :  { %vm2061_vm9 = vcmp.eq.s32.totalorder %v5817_v43, %v2025_v57  ;;  %v2052_v19 = vcvt.f32.s32 %v2051_v22  ;;  %v1946_v30 = vpop.xlane.xlu0 %1945  ;;  %v5926_v29 = vcvt.s32.f32 %v2352_v58 }
 0x6f1   :  { %v4526_v38 = vsel %vm2061_vm9, 1.0, %v6706_v51  ;;  %v1947_v32 = vcvt.f32.s32 %v1946_v30  ;;  %vm2062_vm10 = vcmp.eq.s32.totalorder %v5820_v31, %v2040_v56  ;;  %v5931_v24 = vsel %vm2061_vm9, 2147483647, %v5817_v43 }
 0x6f2   :  { %v2055_v12 = vadd.s32 %v2054_v52, %v2052_v19  ;;  %5056 = vmatmul.mubr.msk.f32.vlgmr.msra.gmra.mxu1 %vm1235_vm6, %v4526_v38  ;;  %2355 = vmin.xlane.f32.xlu0 %v5926_v29  ;;  %v4527_v60 = vsel %vm2062_vm10, 1.0, %v6706_v51  ;;  %v5938_v37 = vsel %vm1235_vm6, %v5931_v24, 2147483647  ;;  %v5941_v33 = vsel %vm2062_vm10, 2147483647, %v5820_v31 }
 0x6f3   :  { %v1950_v46 = vadd.s32 %v1949_v23, %v1947_v32  ;;  %5076 = vmatpush3.msra.mxu1 %v5558_v10  ;;  %5058 = vmatprep.mubr.msk.f32.mxu1 %vm1235_vm6, %v4527_v60  ;;  %v2367_v43 = vshra.s32 %v5938_v37, 16  ;;  %v5948_v21 = vsel %vm1235_vm6, %v5941_v33, 2147483647  ;;  %v1994_v52 = vshll.u32 %v1993_v25, 16 }
 0x6f4   :  { %v1961_v14 = vpop.xlane.xlu1 %1960  ;;  %5077 = vmatprep.subr.mxu1 %v5564_v15  ;;  %vm2063_vm11 = vcmp.eq.s32.totalorder %v5842_v54, %v2055_v12  ;;  %v2382_v31 = vshra.s32 %v5948_v21, 16 }
 0x6f5   :  { %v1962_v45 = vcvt.f32.s32 %v1961_v14  ;;  %v1976_v59 = vpop.xlane.xlu0 %1975  ;;  %5078 = vmatpush3.msra.mxu1 %v5564_v15  ;;  %vm2056_vm13 = vcmp.eq.s32.totalorder %v5858_v47, %v1950_v46  ;;  %v4528_v49 = vsel %vm2063_vm11, 1.0, %v6706_v51  ;;  %v5957_v20 = vcvt.s32.f32 %v2367_v43 }
 0x6f6   :  { %v1977_v42 = vcvt.f32.s32 %v1976_v59  ;;  %5079 = vmatprep.subr.mxu1 %v5540_v6  ;;  %v4521_v17 = vsel %vm2056_vm13, 1.0, %v6706_v51  ;;  %5059 = vmatmul.mubr.msk.f32.gmra.mxu1 %vm1235_vm6, %v4528_v49  ;;  %v5962_v41 = vcvt.s32.f32 %v2382_v31  ;;  %v5965_v36 = vsel %vm2063_vm11, 2147483647, %v5842_v54 }
 0x6f7   :  { %v1965_v50 = vadd.s32 %v1964_v35, %v1962_v45  ;;  %5041 = vmatprep.mubr.msk.f32.mxu0 %vm1235_vm6, %v4521_v17  ;;  %5080 = vmatpush3.msra.mxu1 %v5540_v6  ;;  %v5971_v48 = vsel %vm1235_vm6, %v5965_v36, 2147483647  ;;  %v5974_v18 = vsel %vm2056_vm13, 2147483647, %v5858_v47  ;;  %v2366_v49 = vand.u32 65535, %v5938_v37 }
 0x6f8   :  { %v1980_v28 = vadd.s32 %v1979_v13, %v1977_v42  ;;  %2370 = vmin.xlane.f32.xlu1 %v5957_v20  ;;  %v1991_v57 = vpop.xlane.xlu1 %1990  ;;  %5081 = vmatprep.subr.mxu1 %v5548_v8  ;;  %v2397_v54 = vshra.s32 %v5971_v48, 16  ;;  %v5981_v58 = vsel %vm1235_vm6, %v5974_v18, 2147483647  ;;  %v2381_v42 = vand.u32 65535, %v5948_v21 }
 0x6f9   :  { %vm2057_vm14 = vcmp.eq.s32.totalorder %v5875_v44, %v1965_v50  ;;  %v1992_v23 = vcvt.f32.s32 %v1991_v57  ;;  %2385 = vmin.xlane.f32.xlu0 %v5962_v41  ;;  %5082 = vmatpush3.msra.mxu1 %v5548_v8  ;;  %v2292_v47 = vshra.s32 %v5981_v58, 16  ;;  %v2368_v50 = vcvt.s32.f32 %v2366_v49 }
 0x6fa   :  { %v4522_v34 = vsel %vm2057_vm14, 1.0, %v6706_v51  ;;  %5103 = vmatprep.subr.mxu1 %v5558_v10  ;;  %v2399_v56 = vcvt.s32.f32 %v2397_v54  ;;  %vm2058_vm15 = vcmp.eq.s32.totalorder %v5883_v39, %v1980_v28  ;;  %v5991_v22 = vsel %vm2057_vm14, 2147483647, %v5875_v44 }
 0x6fb   :  { %v1995_v27 = vadd.s32 %v1994_v52, %v1992_v23  ;;  %5042 = vmatmul.mubr.msk.f32.vlgmr.msra.gmra.mxu0 %vm1235_vm6, %v4522_v34  ;;  %v2294_v19 = vcvt.s32.f32 %v2292_v47  ;;  %v4523_v30 = vsel %vm2058_vm15, 1.0, %v6706_v51  ;;  %v2305_v38 = vsel %vm1235_vm6, %v5991_v22, 2147483647 }
 0x6fc   :  { %5062 = vmatpush3.msra.mxu0 %v5526_v2  ;;  %2400 = vmin.xlane.f32.xlu1 %v2399_v56  ;;  %v2307_v32 = vshra.s32 %v2305_v38, 16  ;;  %v5999_v12 = vsel %vm2058_vm15, 2147483647, %v5883_v39  ;;  %v2396_v28 = vand.u32 65535, %v5971_v48  ;;  %v2383_v54 = vcvt.s32.f32 %v2381_v42 }
 0x6fd   :  { %2295 = vmin.xlane.f32.xlu0 %v2294_v19  ;;  %5044 = vmatprep.mubr.msk.f32.mxu0 %vm1235_vm6, %v4523_v30  ;;  %vm2059_vm0 = vcmp.eq.s32.totalorder %v5892_v26, %v1995_v27  ;;  %v2320_v44 = vsel %vm1235_vm6, %v5999_v12, 2147483647  ;;  %v2306_v34 = vand.u32 65535, %v2305_v38 }
 0x6fe   :  { %5063 = vmatprep.subr.mxu0 %v5532_v4  ;;  %v4524_v60 = vsel %vm2059_vm0, 1.0, %v6706_v51  ;;  %v2309_v35 = vcvt.s32.f32 %v2307_v32  ;;  %v2322_v46 = vshra.s32 %v2320_v44, 16  ;;  %v6008_v43 = vsel %vm2059_vm0, 2147483647, %v5892_v26 }
 0x6ff   :  { %5064 = vmatpush3.msra.mxu0 %v5532_v4  ;;  %v2335_v39 = vsel %vm1235_vm6, %v6008_v43, 2147483647  ;;  %v2351_v26 = vand.u32 65535, %v5922_v40  ;;  %v2291_v40 = vand.u32 65535, %v5981_v58  ;;  %v2398_v23 = vcvt.s32.f32 %v2396_v28 }
 0x700   :  { %5065 = vmatprep.subr.mxu0 %v5518_v62  ;;  %5045 = vmatmul.mubr.msk.f32.gmra.mxu0 %vm1235_vm6, %v4524_v60  ;;  %v2324_v13 = vcvt.s32.f32 %v2322_v46  ;;  %v2337_v25 = vshra.s32 %v2335_v39, 16  ;;  %v2321_v48 = vand.u32 65535, %v2320_v44  ;;  %v2308_v58 = vcvt.s32.f32 %v2306_v34 }
 0x701   :  { %5066 = vmatpush3.msra.mxu0 %v5518_v62  ;;  %2310 = vmin.xlane.f32.xlu1 %v2309_v35  ;;  %v2353_v45 = vcvt.s32.f32 %v2351_v26  ;;  %v2293_v21 = vcvt.s32.f32 %v2291_v40  ;;  %v2336_v32 = vand.u32 65535, %v2335_v39 }
 0x702   :  { %5067 = vmatprep.subr.mxu0 %v5522_v0  ;;  %2325 = vmin.xlane.f32.xlu0 %v2324_v13  ;;  %v2339_v14 = vcvt.s32.f32 %v2337_v25 }
 0x703   :  { %5068 = vmatpush3.msra.mxu0 %v5522_v0  ;;  %v2338_v38 = vcvt.s32.f32 %v2336_v32 }
 0x704   :  { %5089 = vmatprep.subr.mxu0 %v5526_v2 }
 0x705   :  { %2340 = vmin.xlane.f32.xlu1 %v2339_v14 }
 0x77b   :  { %v2356_v31 = vpop.xlane.xlu0 %2355 }
 0x77c   :  { %vm2357_vm1 = vcmp.eq.f32.partialorder %v5926_v29, %v2356_v31  ;;  %v2362_v44 = vcvt.f32.s32 %v2356_v31 }
 0x77d   :  { %v2358_v59 = vsel %vm2357_vm1, %v2353_v45, inf }
 0x77e   :  { %2359 = vmin.xlane.f32.xlu0 %v2358_v59  ;;  %v2363_v45 = vshll.u32 %v2362_v44, 16 }
 0x781   :  { %v2371_v17 = vpop.xlane.xlu1 %2370 }
 0x782   :  { %v2386_v57 = vpop.xlane.xlu0 %2385  ;;  %vm2372_vm3 = vcmp.eq.f32.partialorder %v5957_v20, %v2371_v17  ;;  %v2377_v39 = vcvt.f32.s32 %v2371_v17 }
 0x783   :  { %v2373_v52 = vsel %vm2372_vm3, %v2368_v50, inf  ;;  %vm2387_vm4 = vcmp.eq.f32.partialorder %v5962_v41, %v2386_v57  ;;  %v2323_v41 = vcvt.s32.f32 %v2321_v48 }
 0x784   :  { %2374 = vmin.xlane.f32.xlu1 %v2373_v52  ;;  %v2388_v29 = vsel %vm2387_vm4, %v2383_v54, inf  ;;  %v2378_v54 = vshll.u32 %v2377_v39, 16 }
 0x785   :  { %2389 = vmin.xlane.f32.xlu0 %v2388_v29  ;;  %v2401_v37 = vpop.xlane.xlu1 %2400 }
 0x786   :  { %v2296_v47 = vpop.xlane.xlu0 %2295  ;;  %vm2402_vm5 = vcmp.eq.f32.partialorder %v2399_v56, %v2401_v37 }
 0x787   :  { %v2403_v27 = vsel %vm2402_vm5, %v2398_v23, inf  ;;  %vm2297_vm7 = vcmp.eq.f32.partialorder %v2294_v19, %v2296_v47 }
 0x788   :  { %2404 = vmin.xlane.f32.xlu1 %v2403_v27  ;;  %v2298_v20 = vsel %vm2297_vm7, %v2293_v21, inf }
 0x789   :  { %2299 = vmin.xlane.f32.xlu0 %v2298_v20 }
 0x78a   :  { %v2311_v30 = vpop.xlane.xlu1 %2310 }
 0x78b   :  { %v2326_v60 = vpop.xlane.xlu0 %2325  ;;  %vm2312_vm8 = vcmp.eq.f32.partialorder %v2309_v35, %v2311_v30  ;;  %v2392_v35 = vcvt.f32.s32 %v2386_v57  ;;  %v2317_v21 = vcvt.f32.s32 %v2311_v30 }
 0x78c   :  { %v2313_v46 = vsel %vm2312_vm8, %v2308_v58, inf  ;;  %vm2327_vm9 = vcmp.eq.f32.partialorder %v2324_v13, %v2326_v60  ;;  %v2407_v13 = vcvt.f32.s32 %v2401_v37  ;;  %v2332_v48 = vcvt.f32.s32 %v2326_v60 }
 0x78d   :  { %2314 = vmin.xlane.f32.xlu1 %v2313_v46  ;;  %v2328_v25 = vsel %vm2327_vm9, %v2323_v41, inf  ;;  %v2393_v17 = vshll.u32 %v2392_v35, 16 }
 0x78e   :  { %2329 = vmin.xlane.f32.xlu0 %v2328_v25  ;;  %v6027_v56 = vpop.xlane.xlu1 %2340  ;;  %v2408_v23 = vshll.u32 %v2407_v13, 16 }
 0x78f   :  { %vm2342_vm10 = vcmp.eq.f32.partialorder %v2339_v14, %v6027_v56  ;;  %v2302_v14 = vcvt.f32.s32 %v2296_v47 }
 0x790   :  { %v2343_v19 = vsel %vm2342_vm10, %v2338_v38, inf }
 0x791   :  { %2344 = vmin.xlane.f32.xlu1 %v2343_v19  ;;  %v2303_v47 = vshll.u32 %v2302_v14, 16  ;;  %v2318_v19 = vshll.u32 %v2317_v21, 16 }
 0x807   :  { %v2360_v26 = vpop.xlane.xlu0 %2359 }
 0x808   :  { %v2361_v59 = vcvt.f32.s32 %v2360_v26 }
 0x80a   :  { %v2364_v49 = vadd.s32 %v2363_v45, %v2361_v59  ;;  %v2333_v45 = vshll.u32 %v2332_v48, 16  ;;  %v2347_v59 = vcvt.f32.s32 %v6027_v56 }
 0x80c   :  { %vm2414_vm11 = vcmp.eq.s32.totalorder %v5917_v55, %v2364_v49 }
 0x80d   :  { %v2375_v42 = vpop.xlane.xlu1 %2374  ;;  %v4541_v50 = vsel %vm2414_vm11, 1.0, %v6706_v51  ;;  %v6033_v28 = vsel %vm2414_vm11, 2147483647, %v5917_v55 }
 0x80e   :  { %v2376_v40 = vcvt.f32.s32 %v2375_v42  ;;  %v2390_v52 = vpop.xlane.xlu0 %2389  ;;  %5083 = vmatprep.mubr.msk.f32.mxu1 %vm1235_vm6, %v4541_v50  ;;  %v6038_v31 = vsel %vm1235_vm6, %v6033_v28, 2147483647 }
 0x80f   :  { %v2391_v57 = vcvt.f32.s32 %v2390_v52  ;;  %v2706_v29 = vshra.s32 %v6038_v31, 16 }
 0x810   :  { %v2379_v37 = vadd.s32 %v2378_v54, %v2376_v40 }
 0x811   :  { %v2394_v34 = vadd.s32 %v2393_v17, %v2391_v57  ;;  %v2405_v55 = vpop.xlane.xlu1 %2404  ;;  %v6041_v27 = vcvt.s32.f32 %v2706_v29 }
 0x812   :  { %vm2415_vm13 = vcmp.eq.s32.totalorder %v5931_v24, %v2379_v37  ;;  %v2406_v20 = vcvt.f32.s32 %v2405_v55  ;;  %v2300_v58 = vpop.xlane.xlu0 %2299 }
 0x813   :  { %v4542_v32 = vsel %vm2415_vm13, 1.0, %v6706_v51  ;;  %v2301_v41 = vcvt.f32.s32 %v2300_v58  ;;  %2709 = vmin.xlane.f32.xlu0 %v6041_v27  ;;  %vm2416_vm14 = vcmp.eq.s32.totalorder %v5941_v33, %v2394_v34  ;;  %v6048_v46 = vsel %vm2415_vm13, 2147483647, %v5931_v24 }
 0x814   :  { %v2409_v30 = vadd.s32 %v2408_v23, %v2406_v20  ;;  %5084 = vmatmul.mubr.msk.f32.vlgmr.msra.gmra.mxu1 %vm1235_vm6, %v4542_v32  ;;  %v4543_v25 = vsel %vm2416_vm14, 1.0, %v6706_v51  ;;  %v6054_v60 = vsel %vm1235_vm6, %v6048_v46, 2147483647  ;;  %v6057_v38 = vsel %vm2416_vm14, 2147483647, %v5941_v33 }
 0x815   :  { %v2304_v44 = vadd.s32 %v2303_v47, %v2301_v41  ;;  %5104 = vmatpush3.msra.mxu1 %v5558_v10  ;;  %5086 = vmatprep.mubr.msk.f32.mxu1 %vm1235_vm6, %v4543_v25  ;;  %v2721_v24 = vshra.s32 %v6054_v60, 16  ;;  %v6064_v26 = vsel %vm1235_vm6, %v6057_v38, 2147483647  ;;  %v2348_v23 = vshll.u32 %v2347_v59, 16 }
 0x816   :  { %v2315_v39 = vpop.xlane.xlu1 %2314  ;;  %5105 = vmatprep.subr.mxu1 %v5564_v15  ;;  %vm2417_vm15 = vcmp.eq.s32.totalorder %v5965_v36, %v2409_v30  ;;  %v2736_v33 = vshra.s32 %v6064_v26, 16 }
 0x817   :  { %v2316_v49 = vcvt.f32.s32 %v2315_v39  ;;  %v2330_v35 = vpop.xlane.xlu0 %2329  ;;  %5106 = vmatpush3.msra.mxu1 %v5564_v15  ;;  %vm2410_vm0 = vcmp.eq.s32.totalorder %v5974_v18, %v2304_v44  ;;  %v4544_v13 = vsel %vm2417_vm15, 1.0, %v6706_v51  ;;  %v6073_v42 = vcvt.s32.f32 %v2721_v24 }
 0x818   :  { %v2331_v50 = vcvt.f32.s32 %v2330_v35  ;;  %5107 = vmatprep.subr.mxu1 %v5540_v6  ;;  %v4537_v56 = vsel %vm2410_vm0, 1.0, %v6706_v51  ;;  %5087 = vmatmul.mubr.msk.f32.gmra.mxu1 %vm1235_vm6, %v4544_v13  ;;  %v6078_v54 = vcvt.s32.f32 %v2736_v33  ;;  %v6081_v14 = vsel %vm2417_vm15, 2147483647, %v5965_v36 }
 0x819   :  { %v2319_v40 = vadd.s32 %v2318_v19, %v2316_v49  ;;  %5069 = vmatprep.mubr.msk.f32.mxu0 %vm1235_vm6, %v4537_v56  ;;  %5108 = vmatpush3.msra.mxu1 %v5540_v6  ;;  %v6087_v52 = vsel %vm1235_vm6, %v6081_v14, 2147483647  ;;  %v6090_v17 = vsel %vm2410_vm0, 2147483647, %v5974_v18  ;;  %v2720_v13 = vand.u32 65535, %v6054_v60 }
 0x81a   :  { %v2334_v57 = vadd.s32 %v2333_v45, %v2331_v50  ;;  %2724 = vmin.xlane.f32.xlu1 %v6073_v42  ;;  %v2345_v29 = vpop.xlane.xlu1 %2344  ;;  %5109 = vmatprep.subr.mxu1 %v5548_v8  ;;  %v2751_v36 = vshra.s32 %v6087_v52, 16  ;;  %v6097_v37 = vsel %vm1235_vm6, %v6090_v17, 2147483647  ;;  %v2735_v50 = vand.u32 65535, %v6064_v26 }
 0x81b   :  { %vm2411_vm1 = vcmp.eq.s32.totalorder %v5991_v22, %v2319_v40  ;;  %v2346_v21 = vcvt.f32.s32 %v2345_v29  ;;  %2739 = vmin.xlane.f32.xlu0 %v6078_v54  ;;  %5110 = vmatpush3.msra.mxu1 %v5548_v8  ;;  %v2646_v18 = vshra.s32 %v6097_v37, 16  ;;  %v2722_v40 = vcvt.s32.f32 %v2720_v13 }
 0x81c   :  { %v4538_v34 = vsel %vm2411_vm1, 1.0, %v6706_v51  ;;  %5131 = vmatprep.subr.mxu1 %v5558_v10  ;;  %v2753_v55 = vcvt.s32.f32 %v2751_v36  ;;  %vm2412_vm3 = vcmp.eq.s32.totalorder %v5999_v12, %v2334_v57  ;;  %v6107_v47 = vsel %vm2411_vm1, 2147483647, %v5991_v22 }
 0x81d   :  { %v2349_v48 = vadd.s32 %v2348_v23, %v2346_v21  ;;  %5070 = vmatmul.mubr.msk.f32.vlgmr.msra.gmra.mxu0 %vm1235_vm6, %v4538_v34  ;;  %v2648_v20 = vcvt.s32.f32 %v2646_v18  ;;  %v4539_v58 = vsel %vm2412_vm3, 1.0, %v6706_v51  ;;  %v2659_v32 = vsel %vm1235_vm6, %v6107_v47, 2147483647 }
 0x81e   :  { %5090 = vmatpush3.msra.mxu0 %v5526_v2  ;;  %2754 = vmin.xlane.f32.xlu1 %v2753_v55  ;;  %v2661_v41 = vshra.s32 %v2659_v32, 16  ;;  %v6115_v30 = vsel %vm2412_vm3, 2147483647, %v5999_v12  ;;  %v2750_v57 = vand.u32 65535, %v6087_v52  ;;  %v2737_v36 = vcvt.s32.f32 %v2735_v50 }
 0x81f   :  { %2649 = vmin.xlane.f32.xlu0 %v2648_v20  ;;  %5072 = vmatprep.mubr.msk.f32.mxu0 %vm1235_vm6, %v4539_v58  ;;  %vm2413_vm4 = vcmp.eq.s32.totalorder %v6008_v43, %v2349_v48  ;;  %v2674_v22 = vsel %vm1235_vm6, %v6115_v30, 2147483647  ;;  %v2660_v34 = vand.u32 65535, %v2659_v32 }
 0x820   :  { %5091 = vmatprep.subr.mxu0 %v5532_v4  ;;  %v4540_v25 = vsel %vm2413_vm4, 1.0, %v6706_v51  ;;  %v2663_v19 = vcvt.s32.f32 %v2661_v41  ;;  %v2676_v44 = vshra.s32 %v2674_v22, 16  ;;  %v6124_v24 = vsel %vm2413_vm4, 2147483647, %v6008_v43 }
 0x821   :  { %5092 = vmatpush3.msra.mxu0 %v5532_v4  ;;  %v2689_v12 = vsel %vm1235_vm6, %v6124_v24, 2147483647  ;;  %v2705_v43 = vand.u32 65535, %v6038_v31  ;;  %v2645_v31 = vand.u32 65535, %v6097_v37  ;;  %v2752_v60 = vcvt.s32.f32 %v2750_v57 }
 0x822   :  { %5093 = vmatprep.subr.mxu0 %v5518_v62  ;;  %5073 = vmatmul.mubr.msk.f32.gmra.mxu0 %vm1235_vm6, %v4540_v25  ;;  %v2678_v45 = vcvt.s32.f32 %v2676_v44  ;;  %v2691_v59 = vshra.s32 %v2689_v12, 16  ;;  %v2675_v52 = vand.u32 65535, %v2674_v22  ;;  %v2662_v37 = vcvt.s32.f32 %v2660_v34 }
 0x823   :  { %5094 = vmatpush3.msra.mxu0 %v5518_v62  ;;  %2664 = vmin.xlane.f32.xlu1 %v2663_v19  ;;  %v2707_v49 = vcvt.s32.f32 %v2705_v43  ;;  %v2647_v26 = vcvt.s32.f32 %v2645_v31  ;;  %v2690_v41 = vand.u32 65535, %v2689_v12 }
 0x824   :  { %5095 = vmatprep.subr.mxu0 %v5522_v0  ;;  %2679 = vmin.xlane.f32.xlu0 %v2678_v45  ;;  %v2693_v39 = vcvt.s32.f32 %v2691_v59 }
 0x825   :  { %5096 = vmatpush3.msra.mxu0 %v5522_v0  ;;  %v2692_v32 = vcvt.s32.f32 %v2690_v41 }
 0x826   :  { %5117 = vmatprep.subr.mxu0 %v5526_v2 }
 0x827   :  { %2694 = vmin.xlane.f32.xlu1 %v2693_v39 }
 0x89c   :  { %v2710_v33 = vpop.xlane.xlu0 %2709 }
 0x89d   :  { %vm2711_vm5 = vcmp.eq.f32.partialorder %v6041_v27, %v2710_v33  ;;  %v2716_v22 = vcvt.f32.s32 %v2710_v33 }
 0x89e   :  { %v2712_v35 = vsel %vm2711_vm5, %v2707_v49, inf }
 0x89f   :  { %2713 = vmin.xlane.f32.xlu0 %v2712_v35  ;;  %v2717_v49 = vshll.u32 %v2716_v22, 16 }
 0x8a3   :  { %v2725_v56 = vpop.xlane.xlu1 %2724 }
 0x8a4   :  { %v2740_v29 = vpop.xlane.xlu0 %2739  ;;  %vm2726_vm7 = vcmp.eq.f32.partialorder %v6073_v42, %v2725_v56  ;;  %v2731_v13 = vcvt.f32.s32 %v2725_v56 }
 0x8a5   :  { %v2727_v23 = vsel %vm2726_vm7, %v2722_v40, inf  ;;  %vm2741_vm8 = vcmp.eq.f32.partialorder %v6078_v54, %v2740_v29  ;;  %v2677_v54 = vcvt.s32.f32 %v2675_v52 }
 0x8a6   :  { %2728 = vmin.xlane.f32.xlu1 %v2727_v23  ;;  %v2742_v27 = vsel %vm2741_vm8, %v2737_v36, inf  ;;  %v2732_v33 = vshll.u32 %v2731_v13, 16 }
 0x8a7   :  { %2743 = vmin.xlane.f32.xlu0 %v2742_v27  ;;  %v2755_v21 = vpop.xlane.xlu1 %2754 }
 0x8a8   :  { %v2650_v18 = vpop.xlane.xlu0 %2649  ;;  %vm2756_vm9 = vcmp.eq.f32.partialorder %v2753_v55, %v2755_v21  ;;  %v2761_v40 = vcvt.f32.s32 %v2755_v21 }
 0x8a9   :  { %v2757_v48 = vsel %vm2756_vm9, %v2752_v60, inf  ;;  %vm2651_vm10 = vcmp.eq.f32.partialorder %v2648_v20, %v2650_v18  ;;  %v2656_v36 = vcvt.f32.s32 %v2650_v18 }
 0x8aa   :  { %2758 = vmin.xlane.f32.xlu1 %v2757_v48  ;;  %v2652_v42 = vsel %vm2651_vm10, %v2647_v26, inf }
 0x8ab   :  { %2653 = vmin.xlane.f32.xlu0 %v2652_v42  ;;  %v2657_v52 = vshll.u32 %v2656_v36, 16 }
 0x8ac   :  { %v2665_v58 = vpop.xlane.xlu1 %2664 }
 0x8ad   :  { %v2680_v25 = vpop.xlane.xlu0 %2679  ;;  %vm2666_vm11 = vcmp.eq.f32.partialorder %v2663_v19, %v2665_v58  ;;  %v2746_v19 = vcvt.f32.s32 %v2740_v29  ;;  %v2671_v21 = vcvt.f32.s32 %v2665_v58 }
 0x8ae   :  { %v2667_v44 = vsel %vm2666_vm11, %v2662_v37, inf  ;;  %vm2681_vm13 = vcmp.eq.f32.partialorder %v2678_v45, %v2680_v25  ;;  %v2686_v42 = vcvt.f32.s32 %v2680_v25 }
 0x8af   :  { %2668 = vmin.xlane.f32.xlu1 %v2667_v44  ;;  %v2682_v59 = vsel %vm2681_vm13, %v2677_v54, inf  ;;  %v2747_v23 = vshll.u32 %v2746_v19, 16 }
 0x8b0   :  { %2683 = vmin.xlane.f32.xlu0 %v2682_v59  ;;  %v6143_v55 = vpop.xlane.xlu1 %2694 }
 0x8b1   :  { %vm2696_vm14 = vcmp.eq.f32.partialorder %v2693_v39, %v6143_v55 }
 0x8b2   :  { %v2697_v20 = vsel %vm2696_vm14, %v2692_v32, inf }
 0x8b3   :  { %2698 = vmin.xlane.f32.xlu1 %v2697_v20  ;;  %v2672_v20 = vshll.u32 %v2671_v21, 16 }
 0x928   :  { %v2714_v43 = vpop.xlane.xlu0 %2713 }
 0x929   :  { %v2715_v35 = vcvt.f32.s32 %v2714_v43 }
 0x92b   :  { %v2718_v12 = vadd.s32 %v2717_v49, %v2715_v35  ;;  %v2687_v49 = vshll.u32 %v2686_v42, 16  ;;  %v2701_v35 = vcvt.f32.s32 %v6143_v55 }
 0x92d   :  { %vm2768_vm15 = vcmp.eq.s32.totalorder %v6033_v28, %v2718_v12 }
 0x92e   :  { %v4557_v45 = vsel %vm2768_vm15, 1.0, %v6706_v51  ;;  %v6149_v50 = vsel %vm2768_vm15, 2147483647, %v6033_v28  ;;  %v2762_v28 = vshll.u32 %v2761_v40, 16 }
 0x92f   :  { %v2729_v57 = vpop.xlane.xlu1 %2728  ;;  %5111 = vmatprep.mubr.msk.f32.mxu1 %vm1235_vm6, %v4557_v45  ;;  %v6154_v39 = vsel %vm1235_vm6, %v6149_v50, 2147483647 }
 0x930   :  { %v2730_v31 = vcvt.f32.s32 %v2729_v57  ;;  %v2744_v56 = vpop.xlane.xlu0 %2743  ;;  %v3060_v29 = vshra.s32 %v6154_v39, 16 }
 0x931   :  { %v2745_v27 = vcvt.f32.s32 %v2744_v56 }
 0x932   :  { %v2733_v60 = vadd.s32 %v2732_v33, %v2730_v31  ;;  %v6157_v26 = vcvt.s32.f32 %v3060_v29 }
 0x933   :  { %v2748_v34 = vadd.s32 %v2747_v23, %v2745_v27  ;;  %v2759_v48 = vpop.xlane.xlu1 %2758 }
 0x934   :  { %vm2769_vm0 = vcmp.eq.s32.totalorder %v6048_v46, %v2733_v60  ;;  %v2760_v37 = vcvt.f32.s32 %v2759_v48  ;;  %v2654_v41 = vpop.xlane.xlu0 %2653  ;;  %3063 = vmin.xlane.f32.xlu0 %v6157_v26 }
 0x935   :  { %v4558_v18 = vsel %vm2769_vm0, 1.0, %v6706_v51  ;;  %v2655_v54 = vcvt.f32.s32 %v2654_v41  ;;  %vm2770_vm1 = vcmp.eq.s32.totalorder %v6057_v38, %v2748_v34  ;;  %v6164_v44 = vsel %vm2769_vm0, 2147483647, %v6048_v46 }
 0x936   :  { %v2763_v59 = vadd.s32 %v2762_v28, %v2760_v37  ;;  %5112 = vmatmul.mubr.msk.f32.vlgmr.msra.gmra.mxu1 %vm1235_vm6, %v4558_v18  ;;  %v4559_v58 = vsel %vm2770_vm1, 1.0, %v6706_v51  ;;  %v6170_v25 = vsel %vm1235_vm6, %v6164_v44, 2147483647  ;;  %v6173_v32 = vsel %vm2770_vm1, 2147483647, %v6057_v38 }
 0x937   :  { %v2658_v22 = vadd.s32 %v2657_v52, %v2655_v54  ;;  %5132 = vmatpush3.msra.mxu1 %v5558_v10  ;;  %5114 = vmatprep.mubr.msk.f32.mxu1 %vm1235_vm6, %v4559_v58  ;;  %v3075_v46 = vshra.s32 %v6170_v25, 16  ;;  %v6180_v43 = vsel %vm1235_vm6, %v6173_v32, 2147483647  ;;  %v2702_v28 = vshll.u32 %v2701_v35, 16 }
 0x938   :  { %v2669_v12 = vpop.xlane.xlu1 %2668  ;;  %5133 = vmatprep.subr.mxu1 %v5564_v15  ;;  %vm2771_vm3 = vcmp.eq.s32.totalorder %v6081_v14, %v2763_v59  ;;  %v3090_v38 = vshra.s32 %v6180_v43, 16 }
 0x939   :  { %v2670_v13 = vcvt.f32.s32 %v2669_v12  ;;  %v2684_v19 = vpop.xlane.xlu0 %2683  ;;  %5134 = vmatpush3.msra.mxu1 %v5564_v15  ;;  %vm2764_vm4 = vcmp.eq.s32.totalorder %v6090_v17, %v2658_v22  ;;  %v4560_v45 = vsel %vm2771_vm3, 1.0, %v6706_v51  ;;  %v6189_v40 = vcvt.s32.f32 %v3075_v46 }
 0x93a   :  { %v2685_v57 = vcvt.f32.s32 %v2684_v19  ;;  %5135 = vmatprep.subr.mxu1 %v5540_v6  ;;  %v4553_v55 = vsel %vm2764_vm4, 1.0, %v6706_v51  ;;  %5115 = vmatmul.mubr.msk.f32.gmra.mxu1 %vm1235_vm6, %v4560_v45  ;;  %v6194_v33 = vcvt.s32.f32 %v3090_v38  ;;  %v6197_v36 = vsel %vm2771_vm3, 2147483647, %v6081_v14 }
 0x93b   :  { %v2673_v31 = vadd.s32 %v2672_v20, %v2670_v13  ;;  %5097 = vmatprep.mubr.msk.f32.mxu0 %vm1235_vm6, %v4553_v55  ;;  %5136 = vmatpush3.msra.mxu1 %v5540_v6  ;;  %v6203_v56 = vsel %vm1235_vm6, %v6197_v36, 2147483647  ;;  %v6206_v29 = vsel %vm2764_vm4, 2147483647, %v6090_v17  ;;  %v3074_v45 = vand.u32 65535, %v6170_v25 }
 0x93c   :  { %v2688_v23 = vadd.s32 %v2687_v49, %v2685_v57  ;;  %3078 = vmin.xlane.f32.xlu1 %v6189_v40  ;;  %v2699_v27 = vpop.xlane.xlu1 %2698  ;;  %5137 = vmatprep.subr.mxu1 %v5548_v8  ;;  %v3105_v14 = vshra.s32 %v6203_v56, 16  ;;  %v6213_v60 = vsel %vm1235_vm6, %v6206_v29, 2147483647  ;;  %v3089_v57 = vand.u32 65535, %v6180_v43 }
 0x93d   :  { %vm2765_vm5 = vcmp.eq.s32.totalorder %v6107_v47, %v2673_v31  ;;  %v2700_v21 = vcvt.f32.s32 %v2699_v27  ;;  %3093 = vmin.xlane.f32.xlu0 %v6194_v33  ;;  %5138 = vmatpush3.msra.mxu1 %v5548_v8  ;;  %v3000_v17 = vshra.s32 %v6213_v60, 16  ;;  %v3076_v31 = vcvt.s32.f32 %v3074_v45 }
 0x93e   :  { %v4554_v34 = vsel %vm2765_vm5, 1.0, %v6706_v51  ;;  %5159 = vmatprep.subr.mxu1 %v5558_v10  ;;  %v3107_v48 = vcvt.s32.f32 %v3105_v14  ;;  %vm2766_vm7 = vcmp.eq.s32.totalorder %v6115_v30, %v2688_v23  ;;  %v6223_v52 = vsel %vm2765_vm5, 2147483647, %v6107_v47 }
 0x93f   :  { %v2703_v42 = vadd.s32 %v2702_v28, %v2700_v21  ;;  %5098 = vmatmul.mubr.msk.f32.vlgmr.msra.gmra.mxu0 %vm1235_vm6, %v4554_v34  ;;  %v3002_v37 = vcvt.s32.f32 %v3000_v17  ;;  %v4555_v41 = vsel %vm2766_vm7, 1.0, %v6706_v51  ;;  %v3013_v18 = vsel %vm1235_vm6, %v6223_v52, 2147483647 }
 0x940   :  { %5118 = vmatpush3.msra.mxu0 %v5526_v2  ;;  %3108 = vmin.xlane.f32.xlu1 %v3107_v48  ;;  %v3015_v54 = vshra.s32 %v3013_v18, 16  ;;  %v6231_v59 = vsel %vm2766_vm7, 2147483647, %v6115_v30  ;;  %v3104_v23 = vand.u32 65535, %v6203_v56  ;;  %v3091_v14 = vcvt.s32.f32 %v3089_v57 }
 0x941   :  { %3003 = vmin.xlane.f32.xlu0 %v3002_v37  ;;  %5100 = vmatprep.mubr.msk.f32.mxu0 %vm1235_vm6, %v4555_v41  ;;  %vm2767_vm8 = vcmp.eq.s32.totalorder %v6124_v24, %v2703_v42  ;;  %v3028_v47 = vsel %vm1235_vm6, %v6231_v59, 2147483647  ;;  %v3014_v34 = vand.u32 65535, %v3013_v18 }
 0x942   :  { %5119 = vmatprep.subr.mxu0 %v5532_v4  ;;  %v4556_v58 = vsel %vm2767_vm8, 1.0, %v6706_v51  ;;  %v3017_v20 = vcvt.s32.f32 %v3015_v54  ;;  %v3030_v22 = vshra.s32 %v3028_v47, 16  ;;  %v6240_v46 = vsel %vm2767_vm8, 2147483647, %v6124_v24 }
 0x943   :  { %5120 = vmatpush3.msra.mxu0 %v5532_v4  ;;  %v3043_v30 = vsel %vm1235_vm6, %v6240_v46, 2147483647  ;;  %v3059_v24 = vand.u32 65535, %v6154_v39  ;;  %v2999_v39 = vand.u32 65535, %v6213_v60  ;;  %v3106_v25 = vcvt.s32.f32 %v3104_v23 }
 0x944   :  { %5121 = vmatprep.subr.mxu0 %v5518_v62  ;;  %5101 = vmatmul.mubr.msk.f32.gmra.mxu0 %vm1235_vm6, %v4556_v58  ;;  %v3032_v49 = vcvt.s32.f32 %v3030_v22  ;;  %v3045_v35 = vshra.s32 %v3043_v30, 16  ;;  %v3029_v56 = vand.u32 65535, %v3028_v47  ;;  %v3016_v60 = vcvt.s32.f32 %v3014_v34 }
 0x945   :  { %5122 = vmatpush3.msra.mxu0 %v5518_v62  ;;  %3018 = vmin.xlane.f32.xlu1 %v3017_v20  ;;  %v3061_v13 = vcvt.s32.f32 %v3059_v24  ;;  %v3001_v43 = vcvt.s32.f32 %v2999_v39  ;;  %v3044_v54 = vand.u32 65535, %v3043_v30 }
 0x946   :  { %5123 = vmatprep.subr.mxu0 %v5522_v0  ;;  %3033 = vmin.xlane.f32.xlu0 %v3032_v49  ;;  %v3047_v12 = vcvt.s32.f32 %v3045_v35 }
 0x947   :  { %5124 = vmatpush3.msra.mxu0 %v5522_v0  ;;  %v3046_v18 = vcvt.s32.f32 %v3044_v54 }
 0x948   :  { %5145 = vmatprep.subr.mxu0 %v5526_v2 }
 0x949   :  { %3048 = vmin.xlane.f32.xlu1 %v3047_v12 }
 0x9bd   :  { %v3064_v38 = vpop.xlane.xlu0 %3063 }
 0x9be   :  { %vm3065_vm9 = vcmp.eq.f32.partialorder %v6157_v26, %v3064_v38  ;;  %v3070_v47 = vcvt.f32.s32 %v3064_v38 }
 0x9bf   :  { %v3066_v19 = vsel %vm3065_vm9, %v3061_v13, inf }
 0x9c0   :  { %3067 = vmin.xlane.f32.xlu0 %v3066_v19  ;;  %v3071_v13 = vshll.u32 %v3070_v47, 16 }
 0x9c5   :  { %v3079_v55 = vpop.xlane.xlu1 %3078 }
 0x9c6   :  { %v3094_v27 = vpop.xlane.xlu0 %3093  ;;  %vm3080_vm10 = vcmp.eq.f32.partialorder %v6189_v40, %v3079_v55  ;;  %v3085_v45 = vcvt.f32.s32 %v3079_v55 }
 0x9c7   :  { %v3081_v28 = vsel %vm3080_vm10, %v3076_v31, inf  ;;  %vm3095_vm11 = vcmp.eq.f32.partialorder %v6194_v33, %v3094_v27  ;;  %v3031_v33 = vcvt.s32.f32 %v3029_v56 }
 0x9c8   :  { %3082 = vmin.xlane.f32.xlu1 %v3081_v28  ;;  %v3096_v26 = vsel %vm3095_vm11, %v3091_v14, inf  ;;  %v3086_v14 = vshll.u32 %v3085_v45, 16 }
 0x9c9   :  { %3097 = vmin.xlane.f32.xlu0 %v3096_v26  ;;  %v3109_v21 = vpop.xlane.xlu1 %3108 }
 0x9ca   :  { %v3004_v17 = vpop.xlane.xlu0 %3003  ;;  %vm3110_vm13 = vcmp.eq.f32.partialorder %v3107_v48, %v3109_v21  ;;  %v3115_v38 = vcvt.f32.s32 %v3109_v21 }
 0x9cb   :  { %v3111_v42 = vsel %vm3110_vm13, %v3106_v25, inf  ;;  %vm3005_vm14 = vcmp.eq.f32.partialorder %v3002_v37, %v3004_v17  ;;  %v3010_v55 = vcvt.f32.s32 %v3004_v17 }
 0x9cc   :  { %3112 = vmin.xlane.f32.xlu1 %v3111_v42  ;;  %v3006_v40 = vsel %vm3005_vm14, %v3001_v43, inf  ;;  %v3116_v43 = vshll.u32 %v3115_v38, 16 }
 0x9cd   :  { %3007 = vmin.xlane.f32.xlu0 %v3006_v40  ;;  %v3011_v40 = vshll.u32 %v3010_v55, 16 }
 0x9ce   :  { %v3019_v41 = vpop.xlane.xlu1 %3018 }
 0x9cf   :  { %v3034_v58 = vpop.xlane.xlu0 %3033  ;;  %vm3020_vm15 = vcmp.eq.f32.partialorder %v3017_v20, %v3019_v41  ;;  %v3100_v20 = vcvt.f32.s32 %v3094_v27  ;;  %v3025_v34 = vcvt.f32.s32 %v3019_v41 }
 0x9d0   :  { %v3021_v22 = vsel %vm3020_vm15, %v3016_v60, inf  ;;  %vm3035_vm0 = vcmp.eq.f32.partialorder %v3032_v49, %v3034_v58  ;;  %v3040_v21 = vcvt.f32.s32 %v3034_v58 }
 0x9d1   :  { %3022 = vmin.xlane.f32.xlu1 %v3021_v22  ;;  %v3036_v35 = vsel %vm3035_vm0, %v3031_v33, inf  ;;  %v3101_v27 = vshll.u32 %v3100_v20, 16 }
 0x9d2   :  { %3037 = vmin.xlane.f32.xlu0 %v3036_v35  ;;  %v6259_v48 = vpop.xlane.xlu1 %3048 }
 0x9d3   :  { %vm3050_vm1 = vcmp.eq.f32.partialorder %v3047_v12, %v6259_v48 }
 0x9d4   :  { %v3051_v37 = vsel %vm3050_vm1, %v3046_v18, inf }
 0x9d5   :  { %3052 = vmin.xlane.f32.xlu1 %v3051_v37  ;;  %v3026_v37 = vshll.u32 %v3025_v34, 16 }
 0xa49   :  { %v3068_v24 = vpop.xlane.xlu0 %3067 }
 0xa4a   :  { %v3069_v19 = vcvt.f32.s32 %v3068_v24 }
 0xa4c   :  { %v3072_v30 = vadd.s32 %v3071_v13, %v3069_v19  ;;  %v3041_v13 = vshll.u32 %v3040_v21, 16 }
 0xa4e   :  { %vm3122_vm3 = vcmp.eq.s32.totalorder %v6149_v50, %v3072_v30 }
 0xa4f   :  { %v4573_v49 = vsel %vm3122_vm3, 1.0, %v6706_v51  ;;  %v6265_v57 = vsel %vm3122_vm3, 2147483647, %v6149_v50 }
 0xa50   :  { %5139 = vmatprep.mubr.msk.f32.mxu1 %vm1235_vm6, %v4573_v49  ;;  %v6270_v12 = vsel %vm1235_vm6, %v6265_v57, 2147483647 }
 0xa51   :  { %v3083_v31 = vpop.xlane.xlu1 %3082  ;;  %v3414_v23 = vshra.s32 %v6270_v12, 16 }
 0xa52   :  { %v3084_v39 = vcvt.f32.s32 %v3083_v31  ;;  %v3098_v28 = vpop.xlane.xlu0 %3097 }
 0xa53   :  { %v3099_v26 = vcvt.f32.s32 %v3098_v28  ;;  %v6273_v25 = vcvt.s32.f32 %v3414_v23 }
 0xa54   :  { %v3087_v50 = vadd.s32 %v3086_v14, %v3084_v39 }
 0xa55   :  { %v3102_v42 = vadd.s32 %v3101_v27, %v3099_v26  ;;  %v3113_v56 = vpop.xlane.xlu1 %3112  ;;  %3417 = vmin.xlane.f32.xlu0 %v6273_v25 }
 0xa56   :  { %vm3123_vm4 = vcmp.eq.s32.totalorder %v6164_v44, %v3087_v50  ;;  %v3114_v60 = vcvt.f32.s32 %v3113_v56  ;;  %v3008_v54 = vpop.xlane.xlu0 %3007 }
 0xa57   :  { %v4574_v17 = vsel %vm3123_vm4, 1.0, %v6706_v51  ;;  %v3009_v33 = vcvt.f32.s32 %v3008_v54  ;;  %vm3124_vm5 = vcmp.eq.s32.totalorder %v6173_v32, %v3102_v42  ;;  %v6280_v22 = vsel %vm3123_vm4, 2147483647, %v6164_v44 }
 0xa58   :  { %v3117_v35 = vadd.s32 %v3116_v43, %v3114_v60  ;;  %5140 = vmatmul.mubr.msk.f32.vlgmr.msra.gmra.mxu1 %vm1235_vm6, %v4574_v17  ;;  %v4575_v41 = vsel %vm3124_vm5, 1.0, %v6706_v51  ;;  %v6285_v18 = vsel %vm3124_vm5, 2147483647, %v6173_v32  ;;  %v6289_v58 = vsel %vm1235_vm6, %v6280_v22, 2147483647 }
 0xa59   :  { %v3012_v47 = vadd.s32 %v3011_v40, %v3009_v33  ;;  %5160 = vmatpush3.msra.mxu1 %v5558_v10  ;;  %5142 = vmatprep.mubr.msk.f32.mxu1 %vm1235_vm6, %v4575_v41  ;;  %v3429_v44 = vshra.s32 %v6289_v58, 16  ;;  %v6296_v24 = vsel %vm1235_vm6, %v6285_v18, 2147483647  ;;  %v3055_v32 = vcvt.f32.s32 %v6259_v48 }
 0xa5a   :  { %v3023_v19 = vpop.xlane.xlu1 %3022  ;;  %5161 = vmatprep.subr.mxu1 %v5564_v15  ;;  %vm3125_vm7 = vcmp.eq.s32.totalorder %v6197_v36, %v3117_v35  ;;  %v3444_v30 = vshra.s32 %v6296_v24, 16 }
 0xa5b   :  { %v3024_v45 = vcvt.f32.s32 %v3023_v19  ;;  %v3038_v20 = vpop.xlane.xlu0 %3037  ;;  %5162 = vmatpush3.msra.mxu1 %v5564_v15  ;;  %vm3118_vm8 = vcmp.eq.s32.totalorder %v6206_v29, %v3012_v47  ;;  %v4576_v49 = vsel %vm3125_vm7, 1.0, %v6706_v51  ;;  %v6306_v38 = vsel %vm3125_vm7, 2147483647, %v6197_v36 }
 0xa5c   :  { %v3039_v31 = vcvt.f32.s32 %v3038_v20  ;;  %5163 = vmatprep.subr.mxu1 %v5540_v6  ;;  %v4569_v48 = vsel %vm3118_vm8, 1.0, %v6706_v51  ;;  %v6311_v23 = vsel %vm3118_vm8, 2147483647, %v6206_v29  ;;  %5143 = vmatmul.mubr.msk.f32.gmra.mxu1 %vm1235_vm6, %v4576_v49  ;;  %v6314_v14 = vcvt.s32.f32 %v3429_v44 }
 0xa5d   :  { %v3027_v55 = vadd.s32 %v3026_v37, %v3024_v45  ;;  %5125 = vmatprep.mubr.msk.f32.mxu0 %vm1235_vm6, %v4569_v48  ;;  %5164 = vmatpush3.msra.mxu1 %v5540_v6  ;;  %v6318_v39 = vcvt.s32.f32 %v3444_v30  ;;  %v6322_v36 = vsel %vm1235_vm6, %v6306_v38, 2147483647  ;;  %v6326_v28 = vsel %vm1235_vm6, %v6311_v23, 2147483647 }
 0xa5e   :  { %v3042_v29 = vadd.s32 %v3041_v13, %v3039_v31  ;;  %3432 = vmin.xlane.f32.xlu1 %v6314_v14  ;;  %v3053_v27 = vpop.xlane.xlu1 %3052  ;;  %5165 = vmatprep.subr.mxu1 %v5548_v8  ;;  %v3459_v26 = vshra.s32 %v6322_v36, 16  ;;  %v3354_v50 = vshra.s32 %v6326_v28, 16  ;;  %v3056_v43 = vshll.u32 %v3055_v32, 16 }
 0xa5f   :  { %vm3119_vm9 = vcmp.eq.s32.totalorder %v6223_v52, %v3027_v55  ;;  %v3054_v34 = vcvt.f32.s32 %v3053_v27  ;;  %3447 = vmin.xlane.f32.xlu0 %v6318_v39  ;;  %5166 = vmatpush3.msra.mxu1 %v5548_v8  ;;  %v3413_v19 = vand.u32 65535, %v6270_v12  ;;  %v3428_v49 = vand.u32 65535, %v6289_v58 }
 0xa60   :  { %v4570_v42 = vsel %vm3119_vm9, 1.0, %v6706_v51  ;;  %v6337_v56 = vsel %vm3119_vm9, 2147483647, %v6223_v52  ;;  %5187 = vmatprep.subr.mxu1 %v5558_v10  ;;  %v3461_v40 = vcvt.s32.f32 %v3459_v26  ;;  %v6340_v21 = vcvt.s32.f32 %v3354_v50 }
 0xa61   :  { %v3057_v60 = vadd.s32 %v3056_v43, %v3054_v34  ;;  %5126 = vmatmul.mubr.msk.f32.vlgmr.msra.gmra.mxu0 %vm1235_vm6, %v4570_v42  ;;  %vm3120_vm10 = vcmp.eq.s32.totalorder %v6231_v59, %v3042_v29  ;;  %v3367_v54 = vsel %vm1235_vm6, %v6337_v56, 2147483647  ;;  %v3415_v45 = vcvt.s32.f32 %v3413_v19 }
 0xa62   :  { %5146 = vmatpush3.msra.mxu0 %v5526_v2  ;;  %3462 = vmin.xlane.f32.xlu1 %v3461_v40  ;;  %v4571_v17 = vsel %vm3120_vm10, 1.0, %v6706_v51  ;;  %v6349_v52 = vsel %vm3120_vm10, 2147483647, %v6231_v59  ;;  %v3369_v33 = vshra.s32 %v3367_v54, 16  ;;  %v3443_v31 = vand.u32 65535, %v6296_v24 }
 0xa63   :  { %3357 = vmin.xlane.f32.xlu0 %v6340_v21  ;;  %5128 = vmatprep.mubr.msk.f32.mxu0 %vm1235_vm6, %v4571_v17  ;;  %vm3121_vm11 = vcmp.eq.s32.totalorder %v6240_v46, %v3057_v60  ;;  %v3382_v35 = vsel %vm1235_vm6, %v6349_v52, 2147483647  ;;  %v3430_v55 = vcvt.s32.f32 %v3428_v49  ;;  %v3458_v29 = vand.u32 65535, %v6322_v36 }
 0xa64   :  { %5147 = vmatprep.subr.mxu0 %v5532_v4  ;;  %v4572_v41 = vsel %vm3121_vm11, 1.0, %v6706_v51  ;;  %v6359_v37 = vsel %vm3121_vm11, 2147483647, %v6240_v46  ;;  %v3371_v47 = vcvt.s32.f32 %v3369_v33  ;;  %v3384_v59 = vshra.s32 %v3382_v35, 16 }
 0xa65   :  { %5148 = vmatpush3.msra.mxu0 %v5532_v4  ;;  %v3397_v44 = vsel %vm1235_vm6, %v6359_v37, 2147483647  ;;  %v3445_v26 = vcvt.s32.f32 %v3443_v31  ;;  %v3353_v12 = vand.u32 65535, %v6326_v28  ;;  %v3460_v58 = vcvt.s32.f32 %v3458_v29 }
 0xa66   :  { %5149 = vmatprep.subr.mxu0 %v5518_v62  ;;  %5129 = vmatmul.mubr.msk.f32.gmra.mxu0 %vm1235_vm6, %v4572_v41  ;;  %v3386_v13 = vcvt.s32.f32 %v3384_v59  ;;  %v3399_v32 = vshra.s32 %v3397_v44, 16  ;;  %v3368_v42 = vand.u32 65535, %v3367_v54 }
 0xa67   :  { %5150 = vmatpush3.msra.mxu0 %v5518_v62  ;;  %3372 = vmin.xlane.f32.xlu1 %v3371_v47  ;;  %v3355_v34 = vcvt.s32.f32 %v3353_v12 }
 0xa68   :  { %5151 = vmatprep.subr.mxu0 %v5522_v0  ;;  %3387 = vmin.xlane.f32.xlu0 %v3386_v13  ;;  %v3401_v46 = vcvt.s32.f32 %v3399_v32  ;;  %v3370_v17 = vcvt.s32.f32 %v3368_v42 }
 0xa69   :  { %5152 = vmatpush3.msra.mxu0 %v5522_v0 }
 0xa6a   :  { %5173 = vmatprep.subr.mxu0 %v5526_v2 }
 0xa6b   :  { %3402 = vmin.xlane.f32.xlu1 %v3401_v46 }
 0xade   :  { %v3418_v30 = vpop.xlane.xlu0 %3417 }
 0xadf   :  { %vm3419_vm13 = vcmp.eq.f32.partialorder %v6273_v25, %v3418_v30 }
 0xae0   :  { %v3420_v20 = vsel %vm3419_vm13, %v3415_v45, inf }
 0xae1   :  { %3421 = vmin.xlane.f32.xlu0 %v3420_v20 }
 0xae7   :  { %v3433_v48 = vpop.xlane.xlu1 %3432 }
 0xae8   :  { %vm3434_vm14 = vcmp.eq.f32.partialorder %v6314_v14, %v3433_v48  ;;  %v3448_v27 = vpop.xlane.xlu0 %3447  ;;  %v3383_v14 = vand.u32 65535, %v3382_v35  ;;  %v3424_v35 = vcvt.f32.s32 %v3418_v30 }
 0xae9   :  { %vm3449_vm15 = vcmp.eq.f32.partialorder %v6318_v39, %v3448_v27  ;;  %v3435_v50 = vsel %vm3434_vm14, %v3430_v55, inf  ;;  %v3398_v39 = vand.u32 65535, %v3397_v44  ;;  %v3454_v31 = vcvt.f32.s32 %v3448_v27 }
 0xaea   :  { %3436 = vmin.xlane.f32.xlu1 %v3435_v50  ;;  %v3450_v25 = vsel %vm3449_vm15, %v3445_v26, inf  ;;  %v3385_v41 = vcvt.s32.f32 %v3383_v14  ;;  %v3425_v45 = vshll.u32 %v3424_v35, 16 }
 0xaeb   :  { %3451 = vmin.xlane.f32.xlu0 %v3450_v25  ;;  %v3463_v43 = vpop.xlane.xlu1 %3462  ;;  %v3400_v54 = vcvt.s32.f32 %v3398_v39 }
 0xaec   :  { %vm3464_vm0 = vcmp.eq.f32.partialorder %v3461_v40, %v3463_v43  ;;  %v3358_v24 = vpop.xlane.xlu0 %3357  ;;  %v3469_v55 = vcvt.f32.s32 %v3463_v43 }
 0xaed   :  { %vm3359_vm1 = vcmp.eq.f32.partialorder %v6340_v21, %v3358_v24  ;;  %v3465_v36 = vsel %vm3464_vm0, %v3460_v58, inf  ;;  %v3364_v12 = vcvt.f32.s32 %v3358_v24  ;;  %v3455_v58 = vshll.u32 %v3454_v31, 16 }
 0xaee   :  { %3466 = vmin.xlane.f32.xlu1 %v3465_v36  ;;  %v3360_v60 = vsel %vm3359_vm1, %v3355_v34, inf  ;;  %v3470_v27 = vshll.u32 %v3469_v55, 16 }
 0xaef   :  { %3361 = vmin.xlane.f32.xlu0 %v3360_v60  ;;  %v3365_v60 = vshll.u32 %v3364_v12, 16 }
 0xaf0   :  { %v3373_v28 = vpop.xlane.xlu1 %3372 }
 0xaf1   :  { %vm3374_vm3 = vcmp.eq.f32.partialorder %v3371_v47, %v3373_v28  ;;  %v3388_v33 = vpop.xlane.xlu0 %3387  ;;  %v3439_v47 = vcvt.f32.s32 %v3433_v48  ;;  %v3379_v42 = vcvt.f32.s32 %v3373_v28 }
 0xaf2   :  { %vm3389_vm4 = vcmp.eq.f32.partialorder %v3386_v13, %v3388_v33  ;;  %v3375_v59 = vsel %vm3374_vm3, %v3370_v17, inf  ;;  %v3394_v17 = vcvt.f32.s32 %v3388_v33 }
 0xaf3   :  { %3376 = vmin.xlane.f32.xlu1 %v3375_v59  ;;  %v3390_v40 = vsel %vm3389_vm4, %v3385_v41, inf  ;;  %v3440_v26 = vshll.u32 %v3439_v47, 16 }
 0xaf4   :  { %3391 = vmin.xlane.f32.xlu0 %v3390_v40  ;;  %v6379_v32 = vpop.xlane.xlu1 %3402 }
 0xaf5   :  { %vm3404_vm5 = vcmp.eq.f32.partialorder %v3401_v46, %v6379_v32 }
 0xaf6   :  { %v3405_v21 = vsel %vm3404_vm5, %v3400_v54, inf }
 0xaf7   :  { %3406 = vmin.xlane.f32.xlu1 %v3405_v21  ;;  %v3380_v21 = vshll.u32 %v3379_v42, 16 }
 0xb6a   :  { %v3422_v19 = vpop.xlane.xlu0 %3421 }
 0xb6b   :  { %v3423_v20 = vcvt.f32.s32 %v3422_v19 }
 0xb6d   :  { %v3426_v44 = vadd.s32 %v3425_v45, %v3423_v20  ;;  %v3395_v45 = vshll.u32 %v3394_v17, 16 }
 0xb6f   :  { %vm3476_vm7 = vcmp.eq.s32.totalorder %v6265_v57, %v3426_v44 }
 0xb70   :  { %v4589_v13 = vsel %vm3476_vm7, 1.0, %v6706_v51  ;;  %v6385_v49 = vsel %vm3476_vm7, 2147483647, %v6265_v57 }
 0xb71   :  { %5167 = vmatprep.mubr.msk.f32.mxu1 %vm1235_vm6, %v4589_v13  ;;  %v6390_v46 = vsel %vm1235_vm6, %v6385_v49, 2147483647 }
 0xb72   :  { %v3768_v30 = vshra.s32 %v6390_v46, 16 }
 0xb73   :  { %v3437_v29 = vpop.xlane.xlu1 %3436 }
 0xb74   :  { %v3438_v50 = vcvt.f32.s32 %v3437_v29  ;;  %v3452_v48 = vpop.xlane.xlu0 %3451  ;;  %v6393_v25 = vcvt.s32.f32 %v3768_v30 }
 0xb75   :  { %v3453_v57 = vcvt.f32.s32 %v3452_v48 }
 0xb76   :  { %v3441_v34 = vadd.s32 %v3440_v26, %v3438_v50  ;;  %3771 = vmin.xlane.f32.xlu0 %v6393_v25 }
 0xb77   :  { %v3456_v36 = vadd.s32 %v3455_v58, %v3453_v57  ;;  %v3467_v14 = vpop.xlane.xlu1 %3466 }
 0xb78   :  { %vm3477_vm8 = vcmp.eq.s32.totalorder %v6280_v22, %v3441_v34  ;;  %v3468_v43 = vcvt.f32.s32 %v3467_v14  ;;  %v3362_v39 = vpop.xlane.xlu0 %3361 }
 0xb79   :  { %v4590_v24 = vsel %vm3477_vm8, 1.0, %v6706_v51  ;;  %v6399_v41 = vsel %vm3477_vm8, 2147483647, %v6280_v22  ;;  %v3363_v59 = vcvt.f32.s32 %v3362_v39  ;;  %vm3478_vm9 = vcmp.eq.s32.totalorder %v6285_v18, %v3456_v36 }
 0xb7a   :  { %v3471_v40 = vadd.s32 %v3470_v27, %v3468_v43  ;;  %5168 = vmatmul.mubr.msk.f32.vlgmr.msra.gmra.mxu1 %vm1235_vm6, %v4590_v24  ;;  %v4591_v28 = vsel %vm3478_vm9, 1.0, %v6706_v51  ;;  %v6405_v54 = vsel %vm3478_vm9, 2147483647, %v6285_v18  ;;  %v6409_v33 = vsel %vm1235_vm6, %v6399_v41, 2147483647 }
 0xb7b   :  { %v3366_v35 = vadd.s32 %v3365_v60, %v3363_v59  ;;  %5188 = vmatpush3.msra.mxu1 %v5558_v10  ;;  %5170 = vmatprep.mubr.msk.f32.mxu1 %vm1235_vm6, %v4591_v28  ;;  %v3783_v22 = vshra.s32 %v6409_v33, 16  ;;  %v6416_v19 = vsel %vm1235_vm6, %v6405_v54, 2147483647  ;;  %v3409_v18 = vcvt.f32.s32 %v6379_v32 }
 0xb7c   :  { %v3377_v20 = vpop.xlane.xlu1 %3376  ;;  %5189 = vmatprep.subr.mxu1 %v5564_v15  ;;  %vm3479_vm10 = vcmp.eq.s32.totalorder %v6306_v38, %v3471_v40  ;;  %v3798_v44 = vshra.s32 %v6416_v19, 16 }
 0xb7d   :  { %v3378_v47 = vcvt.f32.s32 %v3377_v20  ;;  %v3392_v13 = vpop.xlane.xlu0 %3391  ;;  %5190 = vmatpush3.msra.mxu1 %v5564_v15  ;;  %vm3472_vm11 = vcmp.eq.s32.totalorder %v6311_v23, %v3366_v35  ;;  %v4592_v31 = vsel %vm3479_vm10, 1.0, %v6706_v51  ;;  %v6426_v30 = vsel %vm3479_vm10, 2147483647, %v6306_v38 }
 0xb7e   :  { %v3393_v55 = vcvt.f32.s32 %v3392_v13  ;;  %5191 = vmatprep.subr.mxu1 %v5540_v6  ;;  %v4585_v32 = vsel %vm3472_vm11, 1.0, %v6706_v51  ;;  %v6431_v29 = vsel %vm3472_vm11, 2147483647, %v6311_v23  ;;  %5171 = vmatmul.mubr.msk.f32.gmra.mxu1 %vm1235_vm6, %v4592_v31  ;;  %v6434_v26 = vcvt.s32.f32 %v3783_v22 }
 0xb7f   :  { %v3381_v12 = vadd.s32 %v3380_v21, %v3378_v47  ;;  %5153 = vmatprep.mubr.msk.f32.mxu0 %vm1235_vm6, %v4585_v32  ;;  %5192 = vmatpush3.msra.mxu1 %v5540_v6  ;;  %v6438_v50 = vcvt.s32.f32 %v3798_v44  ;;  %v6442_v38 = vsel %vm1235_vm6, %v6426_v30, 2147483647  ;;  %v6446_v48 = vsel %vm1235_vm6, %v6431_v29, 2147483647 }
 0xb80   :  { %v3396_v23 = vadd.s32 %v3395_v45, %v3393_v55  ;;  %3786 = vmin.xlane.f32.xlu1 %v6434_v26  ;;  %v3407_v58 = vpop.xlane.xlu1 %3406  ;;  %5193 = vmatprep.subr.mxu1 %v5548_v8  ;;  %v3813_v57 = vshra.s32 %v6442_v38, 16  ;;  %v3708_v34 = vshra.s32 %v6446_v48, 16  ;;  %v3410_v27 = vshll.u32 %v3409_v18, 16 }
 0xb81   :  { %vm3473_vm13 = vcmp.eq.s32.totalorder %v6337_v56, %v3381_v12  ;;  %v3408_v42 = vcvt.f32.s32 %v3407_v58  ;;  %3801 = vmin.xlane.f32.xlu0 %v6438_v50  ;;  %5194 = vmatpush3.msra.mxu1 %v5548_v8  ;;  %v3767_v20 = vand.u32 65535, %v6390_v46  ;;  %v3782_v31 = vand.u32 65535, %v6409_v33 }
 0xb82   :  { %v4586_v36 = vsel %vm3473_vm13, 1.0, %v6706_v51  ;;  %v6457_v14 = vsel %vm3473_vm13, 2147483647, %v6337_v56  ;;  %v6459_v60 = vcvt.s32.f32 %v3813_v57  ;;  %v6461_v17 = vcvt.s32.f32 %v3708_v34  ;;  %5220 = vmatprep.subr.mxu1 %v6706_v51 }
 0xb83   :  { %v3411_v43 = vadd.s32 %v3410_v27, %v3408_v42  ;;  %5154 = vmatmul.mubr.msk.f32.vlgmr.msra.gmra.mxu0 %vm1235_vm6, %v4586_v36  ;;  %vm3474_vm14 = vcmp.eq.s32.totalorder %v6349_v52, %v3396_v23  ;;  %v3721_v39 = vsel %vm1235_vm6, %v6457_v14, 2147483647  ;;  %v3769_v47 = vcvt.s32.f32 %v3767_v20 }
 0xb84   :  { %5174 = vmatpush3.msra.mxu0 %v5526_v2  ;;  %3816 = vmin.xlane.f32.xlu1 %v6459_v60  ;;  %v4587_v56 = vsel %vm3474_vm14, 1.0, %v6706_v51  ;;  %v6472_v24 = vsel %vm3474_vm14, 2147483647, %v6349_v52  ;;  %v3723_v59 = vshra.s32 %v3721_v39, 16  ;;  %v3797_v55 = vand.u32 65535, %v6416_v19 }
 0xb85   :  { %3711 = vmin.xlane.f32.xlu0 %v6461_v17  ;;  %5156 = vmatprep.mubr.msk.f32.mxu0 %vm1235_vm6, %v4587_v56  ;;  %vm3475_vm15 = vcmp.eq.s32.totalorder %v6359_v37, %v3411_v43  ;;  %v3736_v40 = vsel %vm1235_vm6, %v6472_v24, 2147483647  ;;  %v3784_v12 = vcvt.s32.f32 %v3782_v31  ;;  %v3812_v23 = vand.u32 65535, %v6442_v38 }
 0xb86   :  { %5175 = vmatprep.subr.mxu0 %v5532_v4  ;;  %v4588_v28 = vsel %vm3475_vm15, 1.0, %v6706_v51  ;;  %v6482_v21 = vsel %vm3475_vm15, 2147483647, %v6359_v37  ;;  %v3725_v35 = vcvt.s32.f32 %v3723_v59  ;;  %v3738_v52 = vshra.s32 %v3736_v40, 16 }
 0xb87   :  { %5176 = vmatpush3.msra.mxu0 %v5532_v4  ;;  %v3751_v22 = vsel %vm1235_vm6, %v6482_v21, 2147483647  ;;  %v3799_v57 = vcvt.s32.f32 %v3797_v55  ;;  %v3707_v46 = vand.u32 65535, %v6446_v48  ;;  %v3814_v33 = vcvt.s32.f32 %v3812_v23 }
 0xb88   :  { %5177 = vmatprep.subr.mxu0 %v5518_v62  ;;  %5157 = vmatmul.mubr.msk.f32.gmra.mxu0 %vm1235_vm6, %v4588_v28  ;;  %v3740_v45 = vcvt.s32.f32 %v3738_v52  ;;  %v3753_v18 = vshra.s32 %v3751_v22, 16  ;;  %v3722_v36 = vand.u32 65535, %v3721_v39  ;;  %v3737_v38 = vand.u32 65535, %v3736_v40 }
 0xb89   :  { %5178 = vmatpush3.msra.mxu0 %v5518_v62  ;;  %3726 = vmin.xlane.f32.xlu1 %v3725_v35  ;;  %v3709_v42 = vcvt.s32.f32 %v3707_v46  ;;  %v3752_v56 = vand.u32 65535, %v3751_v22 }
 0xb8a   :  { %5179 = vmatprep.subr.mxu0 %v5522_v0  ;;  %3741 = vmin.xlane.f32.xlu0 %v3740_v45  ;;  %v3755_v37 = vcvt.s32.f32 %v3753_v18  ;;  %v3739_v28 = vcvt.s32.f32 %v3737_v38 }
 0xb8b   :  { %5180 = vmatpush3.msra.mxu0 %v5522_v0  ;;  %v3754_v39 = vcvt.s32.f32 %v3752_v56 }
 0xb8c   :  { %5201 = vmatprep.subr.mxu0 %v6706_v51 }
 0xb8d   :  { %3756 = vmin.xlane.f32.xlu1 %v3755_v37 }
 0xbff   :  { %v3772_v44 = vpop.xlane.xlu0 %3771 }
 0xc00   :  { %vm3773_vm0 = vcmp.eq.f32.partialorder %v6393_v25, %v3772_v44  ;;  %v3778_v40 = vcvt.f32.s32 %v3772_v44 }
 0xc01   :  { %v3774_v13 = vsel %vm3773_vm0, %v3769_v47, inf }
 0xc02   :  { %3775 = vmin.xlane.f32.xlu0 %v3774_v13  ;;  %v3779_v47 = vshll.u32 %v3778_v40, 16 }
 0xc09   :  { %v3787_v32 = vpop.xlane.xlu1 %3786 }
 0xc0a   :  { %vm3788_vm1 = vcmp.eq.f32.partialorder %v6434_v26, %v3787_v32  ;;  %v3802_v58 = vpop.xlane.xlu0 %3801  ;;  %v3793_v22 = vcvt.f32.s32 %v3787_v32 }
 0xc0b   :  { %vm3803_vm3 = vcmp.eq.f32.partialorder %v6438_v50, %v3802_v58  ;;  %v3789_v34 = vsel %vm3788_vm1, %v3784_v12, inf  ;;  %v3724_v50 = vcvt.s32.f32 %v3722_v36 }
 0xc0c   :  { %3790 = vmin.xlane.f32.xlu1 %v3789_v34  ;;  %v3804_v25 = vsel %vm3803_vm3, %v3799_v57, inf  ;;  %v3794_v12 = vshll.u32 %v3793_v22, 16 }
 0xc0d   :  { %3805 = vmin.xlane.f32.xlu0 %v3804_v25  ;;  %v3817_v27 = vpop.xlane.xlu1 %3816 }
 0xc0e   :  { %vm3818_vm4 = vcmp.eq.f32.partialorder %v6459_v60, %v3817_v27  ;;  %v3712_v19 = vpop.xlane.xlu0 %3711  ;;  %v3823_v23 = vcvt.f32.s32 %v3817_v27 }
 0xc0f   :  { %vm3713_vm5 = vcmp.eq.f32.partialorder %v6461_v17, %v3712_v19  ;;  %v3819_v26 = vsel %vm3818_vm4, %v3814_v33, inf  ;;  %v3718_v34 = vcvt.f32.s32 %v3712_v19 }
 0xc10   :  { %3820 = vmin.xlane.f32.xlu1 %v3819_v26  ;;  %v3714_v43 = vsel %vm3713_vm5, %v3709_v42, inf  ;;  %v3824_v36 = vshll.u32 %v3823_v23, 16 }
 0xc11   :  { %3715 = vmin.xlane.f32.xlu0 %v3714_v43  ;;  %v3719_v38 = vshll.u32 %v3718_v34, 16 }
 0xc12   :  { %v3727_v48 = vpop.xlane.xlu1 %3726 }
 0xc13   :  { %vm3728_vm7 = vcmp.eq.f32.partialorder %v3725_v35, %v3727_v48  ;;  %v3742_v59 = vpop.xlane.xlu0 %3741  ;;  %v3733_v26 = vcvt.f32.s32 %v3727_v48 }
 0xc14   :  { %vm3743_vm8 = vcmp.eq.f32.partialorder %v3740_v45, %v3742_v59  ;;  %v3729_v52 = vsel %vm3728_vm7, %v3724_v50, inf  ;;  %v3808_v45 = vcvt.f32.s32 %v3802_v58  ;;  %v3748_v27 = vcvt.f32.s32 %v3742_v59 }
 0xc15   :  { %3730 = vmin.xlane.f32.xlu1 %v3729_v52  ;;  %v3744_v60 = vsel %vm3743_vm8, %v3739_v28, inf  ;;  %v3734_v48 = vshll.u32 %v3733_v26, 16 }
 0xc16   :  { %3745 = vmin.xlane.f32.xlu0 %v3744_v60  ;;  %v3757_v18 = vpop.xlane.xlu1 %3756  ;;  %v3809_v46 = vshll.u32 %v3808_v45, 16  ;;  %v3749_v59 = vshll.u32 %v3748_v27, 16 }
 0xc17   :  { %vm3758_vm9 = vcmp.eq.f32.partialorder %v3755_v37, %v3757_v18 }
 0xc18   :  { %v3759_v17 = vsel %vm3758_vm9, %v3754_v39, inf }
 0xc19   :  { %3760 = vmin.xlane.f32.xlu1 %v3759_v17 }
 0xc8b   :  { %v3776_v20 = vpop.xlane.xlu0 %3775 }
 0xc8c   :  { %v3777_v13 = vcvt.f32.s32 %v3776_v20 }
 0xc8e   :  { %v3780_v31 = vadd.s32 %v3779_v47, %v3777_v13 }
 0xc90   :  { %vm3830_vm10 = vcmp.eq.s32.totalorder %v6385_v49, %v3780_v31 }
 0xc91   :  { %v4605_v35 = vsel %vm3830_vm10, 1.0, %v6706_v51 }
 0xc92   :  { %5195 = vmatprep.mubr.msk.f32.mxu1 %vm1235_vm6, %v4605_v35 }
 0xc95   :  { %v3791_v55 = vpop.xlane.xlu1 %3790 }
 0xc96   :  { %v3792_v57 = vcvt.f32.s32 %v3791_v55  ;;  %v3806_v37 = vpop.xlane.xlu0 %3805 }
 0xc97   :  { %v3807_v44 = vcvt.f32.s32 %v3806_v37  ;;  %v22_v37 = vld [vmem:[%s6704_s1 + $0x50] sm:$0xff] }
 0xc98   :  { %v3795_v25 = vadd.s32 %v3794_v12, %v3792_v57 }
 0xc99   :  { %v3810_v33 = vadd.s32 %v3809_v46, %v3807_v44  ;;  %v3821_v42 = vpop.xlane.xlu1 %3820  ;;  %v21_v46 = vld [vmem:[%s6704_s1 + $0x48] sm:$0xff] }
 0xc9a   :  { %vm3831_vm11 = vcmp.eq.s32.totalorder %v6399_v41, %v3795_v25  ;;  %v3822_v49 = vcvt.f32.s32 %v3821_v42  ;;  %v3716_v32 = vpop.xlane.xlu0 %3715  ;;  %v3763_v41 = vcvt.f32.s32 %v3757_v18  ;;  %v6551_v25 = vpop.f32.mrf.mxu0 }
 0xc9b   :  { %v4606_v58 = vsel %vm3831_vm11, 1.0, %v6706_v51  ;;  %v3717_v43 = vcvt.f32.s32 %v3716_v32  ;;  %vm3832_vm13 = vcmp.eq.s32.totalorder %v6405_v54, %v3810_v33 }
 0xc9c   :  { %v3825_v50 = vadd.s32 %v3824_v36, %v3822_v49  ;;  %5196 = vmatmul.mubr.msk.f32.vlgmr.msra.gmra.mxu1 %vm1235_vm6, %v4606_v58  ;;  %v4607_v19 = vsel %vm3832_vm13, 1.0, %v6706_v51  ;;  %v3764_v20 = vshll.u32 %v3763_v41, 16  ;;  %v6553_v42 = vpop.f32.mrf.mxu0 }
 0xc9d   :  { %v3720_v56 = vadd.s32 %v3719_v38, %v3717_v43  ;;  %5198 = vmatprep.mubr.msk.f32.mxu1 %vm1235_vm6, %v4607_v19  ;;  %5221 = vmatpush3.msra.mxu1 %v22_v37 }
 0xc9e   :  { %v3731_v28 = vpop.xlane.xlu1 %3730  ;;  %vm3833_vm14 = vcmp.eq.s32.totalorder %v6426_v30, %v3825_v50  ;;  %5222 = vmatprep.subr.mxu1 %v6706_v51  ;;  %v6555_v26 = vpop.f32.mrf.mxu0 }
 0xc9f   :  { %v3732_v52 = vcvt.f32.s32 %v3731_v28  ;;  %v3746_v60 = vpop.xlane.xlu0 %3745  ;;  %vm3826_vm15 = vcmp.eq.s32.totalorder %v6431_v29, %v3720_v56  ;;  %v4608_v54 = vsel %vm3833_vm14, 1.0, %v6706_v51  ;;  %5223 = vmatpush3.msra.mxu1 %v21_v46 }
 0xca0   :  { %v3747_v39 = vcvt.f32.s32 %v3746_v60  ;;  %v4601_v17 = vsel %vm3826_vm15, 1.0, %v6706_v51  ;;  %5199 = vmatmul.mubr.msk.f32.gmra.mxu1 %vm1235_vm6, %v4608_v54  ;;  %5227 = vmatprep.subr.mxu1 %v6706_v51  ;;  %v6557_v32 = vpop.f32.mrf.mxu0 }
 0xca1   :  { %v3735_v40 = vadd.s32 %v3734_v48, %v3732_v52  ;;  %5181 = vmatprep.mubr.msk.f32.mxu0 %vm1235_vm6, %v4601_v17  ;;  %5224 = vmatprep.mubr.msk.f32.mxu1 %vm5331_vm12, %v6706_v51 }
 0xca2   :  { %v3750_v30 = vadd.s32 %v3749_v59, %v3747_v39  ;;  %v3761_v18 = vpop.xlane.xlu1 %3760  ;;  %v6559_v58 = vpop.f32.mrf.mxu0 }
 0xca3   :  { %vm3827_vm0 = vcmp.eq.s32.totalorder %v6457_v14, %v3735_v40  ;;  %v3762_v29 = vcvt.f32.s32 %v3761_v18  ;;  %v6531_v14 = vpop.f32.mrf.mxu1 }
 0xca4   :  { %v4602_v47 = vsel %vm3827_vm0, 1.0, %v6706_v51  ;;  %vm3828_vm1 = vcmp.eq.s32.totalorder %v6472_v24, %v3750_v30  ;;  %v6561_v27 = vpop.f32.mrf.mxu0  ;;  %vm4136_vm0 = vcmask 523264  }
 0xca5   :  { %v3765_v13 = vadd.s32 %v3764_v20, %v3762_v29  ;;  %5182 = vmatmul.mubr.msk.f32.vlgmr.msra.gmra.mxu0 %vm1235_vm6, %v4602_v47  ;;  %v4603_v31 = vsel %vm3828_vm1, 1.0, %v6706_v51  ;;  %v6533_v22 = vpop.f32.mrf.mxu1  ;;  %vm4380_vm1 = vcmask 8192  }
 0xca6   :  { %5184 = vmatprep.mubr.msk.f32.mxu0 %vm1235_vm6, %v4603_v31  ;;  %v6563_v19 = vpop.f32.mrf.mxu0 }
 0xca7   :  { %vm3829_vm3 = vcmp.eq.s32.totalorder %v6482_v21, %v3765_v13  ;;  %v6535_v24 = vpop.f32.mrf.mxu1 }
 0xca8   :  { %v4604_v35 = vsel %vm3829_vm3, 1.0, %v6706_v51  ;;  %v6565_v48 = vpop.f32.mrf.mxu0 }
 0xca9   :  { %5185 = vmatmul.mubr.msk.f32.gmra.mxu0 %vm1235_vm6, %v4604_v35  ;;  %v6537_v45 = vpop.f32.mrf.mxu1 }
 0xcaa   :  { %5217 = vmatprep.mubr.msk.f32.mxu0 %vm5331_vm12, %v6706_v51  ;;  %v6567_v41 = vpop.f32.mrf.mxu0 }
 0xcab   :  { %v5001_v55 = vpop.f32.mrf.mxu1 }
 0xcac   :  { %v6569_v60 = vpop.f32.mrf.mxu0 }
 0xcad   :  { %v1555_v12 = vpop.f32.mrf.mxu1 }
 0xcae   :  { %v6571_v59 = vpop.f32.mrf.mxu0 }
 0xcaf   :  { %v6539_v23 = vpop.f32.mrf.mxu1  ;;  %6719 = vst [vmem:[#allocation11_spill] sm:$0xff] %v6571_v59 }
 0xcb0   :  { %v6573_v17 = vpop.f32.mrf.mxu0 }
 0xcb1   :  { %v6541_v21 = vpop.f32.mrf.mxu1  ;;  %6720 = vst [vmem:[#allocation12_spill] sm:$0xff] %v6573_v17 }
 0xcb2   :  { %v6575_v30 = vpop.f32.mrf.mxu0 }
 0xcb3   :  { %v5029_v57 = vpop.f32.mrf.mxu1 }
 0xcb4   :  { %v6577_v20 = vpop.f32.mrf.mxu0  ;;  %v1925_v16 = vmax.f32 %v5001_v55, %v5029_v57  ;;  %v4057_v57 = vsub.f32 %v5538_v5, %v5540_v6 }
 0xcb5   :  { %v1901_v34 = vpop.f32.mrf.mxu1  ;;  %6721 = vst [vmem:[#allocation13_spill] sm:$0xff] %v6577_v20 }
 0xcb6   :  { %v6579_v47 = vpop.f32.mrf.mxu0  ;;  %v1924_v1 = vmax.f32 %v1555_v12, %v1901_v34  ;;  %v4059_v34 = vsub.f32 %v5554_v9, %v5558_v10 }
 0xcb7   :  { %v5032_v44 = vpop.f32.mrf.mxu1  ;;  %6722 = vst [vmem:[#allocation14_spill] sm:$0xff] %v6579_v47  ;;  %v4053_v47 = vsub.f32 %v5516_v61, %v5518_v62  ;;  %v4052_v61 = vsub.f32 %v5520_v63, %v5522_v0 }
 0xcb8   :  { %v6581_v31 = vpop.f32.mrf.mxu0  ;;  %v1927_v17 = vmax.f32 %v6539_v23, %v5032_v44 }
 0xcb9   :  { %v1911_v33 = vpop.f32.mrf.mxu1  ;;  %6723 = vst [vmem:[#allocation15_spill] sm:$0xff] %v6581_v31 }
 0xcba   :  { %v6583_v37 = vpop.f32.mrf.mxu0  ;;  %v1926_v62 = vmax.f32 %v6541_v21, %v1911_v33 }
 0xcbb   :  { %v5057_v36 = vpop.f32.mrf.mxu1 }
 0xcbc   :  { %v6587_v51 = vpop.f32.mrf.mxu0  ;;  %v2279_v2 = vmax.f32 %v1925_v16, %v5057_v36  ;;  %v4056_v16 = vsub.f32 %v5546_v7, %v5548_v8  ;;  %v1921_v7 = vmax.f32 %v6531_v14, %v6551_v25  ;;  %v4058_v25 = vsub.f32 %v5562_v11, %v5564_v15 }
 0xcbd   :  { %v2255_v49 = vpop.f32.mrf.mxu1  ;;  %6724 = vst [vmem:[#allocation16_spill] sm:$0xff] %v6587_v51  ;;  %v6599_v51 = vld [vmem:[%s6704_s1 + $0x5a] ss:$0 sm:$0xff] }
 0xcbe   :  { %v6589_v3 = vpop.f32.mrf.mxu0  ;;  %v2278_v31 = vmax.f32 %v1924_v1, %v2255_v49  ;;  %v6611_v44 = vadd.f32 %v6599_v51, %v4053_v47  ;;  %v4069_v0 = vadd.f32 %v6599_v51, %v4057_v57  ;;  %v4068_v8 = vadd.f32 %v6599_v51, %v4056_v16  ;;  %v6727_v16 = vld [vmem:[#allocation12_spill] sm:$0xff] }
 0xcbf   :  { %v5060_v38 = vpop.f32.mrf.mxu1  ;;  %v6618_v21 = vadd.f32 %v6599_v51, %v4052_v61  ;;  %v4071_v14 = vadd.f32 %v6599_v51, %v4059_v34 }
 0xcc0   :  { %v6594_v59 = vpop.f32.mrf.mxu0  ;;  %v2281_v1 = vmax.f32 %v1927_v17, %v5060_v38 }
 0xcc1   :  { %v2265_v43 = vpop.f32.mrf.mxu1 }
 0xcc2   :  { %v5155_v23 = vpop.f32.mrf.mxu0  ;;  %v2280_v36 = vmax.f32 %v1926_v62, %v2265_v43  ;;  %v1920_v43 = vmax.f32 %v6533_v22, %v6553_v42 }
 0xcc3   :  { %v5085_v50 = vpop.f32.mrf.mxu1 }
 0xcc4   :  { %v2633_v20 = vmax.f32 %v2279_v2, %v5085_v50  ;;  %v3574_v50 = vpop.f32.mrf.mxu0  ;;  %v2274_v22 = vmax.f32 %v1920_v43, %v6561_v27  ;;  %v6729_v34 = vld [vmem:[#allocation16_spill] sm:$0xff] }
 0xcc5   :  { %v2609_v56 = vpop.f32.mrf.mxu1 }
 0xcc6   :  { %v2632_v2 = vmax.f32 %v2278_v31, %v2609_v56  ;;  %v2275_v56 = vmax.f32 %v1921_v7, %v6559_v58  ;;  %v5158_v47 = vpop.f32.mrf.mxu0  ;;  %v6725_v31 = vld [vmem:[#allocation11_spill] sm:$0xff] }
 0xcc7   :  { %v5088_v28 = vpop.f32.mrf.mxu1 }
 0xcc8   :  { %v2635_v5 = vmax.f32 %v2281_v1, %v5088_v28  ;;  %v2629_v42 = vmax.f32 %v2275_v56, %v6567_v41  ;;  %v3584_v61 = vpop.f32.mrf.mxu0 }
 0xcc9   :  { %v2619_v52 = vpop.f32.mrf.mxu1 }
 0xcca   :  { %v2634_v33 = vmax.f32 %v2280_v36, %v2619_v52  ;;  %v1923_v52 = vmax.f32 %v6535_v24, %v6555_v26  ;;  %v2628_v24 = vmax.f32 %v2274_v22, %v6569_v60 }
 0xccb   :  { %v5113_v54 = vpop.f32.mrf.mxu1 }
 0xccc   :  { %v2987_v12 = vmax.f32 %v2633_v20, %v5113_v54 }
 0xccd   :  { %v2963_v39 = vpop.f32.mrf.mxu1 }
 0xcce   :  { %v2986_v6 = vmax.f32 %v2632_v2, %v2963_v39  ;;  %v6728_v2 = vld [vmem:[#allocation14_spill] sm:$0xff] }
 0xccf   :  { %v5116_v40 = vpop.f32.mrf.mxu1 }
 0xcd0   :  { %v2989_v9 = vmax.f32 %v2635_v5, %v5116_v40 }
 0xcd1   :  { %v2973_v18 = vpop.f32.mrf.mxu1 }
 0xcd2   :  { %v2988_v54 = vmax.f32 %v2634_v33, %v2973_v18  ;;  %v6732_v33 = vld [vmem:[#allocation5_spill] sm:$0xff] }
 0xcd3   :  { %v5141_v29 = vpop.f32.mrf.mxu1 }
 0xcd4   :  { %v3341_v49 = vmax.f32 %v2987_v12, %v5141_v29 }
 0xcd5   :  { %v3317_v13 = vpop.f32.mrf.mxu1 }
 0xcd6   :  { %v3340_v10 = vmax.f32 %v2986_v6, %v3317_v13 }
 0xcd7   :  { %v5144_v35 = vpop.f32.mrf.mxu1 }
 0xcd8   :  { %v3343_v39 = vmax.f32 %v2989_v9, %v5144_v35 }
 0xcd9   :  { %v6585_v46 = vpop.f32.mrf.mxu1 }
 0xcda   :  { %v3342_v40 = vmax.f32 %v2988_v54, %v6585_v46  ;;  %v6726_v46 = vld [vmem:[#allocation13_spill] sm:$0xff] }
 0xcdb   :  { %v5169_v53 = vpop.f32.mrf.mxu1 }
 0xcdc   :  { %v3695_v38 = vmax.f32 %v3341_v49, %v5169_v53  ;;  %v1922_v53 = vmax.f32 %v6537_v45, %v6557_v32  ;;  %v2983_v45 = vmax.f32 %v2629_v42, %v6575_v30  ;;  %v6730_v49 = vld [vmem:[#allocation15_spill] sm:$0xff] }
 0xcdd   :  { %v3671_v4 = vpop.f32.mrf.mxu1 }
 0xcde   :  { %v3694_v17 = vmax.f32 %v3340_v10, %v3671_v4  ;;  %v2277_v4 = vmax.f32 %v1923_v52, %v6563_v19  ;;  %v2276_v18 = vmax.f32 %v1922_v53, %v6565_v48  ;;  %v3337_v57 = vmax.f32 %v2983_v45, %v6583_v37 }
 0xcdf   :  { %v5172_v55 = vpop.f32.mrf.mxu1  ;;  %v4070_v48 = vadd.f32 %v6599_v51, %v4058_v25 }
 0xce0   :  { %v3697_v29 = vmax.f32 %v3343_v39, %v5172_v55  ;;  %v2631_v35 = vmax.f32 %v2277_v4, %v6725_v31  ;;  %v2982_v55 = vmax.f32 %v2628_v24, %v6726_v46  ;;  %v2630_v60 = vmax.f32 %v2276_v18, %v6727_v16  ;;  %v6734_v39 = vld [vmem:[#allocation7_spill] sm:$0xff] }
 0xce1   :  { %v3681_v63 = vpop.f32.mrf.mxu1  ;;  %v3691_v5 = vmax.f32 %v3337_v57, %v5155_v23  ;;  %v6733_v23 = vld [vmem:[#allocation8_spill] sm:$0xff]  ;;  %v6735_v57 = vld [vmem:[#allocation9_spill] sm:$0xff] }
 0xce2   :  { %v3696_v32 = vmax.f32 %v3342_v40, %v3681_v63  ;;  %v2985_v12 = vmax.f32 %v2631_v35, %v6728_v2  ;;  %v3336_v36 = vmax.f32 %v2982_v55, %v6729_v34  ;;  %v2984_v7 = vmax.f32 %v2630_v60, %v6730_v49  ;;  %v6737_v49 = vld [vmem:[#allocation10_spill] sm:$0xff] }
 0xce3   :  { %v6736_v60 = vmov 0.0  }
 0xce4   :  { %v3339_v10 = vmax.f32 %v2985_v12, %v6589_v3 }
 0xd5c   :  { %v5197_v28 = vpop.f32.mrf.mxu1 }
 0xd5d   :  { %v4049_v20 = vmax.f32 %v3695_v38, %v5197_v28  ;;  %v3690_v38 = vmax.f32 %v3336_v36, %v3574_v50  ;;  %v3338_v28 = vmax.f32 %v2984_v7, %v6594_v59 }
 0xd5e   :  { %v4025_v58 = vpop.f32.mrf.mxu1 }
 0xd5f   :  { %v6633_v11 = vadd.f32 %v4069_v0, %v4049_v20  ;;  %v4048_v15 = vmax.f32 %v3694_v17, %v4025_v58  ;;  %v4054_v17 = vsub.f32 %v6734_v39, %v6733_v23  ;;  %v3693_v20 = vmax.f32 %v3339_v10, %v5158_v47 }
 0xd60   :  { %v5200_v26 = vpop.f32.mrf.mxu1  ;;  %v3692_v22 = vmax.f32 %v3338_v28, %v3584_v61 }
 0xd61   :  { %v4093_v27 = vmin.f32 %v6633_v11, 0.0  ;;  %v6640_v41 = vadd.f32 %v4068_v8, %v4048_v15  ;;  %v4051_v13 = vmax.f32 %v3697_v29, %v5200_v26  ;;  %v6731_v8 = vld [vmem:[#allocation6_spill] sm:$0xff]  ;;  %v4066_v4 = vadd.f32 %v6599_v51, %v4054_v17 }
 0xd62   :  { %v4035_v19 = vpop.f32.mrf.mxu1  ;;  %v4055_v9 = vsub.f32 %v6732_v33, %v6731_v8  ;;  %vm4085_vm5 = vcmp.gt.f32.partialorder %v6633_v11, 0.0 }
 0xd63   :  { %v4092_v30 = vmin.f32 %v6640_v41, 0.0  ;;  %v4079_v62 = vadd.f32 %v4071_v14, %v4051_v13  ;;  %v4050_v1 = vmax.f32 %v3696_v32, %v4035_v19  ;;  %v4106_v6 = vmul.f32 1.442695, %v4093_v27 }
 0xd64   :  { %v4067_v42 = vadd.f32 %v6599_v51, %v4055_v9  ;;  %v4130_v19 = vmul.u32 32, %v6735_v57  ;;  %vm4084_vm7 = vcmp.gt.f32.partialorder %v6640_v41, 0.0 }
 0xd65   :  { %v4095_v63 = vmin.f32 %v4079_v62, 0.0  ;;  %v4078_v37 = vadd.f32 %v4070_v48, %v4050_v1  ;;  %v5183_v0 = vpop.f32.mrf.mxu0  ;;  %v4104_v43 = vmul.f32 1.442695, %v4092_v30  ;;  %5286 = vpow2.f32 %v4106_v6 }
 0xd66   :  { %v4045_v56 = vmax.f32 %v3691_v5, %v5183_v0  ;;  %vm4087_vm6 = vcmp.gt.f32.partialorder %v4079_v62, 0.0  ;;  %v4132_v1 = vadd.s32 32, %v4130_v19  ;;  %vm4131_vm8 = vcmp.ge.s32.totalorder %v6737_v49, %v4130_v19 }
 0xd67   :  { %v4110_v14 = vmul.f32 1.442695, %v4095_v63  ;;  %v4094_v25 = vmin.f32 %v4078_v37, 0.0  ;;  %v3928_v54 = vpop.f32.mrf.mxu0  ;;  %vm4086_vm4 = vcmp.gt.f32.partialorder %v4078_v37, 0.0 }
 0xd68   :  { %v6658_v52 = vadd.f32 %v6611_v44, %v4045_v56  ;;  %v4044_v53 = vmax.f32 %v3690_v38, %v3928_v54  ;;  %vm4133_vm10 = vcmp.lt.s32.totalorder %v6737_v49, %v4132_v1  ;;  %v28_v38 = vld [vmem:[%s6704_s1 + $0x5d] sm:$0x1]  ;;  %v4627_v56 = vld [vmem:[%s6704_s1 + $0x5b] ss:$0 sm:$0xff] }
 0xd69   :  { %5288 = vpow2.f32 %v4110_v14  ;;  %v4108_v3 = vmul.f32 1.442695, %v4094_v25  ;;  %v5186_v50 = vpop.f32.mrf.mxu0  ;;  %vm4134_vm13 = vmand %vm4131_vm8, %vm4133_vm10 }
 0xd6a   :  { %5290 = vpow2.f32 %v4104_v43  ;;  %v4089_v59 = vmin.f32 %v6658_v52, 0.0  ;;  %v6663_v58 = vadd.f32 %v6618_v21, %v4044_v53  ;;  %v4047_v40 = vmax.f32 %v3693_v20, %v5186_v50 }
 0xd6b   :  { %5292 = vpow2.f32 %v4108_v3  ;;  %v3938_v29 = vpop.f32.mrf.mxu0  ;;  %vm4081_vm14 = vcmp.gt.f32.partialorder %v6658_v52, 0.0  ;;  %v4135_v8 = vsel %vm4134_vm13, 0.03125, %v6736_v60  ;;  %v5333_v43 = vmov 0  }
 0xd6c   :  { %v4088_v47 = vmin.f32 %v6663_v58, 0.0  ;;  %v4075_v44 = vadd.f32 %v4067_v42, %v4047_v40  ;;  %v4046_v15 = vmax.f32 %v3692_v22, %v3938_v29  ;;  %v4098_v18 = vmul.f32 1.442695, %v4089_v59  ;;  %5237 = vset.pattern.permute.xlu0 %v5333_v43 }
 0xd6d   :  { %vm4080_vm15 = vcmp.gt.f32.partialorder %v6663_v58, 0.0  ;;  %4295 = vperm.xlu0 %5237, %v28_v38  }
 0xd6e   :  { %v4091_v24 = vmin.f32 %v4075_v44, 0.0  ;;  %v4074_v45 = vadd.f32 %v4066_v4, %v4046_v15  ;;  %v4096_v26 = vmul.f32 1.442695, %v4088_v47  ;;  %5294 = vpow2.f32 %v4098_v18 }
 0xd6f   :  { %vm4083_vm9 = vcmp.gt.f32.partialorder %v4075_v44, 0.0 }
 0xd70   :  { %v4102_v32 = vmul.f32 1.442695, %v4091_v24  ;;  %v4090_v27 = vmin.f32 %v4074_v45, 0.0  ;;  %vm4082_vm11 = vcmp.gt.f32.partialorder %v4074_v45, 0.0 }
 0xd72   :  { %5296 = vpow2.f32 %v4102_v32  ;;  %v4100_v13 = vmul.f32 1.442695, %v4090_v27  ;;  %v5287_v21 = vpop.eup %5286 }
 0xd73   :  { %5298 = vpow2.f32 %v4096_v26  ;;  %v4623_v16 = vadd.f32 -1.0, %v5287_v21 }
 0xd74   :  { %5300 = vpow2.f32 %v4100_v13 }
 0xd75   :  { %v4125_v2 = vsel %vm4085_vm5, %v6633_v11, %v4623_v16 }
 0xd76   :  { %v5289_v31 = vpop.eup %5288 }
 0xd77   :  { %v5291_v35 = vpop.eup %5290  ;;  %v4625_v46 = vadd.f32 -1.0, %v5289_v31 }
 0xd78   :  { %v5293_v55 = vpop.eup %5292  ;;  %v4622_v30 = vadd.f32 -1.0, %v5291_v35 }
 0xd79   :  { %v4127_v51 = vsel %vm4087_vm6, %v4079_v62, %v4625_v46  ;;  %v4624_v48 = vadd.f32 -1.0, %v5293_v55 }
 0xd7a   :  { %5202 = vmatpush3.msra.mxu0 %v4127_v51  ;;  %v4124_v34 = vsel %vm4084_vm7, %v6640_v41, %v4622_v30 }
 0xd7b   :  { %5203 = vmatprep.subr.mxu0 %v6736_v60  ;;  %v4126_v61 = vsel %vm4086_vm4, %v4078_v37, %v4624_v48  ;;  %v5295_v12 = vpop.eup %5294 }
 0xd7c   :  { %5204 = vmatpush3.msra.mxu0 %v4126_v61  ;;  %v4619_v63 = vadd.f32 -1.0, %v5295_v12 }
 0xd7d   :  { %5205 = vmatprep.subr.mxu0 %v6736_v60 }
 0xd7e   :  { %5206 = vmatpush3.msra.mxu0 %v4125_v2  ;;  %v4121_v0 = vsel %vm4081_vm14, %v6658_v52, %v4619_v63  ;;  %v27_v52 = vld [vmem:[%s6704_s1 + $0x5c] sm:$0x1]  ;;  %s5312_s1 = scalar_lea.vmem %s4389_s0, 32 }
 0xd7f   :  { %v5297_v62 = vpop.eup %5296  ;;  %5207 = vmatprep.subr.mxu0 %v6736_v60  ;;  %p5314_p2 = scmp.lt.s32.totalorder %s5312_s1, %s5308_s3 }
 0xd80   :  { %v5299_v36 = vpop.eup %5298  ;;  %5208 = vmatpush3.msra.mxu0 %v4124_v34  ;;  %v4621_v5 = vadd.f32 -1.0, %v5297_v62 }
 0xd81   :  { %v5301_v6 = vpop.eup %5300  ;;  %5209 = vmatprep.subr.mxu0 %v6736_v60  ;;  %v4618_v41 = vadd.f32 -1.0, %v5299_v36  ;;  %p5315_p3 = por %p5314_p2, %p5313_p1 }
 0xd82   :  { %v4123_v11 = vsel %vm4083_vm9, %v4075_v44, %v4621_v5  ;;  %v4620_v7 = vadd.f32 -1.0, %v5301_v6 }
 0xd83   :  { %5210 = vmatpush3.msra.mxu0 %v4123_v11  ;;  %v4120_v33 = vsel %vm4080_vm15, %v6663_v58, %v4618_v41  ;;  %p5316_p4 = pnand %p5315_p3, %p5309_p0 }
 0xd84   :  { %5211 = vmatprep.subr.mxu0 %v6736_v60  ;;  %v4122_v37 = vsel %vm4082_vm11, %v4074_v45, %v4620_v7 }
 0xd85   :  { %5212 = vmatpush3.msra.mxu0 %v4122_v37 }
 0xd86   :  { %5213 = vmatprep.subr.mxu0 %v6736_v60 }
 0xd87   :  { %5214 = vmatpush3.msra.mxu0 %v4121_v0 }
 0xd88   :  { %5215 = vmatprep.subr.mxu0 %v6736_v60 }
 0xd89   :  { %5216 = vmatpush3.msra.mxu0 %v4120_v33 }
 0xd8a   :  { %5218 = vmatmul.mubr.msk.f32.vlgmr.msra.gmra.mxu0 %vm4136_vm0, %v4135_v8 }
 0xde8   :  { %v4296_v53 = vpop.permute.xlu0 %4295 }
 0xe4a   :  { %v4206_v9 = vpop.f32.mrf.mxu0 }
 0xe4b   :  { %5225 = vmatmul.mubr.msk.f32.vlgmr.msra.gmra.mxu1 %vm223_vm2, %v4206_v9 }
 0xe4c   :  { %v5219_v10 = vpop.f32.mrf.mxu0  ;;  %5229 = vmatprep.mubr.msk.f32.mxu1 %vm5331_vm12, %v6736_v60 }
 0xf0b   :  { %v4283_v28 = vpop.f32.mrf.mxu1 }
 0xf0c   :  { %v4284_v14 = vadd.f32 %v4627_v56, %v4283_v28 }
 0xf0d   :  { %v5226_v25 = vpop.f32.mrf.mxu1 }
 0xf0e   :  { %v4288_v54 = vmin.f32 %v4284_v14, 0.0  ;;  %vm4287_vm12 = vcmp.gt.f32.partialorder %v4284_v14, 0.0 }
 0xf10   :  { %v4289_v23 = vmul.f32 1.442695, %v4288_v54 }
 0xf12   :  { %5302 = vpow2.f32 %v4289_v23 }
 0xf1f   :  { %v5303_v39 = vpop.eup %5302 }
 0xf20   :  { %v4629_v17 = vadd.f32 -1.0, %v5303_v39 }
 0xf22   :  { %v4292_v20 = vsel %vm4287_vm12, %v4284_v14, %v4629_v17 }
 0xf23   :  { %5228 = vmatpush3.xpose.msk.msra.mxu1 %vm223_vm2, %v4292_v20 }
 0xf26   :  { %5230 = vmatmul.mubr.msk.f32.vlgmr.msra.gmra.mxu1 %vm223_vm2, %v27_v52 }
 0xfe6   :  { %v4370_v22 = vpop.f32.mrf.mxu1 }
 0xfe7   :  { %v4371_v3 = vadd.f32 %v4370_v22, %v4296_v53 }
 0xfe8   :  { %v5231_v50 = vpop.f32.mrf.mxu1 }
 0xfe9   :  { %v4374_v42 = vsub.f32 0.0, %v4371_v3 }
 0xfeb   :  { %v4375_v59 = vmul.f32 1.442695, %v4374_v42 }
 0xfed   :  { %5304 = vpow2.f32 %v4375_v59 }
 0xffa   :  { %v5305_v58 = vpop.eup %5304 }
 0xffb   :  { %v4377_v40 = vadd.f32 1.0, %v5305_v58 }
 0xffd   :  { %5306 = vrcp.f32 %v4377_v40 }
0x100a   :  { %v5307_v29 = vpop.eup %5306 }
0x100b   :  { %4381 = vst.msk [vmem:[#allocation2] sm:$0x1] %vm4380_vm1, %v5307_v29 }
0x100c   :  { %5319 = shalt.err (!%p5316_p4)
}
0x100d   :  { %4391 = dma.vmem_to_hbm [thread:$0]  %s4389_s0, 16, %s6705_s2, [#allocation3]  }
0x100e   :  { %5328 = dma.done.wait [#allocation3], 16  }
0x100f   :  { %5329 = vsyncadd [#allocation3], 4294967280 }
0x1010   :  { %4395 = vsyncpa [#allocation3], 1 }

</bundles_post_ra>
